<compile_context>
chip_gen: v7x
topology: tpu7x:2x2x1
jax: 0.10.0
libtpu: 0.0.40
codegen_flags: <defaults>
</compile_context>

<pallas_src>
import functools

import jax
import jax.numpy as jnp
from jax.experimental import pallas as pl
from jax.experimental.pallas import tpu as pltpu


def _round_up(x, m):
    return ((x + m - 1) // m) * m


def _mlp_kernel(x_ref, w1_ref, b1_ref, w2_ref, b2_ref, w3_ref, b3_ref,
                w4_ref, b4_ref, o_ref):
    # x_ref: (TB, n_pixels) f32 -> cast to bf16 on the VPU inside VMEM.
    h = x_ref[...].astype(jnp.bfloat16)
    # Three hidden layers: bf16 MXU matmul, f32 accumulate, f32 bias add,
    # cast-to-bf16 then ReLU (identical to ReLU-then-cast, cheaper on bf16 VPU).
    h = jnp.dot(h, w1_ref[...], preferred_element_type=jnp.float32) + b1_ref[...]
    h = jnp.maximum(h.astype(jnp.bfloat16), 0.0)                     # (TB, 512)
    h = jnp.dot(h, w2_ref[...], preferred_element_type=jnp.float32) + b2_ref[...]
    h = jnp.maximum(h.astype(jnp.bfloat16), 0.0)                     # (TB, 512)
    h = jnp.dot(h, w3_ref[...], preferred_element_type=jnp.float32) + b3_ref[...]
    h = jnp.maximum(h.astype(jnp.bfloat16), 0.0)                     # (TB, 512)
    # Final 512 -> 1 layer as a batch-transposed matmul so the logits land
    # lane-dense along the batch axis.  w4_ref is (8, 512) bf16, row 0 real.
    s = jax.lax.dot_general(
        w4_ref[...], h,
        dimension_numbers=(((1,), (1,)), ((), ())),
        preferred_element_type=jnp.float32)                          # (8, TB)
    o_ref[...] = (s + b4_ref[...]).reshape(o_ref.shape)              # (1, 8, TB)


@functools.partial(jax.jit, static_argnames=("tb_max",))
def baseline_nn_forward(image, params, *, tb_max=1024):
    """image: (B, slen, slen) or (B, n_pixels). Returns (B, 1) float32."""
    w1, b1, w2, b2, w3, b3, w4, b4 = params
    n_pixels, hidden = w1.shape

    x = image.reshape(-1, n_pixels).astype(jnp.float32)
    B = x.shape[0]

    # bf16 weights for the MXU; biases stay f32 (added post-accumulation).
    w1b = w1.astype(jnp.bfloat16)
    w2b = w2.astype(jnp.bfloat16)
    w3b = w3.astype(jnp.bfloat16)
    b1f = b1.reshape(1, hidden).astype(jnp.float32)
    b2f = b2.reshape(1, hidden).astype(jnp.float32)
    b3f = b3.reshape(1, hidden).astype(jnp.float32)
    # Final layer packed as (8, hidden) bf16, real weights in row 0.
    w4t = jnp.zeros((8, hidden), jnp.bfloat16).at[0, :].set(
        w4.reshape(hidden).astype(jnp.bfloat16))
    b4f = b4.reshape(1, 1).astype(jnp.float32)

    # Batch tiling: TB multiple of 128; an even number of >=2 grid steps once
    # B > 128 (keeps both v7x TensorCores busy); steps chosen so the padded
    # batch divides nearly evenly (bounded tail waste).
    steps = pl.cdiv(B, tb_max)
    if B > 128:
        steps = _round_up(max(steps, 2), 2)
    TB = _round_up(pl.cdiv(B, steps), 128)
    B_pad = steps * TB
    if B_pad != B:
        x = jnp.pad(x, ((0, B_pad - B), (0, 0)))

    def resident(shape):
        # Constant index map -> DMA'd once, stays VMEM-resident across steps.
        return pl.BlockSpec(shape, lambda i: (0, 0))

    out = pl.pallas_call(
        _mlp_kernel,
        out_shape=jax.ShapeDtypeStruct((steps, 8, TB), jnp.float32),
        grid=(steps,),
        in_specs=[
            pl.BlockSpec((TB, n_pixels), lambda i: (i, 0)),
            resident(w1b.shape), resident(b1f.shape),
            resident(w2b.shape), resident(b2f.shape),
            resident(w3b.shape), resident(b3f.shape),
            resident(w4t.shape), resident(b4f.shape),
        ],
        out_specs=pl.BlockSpec((1, 8, TB), lambda i: (i, 0, 0)),
        compiler_params=pltpu.CompilerParams(
            dimension_semantics=("parallel",),
            vmem_limit_bytes=48 * 1024 * 1024,
        ),
    )(x, w1b, b1f, w2b, b2f, w3b, b3f, w4t, b4f)

    # Row 0 of each (8, TB) slab holds the real logits, batch along lanes.
    logits = out[:, 0, :].reshape(B_pad)[:B]
    return logits.reshape(B, 1)


def init_params(key, slen=28, hidden=512):
    """Deterministic synthetic init (PyTorch-Linear-like uniform fan-in)."""
    n_pixels = slen * slen
    dims = [(n_pixels, hidden), (hidden, hidden), (hidden, hidden), (hidden, 1)]
    params = []
    for (fan_in, fan_out) in dims:
        key, kw, kb = jax.random.split(key, 3)
        bound = 1.0 / jnp.sqrt(float(fan_in))
        w = jax.random.uniform(kw, (fan_in, fan_out), jnp.float32, -bound, bound)
        b = jax.random.uniform(kb, (1, fan_out), jnp.float32, -bound, bound)
        params += [w, b]
    return tuple(params)


def _reference_forward_bf16(image, params):
    """Plain-JAX reference mirroring the kernel's bf16/f32-accumulate math."""
    w1, b1, w2, b2, w3, b3, w4, b4 = params
    h = image.reshape(-1, w1.shape[0]).astype(jnp.bfloat16)
    for w, b in ((w1, b1), (w2, b2), (w3, b3)):
        h = jnp.dot(h, w.astype(jnp.bfloat16),
                    preferred_element_type=jnp.float32) + b.astype(jnp.float32)
        h = jnp.maximum(h.astype(jnp.bfloat16), 0.0)
    return (jnp.dot(h, w4.astype(jnp.bfloat16),
                    preferred_element_type=jnp.float32)
            + b4.astype(jnp.float32).reshape(1, 1))


def _reference_forward_f32(image, params):
    w1, b1, w2, b2, w3, b3, w4, b4 = params
    h = image.reshape(-1, w1.shape[0]).astype(jnp.float32)
    h = jnp.maximum(h @ w1 + b1, 0.0)
    h = jnp.maximum(h @ w2 + b2, 0.0)
    h = jnp.maximum(h @ w3 + b3, 0.0)
    return h @ w4 + b4


if __name__ == "__main__":
    key = jax.random.PRNGKey(0)
    key, k_small, k_tiled = jax.random.split(key, 3)

    slen = 28
    params = init_params(key, slen=slen)

    # Small single-step case and a multi-step (tiled, padded) case.
    for name, kimg, B in (("small", k_small, 8), ("tiled", k_tiled, 300)):
        image = jax.random.normal(kimg, (B, slen, slen), jnp.float32)

        out = jax.block_until_ready(baseline_nn_forward(image, params))
        assert out.shape == (B, 1), (name, out.shape)

        # Tight check vs. a reference doing the same bf16/f32-accumulate math.
        ref_bf16 = _reference_forward_bf16(image, params)
        err_bf16 = float(jnp.max(jnp.abs(out - ref_bf16)))
        assert jnp.allclose(out, ref_bf16, atol=2e-3, rtol=2e-3), (name, err_bf16)

        # Looser sanity check vs. the full-f32 PyTorch-equivalent forward.
        ref_f32 = _reference_forward_f32(image, params)
        err_f32 = float(jnp.max(jnp.abs(out - ref_f32)))
        assert jnp.allclose(out, ref_f32, atol=5e-2, rtol=5e-2), (name, err_f32)

    print("KERNEL_OK")
</pallas_src>

<mosaic_0001>
module attributes {stable_mosaic.version = 11 : i64} {
  func.func @_mlp_kernel(%arg0: i32, %arg1: memref<128x784xf32, #tpu.memory_space<vmem>>, %arg2: memref<784x512xbf16, #tpu.memory_space<vmem>>, %arg3: memref<1x512xf32, #tpu.memory_space<vmem>>, %arg4: memref<512x512xbf16, #tpu.memory_space<vmem>>, %arg5: memref<1x512xf32, #tpu.memory_space<vmem>>, %arg6: memref<512x512xbf16, #tpu.memory_space<vmem>>, %arg7: memref<1x512xf32, #tpu.memory_space<vmem>>, %arg8: memref<8x512xbf16, #tpu.memory_space<vmem>>, %arg9: memref<1x1xf32, #tpu.memory_space<vmem>>, %arg10: memref<1x8x128xf32, #tpu.memory_space<vmem>>) attributes {dimension_semantics = [#tpu.dimension_semantics<parallel>], iteration_bounds = array<i64: 1>, scalar_prefetch = 0 : i64, scratch_operands = 0 : i64, tpu.core_type = #tpu.core_type<tc>, window_params = [{transform_indices = @transform_0, window_bounds = array<i64: 128, 784>}, {pipeline_mode = #tpu.pipeline_mode<synchronous>, transform_indices = @transform_1, window_bounds = array<i64: 784, 512>}, {pipeline_mode = #tpu.pipeline_mode<synchronous>, transform_indices = @transform_2, window_bounds = array<i64: 1, 512>}, {pipeline_mode = #tpu.pipeline_mode<synchronous>, transform_indices = @transform_3, window_bounds = array<i64: 512, 512>}, {pipeline_mode = #tpu.pipeline_mode<synchronous>, transform_indices = @transform_4, window_bounds = array<i64: 1, 512>}, {pipeline_mode = #tpu.pipeline_mode<synchronous>, transform_indices = @transform_5, window_bounds = array<i64: 512, 512>}, {pipeline_mode = #tpu.pipeline_mode<synchronous>, transform_indices = @transform_6, window_bounds = array<i64: 1, 512>}, {pipeline_mode = #tpu.pipeline_mode<synchronous>, transform_indices = @transform_7, window_bounds = array<i64: 8, 512>}, {pipeline_mode = #tpu.pipeline_mode<synchronous>, transform_indices = @transform_8, window_bounds = array<i64: 1, 1>}, {transform_indices = @transform_9, window_bounds = array<i64: 1, 8, 128>}]} {
    %c0 = arith.constant 0 : index
    %c0_0 = arith.constant 0 : index
    %0 = vector.load %arg1[%c0, %c0_0] : memref<128x784xf32, #tpu.memory_space<vmem>>, vector<128x784xf32>
    %1 = arith.truncf %0 : vector<128x784xf32> to vector<128x784xbf16>
    %c0_1 = arith.constant 0 : index
    %c0_2 = arith.constant 0 : index
    %2 = vector.load %arg2[%c0_1, %c0_2] : memref<784x512xbf16, #tpu.memory_space<vmem>>, vector<784x512xbf16>
    %cst = arith.constant dense<0.000000e+00> : vector<128x512xf32>
    %3 = tpu.matmul %1, %2, %cst {dimension_numbers = #tpu.dot_dimension_numbers<[1], [0], [0], [1], [0, 0, 1, 1], [], []>} : vector<128x784xbf16>, vector<784x512xbf16>, vector<128x512xf32> -> vector<128x512xf32>
    %c0_3 = arith.constant 0 : index
    %c0_4 = arith.constant 0 : index
    %4 = vector.load %arg3[%c0_3, %c0_4] : memref<1x512xf32, #tpu.memory_space<vmem>>, vector<1x512xf32>
    %5 = vector.broadcast %4 : vector<1x512xf32> to vector<128x512xf32>
    %6 = arith.addf %3, %5 : vector<128x512xf32>
    %7 = arith.truncf %6 : vector<128x512xf32> to vector<128x512xbf16>
    %cst_5 = arith.constant 0.000000e+00 : bf16
    %8 = vector.broadcast %cst_5 : bf16 to vector<128x512xbf16>
    %9 = arith.maximumf %7, %8 : vector<128x512xbf16>
    %c0_6 = arith.constant 0 : index
    %c0_7 = arith.constant 0 : index
    %10 = vector.load %arg4[%c0_6, %c0_7] : memref<512x512xbf16, #tpu.memory_space<vmem>>, vector<512x512xbf16>
    %cst_8 = arith.constant dense<0.000000e+00> : vector<128x512xf32>
    %11 = tpu.matmul %9, %10, %cst_8 {dimension_numbers = #tpu.dot_dimension_numbers<[1], [0], [0], [1], [0, 0, 1, 1], [], []>} : vector<128x512xbf16>, vector<512x512xbf16>, vector<128x512xf32> -> vector<128x512xf32>
    %c0_9 = arith.constant 0 : index
    %c0_10 = arith.constant 0 : index
    %12 = vector.load %arg5[%c0_9, %c0_10] : memref<1x512xf32, #tpu.memory_space<vmem>>, vector<1x512xf32>
    %13 = vector.broadcast %12 : vector<1x512xf32> to vector<128x512xf32>
    %14 = arith.addf %11, %13 : vector<128x512xf32>
    %15 = arith.truncf %14 : vector<128x512xf32> to vector<128x512xbf16>
    %cst_11 = arith.constant 0.000000e+00 : bf16
    %16 = vector.broadcast %cst_11 : bf16 to vector<128x512xbf16>
    %17 = arith.maximumf %15, %16 : vector<128x512xbf16>
    %c0_12 = arith.constant 0 : index
    %c0_13 = arith.constant 0 : index
    %18 = vector.load %arg6[%c0_12, %c0_13] : memref<512x512xbf16, #tpu.memory_space<vmem>>, vector<512x512xbf16>
    %cst_14 = arith.constant dense<0.000000e+00> : vector<128x512xf32>
    %19 = tpu.matmul %17, %18, %cst_14 {dimension_numbers = #tpu.dot_dimension_numbers<[1], [0], [0], [1], [0, 0, 1, 1], [], []>} : vector<128x512xbf16>, vector<512x512xbf16>, vector<128x512xf32> -> vector<128x512xf32>
    %c0_15 = arith.constant 0 : index
    %c0_16 = arith.constant 0 : index
    %20 = vector.load %arg7[%c0_15, %c0_16] : memref<1x512xf32, #tpu.memory_space<vmem>>, vector<1x512xf32>
    %21 = vector.broadcast %20 : vector<1x512xf32> to vector<128x512xf32>
    %22 = arith.addf %19, %21 : vector<128x512xf32>
    %23 = arith.truncf %22 : vector<128x512xf32> to vector<128x512xbf16>
    %cst_17 = arith.constant 0.000000e+00 : bf16
    %24 = vector.broadcast %cst_17 : bf16 to vector<128x512xbf16>
    %25 = arith.maximumf %23, %24 : vector<128x512xbf16>
    %c0_18 = arith.constant 0 : index
    %c0_19 = arith.constant 0 : index
    %26 = vector.load %arg8[%c0_18, %c0_19] : memref<8x512xbf16, #tpu.memory_space<vmem>>, vector<8x512xbf16>
    %cst_20 = arith.constant dense<0.000000e+00> : vector<8x128xf32>
    %27 = tpu.matmul %26, %25, %cst_20 {dimension_numbers = #tpu.dot_dimension_numbers<[1], [1], [0], [0], [0, 0, 1, 0], [], []>} : vector<8x512xbf16>, vector<128x512xbf16>, vector<8x128xf32> -> vector<8x128xf32>
    %c0_21 = arith.constant 0 : index
    %c0_22 = arith.constant 0 : index
    %28 = vector.load %arg9[%c0_21, %c0_22] : memref<1x1xf32, #tpu.memory_space<vmem>>, vector<1x1xf32>
    %29 = vector.broadcast %28 : vector<1x1xf32> to vector<8x128xf32>
    %30 = arith.addf %27, %29 : vector<8x128xf32>
    %31 = vector.shape_cast %30 : vector<8x128xf32> to vector<1x8x128xf32>
    %c0_23 = arith.constant 0 : index
    %c0_24 = arith.constant 0 : index
    %c0_25 = arith.constant 0 : index
    %32 = vector.load %arg10[%c0_23, %c0_24, %c0_25] : memref<1x8x128xf32, #tpu.memory_space<vmem>>, vector<1x8x128xf32>
    tpu.vector_store %arg10[%c0_23, %c0_24, %c0_25], %31 {strides = array<i32>} : memref<1x8x128xf32, #tpu.memory_space<vmem>>, vector<1x8x128xf32>,
    return
  }
  func.func @transform_0(%arg0: i32) -> (i32, i32) {
    %c0_i32 = arith.constant 0 : i32
    %c0_i32_0 = arith.constant 0 : i32
    return %arg0, %c0_i32 : i32, i32
  }
  func.func @transform_1(%arg0: i32) -> (i32, i32) {
    %c0_i32 = arith.constant 0 : i32
    %c0_i32_0 = arith.constant 0 : i32
    %c0_i32_1 = arith.constant 0 : i32
    return %c0_i32, %c0_i32_0 : i32, i32
  }
  func.func @transform_2(%arg0: i32) -> (i32, i32) {
    %c0_i32 = arith.constant 0 : i32
    %c0_i32_0 = arith.constant 0 : i32
    %c0_i32_1 = arith.constant 0 : i32
    return %c0_i32, %c0_i32_0 : i32, i32
  }
  func.func @transform_3(%arg0: i32) -> (i32, i32) {
    %c0_i32 = arith.constant 0 : i32
    %c0_i32_0 = arith.constant 0 : i32
    %c0_i32_1 = arith.constant 0 : i32
    return %c0_i32, %c0_i32_0 : i32, i32
  }
  func.func @transform_4(%arg0: i32) -> (i32, i32) {
    %c0_i32 = arith.constant 0 : i32
    %c0_i32_0 = arith.constant 0 : i32
    %c0_i32_1 = arith.constant 0 : i32
    return %c0_i32, %c0_i32_0 : i32, i32
  }
  func.func @transform_5(%arg0: i32) -> (i32, i32) {
    %c0_i32 = arith.constant 0 : i32
    %c0_i32_0 = arith.constant 0 : i32
    %c0_i32_1 = arith.constant 0 : i32
    return %c0_i32, %c0_i32_0 : i32, i32
  }
  func.func @transform_6(%arg0: i32) -> (i32, i32) {
    %c0_i32 = arith.constant 0 : i32
    %c0_i32_0 = arith.constant 0 : i32
    %c0_i32_1 = arith.constant 0 : i32
    return %c0_i32, %c0_i32_0 : i32, i32
  }
  func.func @transform_7(%arg0: i32) -> (i32, i32) {
    %c0_i32 = arith.constant 0 : i32
    %c0_i32_0 = arith.constant 0 : i32
    %c0_i32_1 = arith.constant 0 : i32
    return %c0_i32, %c0_i32_0 : i32, i32
  }
  func.func @transform_8(%arg0: i32) -> (i32, i32) {
    %c0_i32 = arith.constant 0 : i32
    %c0_i32_0 = arith.constant 0 : i32
    %c0_i32_1 = arith.constant 0 : i32
    return %c0_i32, %c0_i32_0 : i32, i32
  }
  func.func @transform_9(%arg0: i32) -> (i32, i32, i32) {
    %c0_i32 = arith.constant 0 : i32
    %c0_i32_0 = arith.constant 0 : i32
    %c0_i32_1 = arith.constant 0 : i32
    return %arg0, %c0_i32, %c0_i32_0 : i32, i32, i32
  }
}

</mosaic_0001>

<bundles_post_ra>
// kernel: baseline_nn_forward.1
= control target key start
LH: loop header
LB: loop body
LE: loop exit
PB: predicated region body
PF: predicated region fallthrough
CT: control target
= control target key end

     0   :  { %v6791_v1 = vmov 0   ;;  %vm1401_vm0 = vcmask 130048   ;;  %s9327_s1 = inlined_call_operand.vmem [shape: bf16[784,512], index: 1, kind: input, shape index: {}]   ;;  %s9328_s0 = inlined_call_operand.vmem [shape: f32[128,784], index: 0, kind: input, shape index: {}]   ;;  %s9329_s3 = inlined_call_operand.vmem [shape: bf16[512,512], index: 3, kind: input, shape index: {}]   ;;  %s9330_s2 = inlined_call_operand.vmem [shape: f32[1,512], index: 2, kind: input, shape index: {}]   ;;  %s9331_s5 = inlined_call_operand.vmem [shape: bf16[512,512], index: 5, kind: input, shape index: {}]   ;;  %s9332_s4 = inlined_call_operand.vmem [shape: f32[1,512], index: 4, kind: input, shape index: {}]   ;;  %s9333_s7 = inlined_call_operand.vmem [shape: bf16[8,512], index: 7, kind: input, shape index: {}]   ;;  %s9334_s6 = inlined_call_operand.vmem [shape: f32[1,512], index: 6, kind: input, shape index: {}]   ;;  %s9335_s8 = inlined_call_operand.<no memory space> [shape: f32[1,1], index: 8, kind: input, shape index: {}]   ;;  %s9336_s9 = inlined_call_operand.vmem [shape: f32[1,8,128], index: 9, kind: output, shape index: {}]  }
   0x1   :  { %v6109_v0 = vld [vmem:[%s9327_s1 + $0x4] ss:$16 sps:$4 sm:$0xff]   ;;  %1797 = vmatprep.mubr.bf16.mxu1 %v6791_v1  ;;  %6108 = vset.pattern.permute.xlu0 %v6791_v1  ;;  %v6113_v3 = vld [vmem:[%s9327_s1] ss:$16 sps:$4 sm:$0xff]   ;;  %v48_v7 = vld [vmem:[%s9328_s0 + $0x68] sm:$0xff] }
   0x2   :  { %v6111_v2 = vld [vmem:[%s9327_s1 + $0x604] ss:$16 sps:$4 sm:$0xff]   ;;  %1426 = vmatprep.subr.bf16.mxu0 %v6109_v0  ;;  %v6114_v4 = vld [vmem:[%s9327_s1 + $0x600] ss:$16 sps:$4 sm:$0xff]   ;;  %v6117_v9 = vld [vmem:[%s9327_s1 + $0x8] ss:$16 sps:$4 sm:$0xff]  }
   0x3   :  { %1765 = vmatprep.subr.bf16.mxu1 %v6111_v2  ;;  %v6115_v5 = vld [vmem:[%s9327_s1 + $0x24] ss:$16 sps:$4 sm:$0xff]   ;;  %1427 = vmatpush1.bf16.msra.mxu0 %v6113_v3  ;;  %v6119_v10 = vld [vmem:[%s9327_s1 + $0xc] ss:$16 sps:$4 sm:$0xff]   ;;  %v6120_v11 = vld [vmem:[%s9327_s1 + $0x20] ss:$16 sps:$4 sm:$0xff]  }
   0x4   :  { %v41_v6 = vld [vmem:[%s9328_s0 + $0x30] sm:$0xff]  ;;  %1766 = vmatpush1.bf16.msra.mxu1 %v6114_v4  ;;  %1428 = vmatprep.subr.bf16.mxu0 %v6115_v5  ;;  %v6123_v13 = vld [vmem:[%s9327_s1 + $0x28] ss:$16 sps:$4 sm:$0xff]   ;;  %v6125_v14 = vld [vmem:[%s9327_s1 + $0x2c] ss:$16 sps:$4 sm:$0xff]  }
   0x5   :  { %v6865_v8 = vpack.c.bf16 %v48_v7, %v41_v6  ;;  %v6121_v12 = vld [vmem:[%s9327_s1 + $0x44] ss:$16 sps:$4 sm:$0xff]   ;;  %1878 = vmatprep.subr.bf16.mxu1 %v6119_v10  ;;  %v6126_v15 = vld [vmem:[%s9327_s1 + $0x40] ss:$16 sps:$4 sm:$0xff]   ;;  %v62_v18 = vld [vmem:[%s9328_s0 + $0xd8] sm:$0xff] }
   0x6   :  { %v6127_v16 = vld [vmem:[%s9327_s1 + $0x64] ss:$16 sps:$4 sm:$0xff]   ;;  %v6129_v20 = vld [vmem:[%s9327_s1 + $0x48] ss:$16 sps:$4 sm:$0xff]   ;;  %v6131_v21 = vld [vmem:[%s9327_s1 + $0x4c] ss:$16 sps:$4 sm:$0xff]  }
   0x7   :  { %5313 = vmatmul.mubr.msk.bf16.vlgmr.msra.gmra.mrb[0].mxu1 %vm1401_vm0, %v6865_v8  ;;  %1429 = vmatpush1.bf16.msra.mxu0 %v6120_v11  ;;  %v55_v17 = vld [vmem:[%s9328_s0 + $0xa0] sm:$0xff]  ;;  %v6135_v24 = vld [vmem:[%s9327_s1 + $0x68] ss:$16 sps:$4 sm:$0xff]   ;;  %v6137_v25 = vld [vmem:[%s9327_s1 + $0x6c] ss:$16 sps:$4 sm:$0xff]  }
   0x8   :  { %1879 = vmatpush1.bf16.msra.mxu1 %v6117_v9  ;;  %1430 = vmatprep.subr.bf16.mxu0 %v6121_v12  ;;  %v6900_v19 = vpack.c.bf16 %v62_v18, %v55_v17  ;;  %v6132_v22 = vld [vmem:[%s9327_s1 + $0x60] ss:$16 sps:$4 sm:$0xff]   ;;  %v6133_v23 = vld [vmem:[%s9327_s1 + $0x84] ss:$16 sps:$4 sm:$0xff]   ;;  %v76_v28 = vld [vmem:[%s9328_s0 + $0x148] sm:$0xff] }
   0x9   :  { %1807 = vmatprep.mubr.bf16.mxu1 %v6791_v1  ;;  %1880 = vmatprep.subr.bf16.mxu1 %v6125_v14  ;;  %v6138_v26 = vld [vmem:[%s9327_s1 + $0x80] ss:$16 sps:$4 sm:$0xff]   ;;  %v6139_v29 = vld [vmem:[%s9327_s1 + $0xa4] ss:$16 sps:$4 sm:$0xff]   ;;  %v6143_v30 = vld [vmem:[%s9327_s1 + $0x8c] ss:$16 sps:$4 sm:$0xff]  }
   0xa   :  { %v69_v27 = vld [vmem:[%s9328_s0 + $0x110] sm:$0xff]  ;;  %v6141_v32 = vld [vmem:[%s9327_s1 + $0x88] ss:$16 sps:$4 sm:$0xff]   ;;  %v6149_v35 = vld [vmem:[%s9327_s1 + $0xac] ss:$16 sps:$4 sm:$0xff]  }
   0xb   :  { %1431 = vmatpush1.bf16.msra.mxu0 %v6126_v15  ;;  %v6938_v31 = vpack.c.bf16 %v76_v28, %v69_v27  ;;  %v6144_v33 = vld [vmem:[%s9327_s1 + $0xa0] ss:$16 sps:$4 sm:$0xff]   ;;  %v6145_v34 = vld [vmem:[%s9327_s1 + $0xc4] ss:$16 sps:$4 sm:$0xff]   ;;  %v6147_v36 = vld [vmem:[%s9327_s1 + $0xa8] ss:$16 sps:$4 sm:$0xff]  }
   0xc   :  { %1881 = vmatpush1.bf16.msra.mxu1 %v6123_v13  ;;  %1432 = vmatprep.subr.bf16.mxu0 %v6127_v16  ;;  %v6150_v37 = vld [vmem:[%s9327_s1 + $0xc0] ss:$16 sps:$4 sm:$0xff]   ;;  %v6151_v38 = vld [vmem:[%s9327_s1 + $0xe4] ss:$16 sps:$4 sm:$0xff]   ;;  %v90_v40 = vld [vmem:[%s9328_s0 + $0x1b8] sm:$0xff] }
   0xd   :  { %1882 = vmatprep.subr.bf16.mxu1 %v6131_v21  ;;  %v83_v39 = vld [vmem:[%s9328_s0 + $0x180] sm:$0xff]  ;;  %v6155_v41 = vld [vmem:[%s9327_s1 + $0xcc] ss:$16 sps:$4 sm:$0xff]   ;;  %v6153_v43 = vld [vmem:[%s9327_s1 + $0xc8] ss:$16 sps:$4 sm:$0xff]  }
   0xe   :  { %v6973_v42 = vpack.c.bf16 %v90_v40, %v83_v39  ;;  %v6156_v44 = vld [vmem:[%s9327_s1 + $0xe0] ss:$16 sps:$4 sm:$0xff]   ;;  %v6157_v45 = vld [vmem:[%s9327_s1 + $0x104] ss:$16 sps:$4 sm:$0xff]   ;;  %v6161_v46 = vld [vmem:[%s9327_s1 + $0xec] ss:$16 sps:$4 sm:$0xff]  }
   0xf   :  { %5314 = vmatmul.mubr.msk.bf16.gmra.mrb[4].mxu1 %vm1401_vm0, %v6900_v19  ;;  %1433 = vmatpush1.bf16.msra.mxu0 %v6132_v22  ;;  %v6159_v47 = vld [vmem:[%s9327_s1 + $0xe8] ss:$16 sps:$4 sm:$0xff]   ;;  %v6162_v48 = vld [vmem:[%s9327_s1 + $0x100] ss:$16 sps:$4 sm:$0xff]   ;;  %v6163_v51 = vld [vmem:[%s9327_s1 + $0x124] ss:$16 sps:$4 sm:$0xff]  }
  0x10   :  { %1883 = vmatpush1.bf16.msra.mxu1 %v6129_v20  ;;  %1434 = vmatprep.subr.bf16.mxu0 %v6133_v23  ;;  %v97_v49 = vld [vmem:[%s9328_s0 + $0x1f0] sm:$0xff]  ;;  %v104_v50 = vld [vmem:[%s9328_s0 + $0x228] sm:$0xff]  ;;  %v111_v60 = vld [vmem:[%s9328_s0 + $0x260] sm:$0xff] }
  0x11   :  { %1884 = vmatprep.subr.bf16.mxu1 %v6137_v25  ;;  %1817 = vmatprep.mubr.bf16.mxu1 %v6791_v1  ;;  %v6167_v52 = vld [vmem:[%s9327_s1 + $0x10c] ss:$16 sps:$4 sm:$0xff]   ;;  %v7008_v53 = vpack.c.bf16 %v104_v50, %v97_v49  ;;  %v6165_v54 = vld [vmem:[%s9327_s1 + $0x108] ss:$16 sps:$4 sm:$0xff]   ;;  %v6168_v55 = vld [vmem:[%s9327_s1 + $0x120] ss:$16 sps:$4 sm:$0xff]  }
  0x12   :  { %v6169_v56 = vld [vmem:[%s9327_s1 + $0x144] ss:$16 sps:$4 sm:$0xff]   ;;  %v6173_v57 = vld [vmem:[%s9327_s1 + $0x12c] ss:$16 sps:$4 sm:$0xff]   ;;  %v6171_v58 = vld [vmem:[%s9327_s1 + $0x128] ss:$16 sps:$4 sm:$0xff]  }
  0x13   :  { %1435 = vmatpush1.bf16.msra.mxu0 %v6138_v26  ;;  %v6174_v59 = vld [vmem:[%s9327_s1 + $0x140] ss:$16 sps:$4 sm:$0xff]   ;;  %v118_v61 = vld [vmem:[%s9328_s0 + $0x298] sm:$0xff]  ;;  %v6175_v62 = vld [vmem:[%s9327_s1 + $0x164] ss:$16 sps:$4 sm:$0xff]  }
  0x14   :  { %1885 = vmatpush1.bf16.msra.mxu1 %v6135_v24  ;;  %1436 = vmatprep.subr.bf16.mxu0 %v6139_v29  ;;  %v6179_v63 = vld [vmem:[%s9327_s1 + $0x14c] ss:$16 sps:$4 sm:$0xff]   ;;  %v7043_v0 = vpack.c.bf16 %v118_v61, %v111_v60  ;;  %v6177_v2 = vld [vmem:[%s9327_s1 + $0x148] ss:$16 sps:$4 sm:$0xff]   ;;  %v6180_v3 = vld [vmem:[%s9327_s1 + $0x160] ss:$16 sps:$4 sm:$0xff]  }
  0x15   :  { %1886 = vmatprep.subr.bf16.mxu1 %v6143_v30  ;;  %v6181_v4 = vld [vmem:[%s9327_s1 + $0x184] ss:$16 sps:$4 sm:$0xff]   ;;  %v6185_v5 = vld [vmem:[%s9327_s1 + $0x16c] ss:$16 sps:$4 sm:$0xff]   ;;  %v6183_v6 = vld [vmem:[%s9327_s1 + $0x168] ss:$16 sps:$4 sm:$0xff]  }
  0x16   :  { %v6186_v7 = vld [vmem:[%s9327_s1 + $0x180] ss:$16 sps:$4 sm:$0xff]   ;;  %v6187_v9 = vld [vmem:[%s9327_s1 + $0x1a4] ss:$16 sps:$4 sm:$0xff]   ;;  %v132_v11 = vld [vmem:[%s9328_s0 + $0x308] sm:$0xff] }
  0x17   :  { %5315 = vmatmul.mubr.msk.bf16.gmra.mrb[8].mxu1 %vm1401_vm0, %v6938_v31  ;;  %1437 = vmatpush1.bf16.msra.mxu0 %v6144_v33  ;;  %v125_v10 = vld [vmem:[%s9328_s0 + $0x2d0] sm:$0xff]  ;;  %v36_v12 = vld [vmem:[%s9328_s0 + $0x8] sm:$0xff]  ;;  %v43_v13 = vld [vmem:[%s9328_s0 + $0x40] sm:$0xff] }
  0x18   :  { %1887 = vmatpush1.bf16.msra.mxu1 %v6141_v32  ;;  %1438 = vmatprep.subr.bf16.mxu0 %v6145_v34  ;;  %v6191_v14 = vld [vmem:[%s9327_s1 + $0x18c] ss:$16 sps:$4 sm:$0xff]   ;;  %v148_v15 = vpack.c.bf16 %v43_v13, %v36_v12  ;;  %v7084_v16 = vpack.c.bf16 %v132_v11, %v125_v10  ;;  %v6189_v17 = vld [vmem:[%s9327_s1 + $0x188] ss:$16 sps:$4 sm:$0xff]   ;;  %v6192_v18 = vld [vmem:[%s9327_s1 + $0x1a0] ss:$16 sps:$4 sm:$0xff]  }
  0x19   :  { %1888 = vmatprep.subr.bf16.mxu1 %v6149_v35  ;;  %1827 = vmatprep.mubr.bf16.mxu1 %v6791_v1  ;;  %v6193_v20 = vld [vmem:[%s9327_s1 + $0x1c4] ss:$16 sps:$4 sm:$0xff]   ;;  %v6197_v21 = vld [vmem:[%s9327_s1 + $0x1ac] ss:$16 sps:$4 sm:$0xff]   ;;  %v6195_v22 = vld [vmem:[%s9327_s1 + $0x1a8] ss:$16 sps:$4 sm:$0xff]  }
  0x1a   :  { %1458 = vmatprep.mubr.bf16.mxu0 %v148_v15  ;;  %v6198_v23 = vld [vmem:[%s9327_s1 + $0x1c0] ss:$16 sps:$4 sm:$0xff]   ;;  %v6199_v24 = vld [vmem:[%s9327_s1 + $0x1e4] ss:$16 sps:$4 sm:$0xff]   ;;  %v146_v26 = vld [vmem:[%s9328_s0 + $0x378] sm:$0xff] }
  0x1b   :  { %1439 = vmatpush1.bf16.msra.mxu0 %v6150_v37  ;;  %v139_v25 = vld [vmem:[%s9328_s0 + $0x340] sm:$0xff]  ;;  %v6203_v27 = vld [vmem:[%s9327_s1 + $0x1cc] ss:$16 sps:$4 sm:$0xff]   ;;  %v6201_v28 = vld [vmem:[%s9327_s1 + $0x1c8] ss:$16 sps:$4 sm:$0xff]  }
  0x1c   :  { %1889 = vmatpush1.bf16.msra.mxu1 %v6147_v36  ;;  %1440 = vmatprep.subr.bf16.mxu0 %v6151_v38  ;;  %v7122_v29 = vpack.c.bf16 %v146_v26, %v139_v25  ;;  %v6204_v30 = vld [vmem:[%s9327_s1 + $0x1e0] ss:$16 sps:$4 sm:$0xff]   ;;  %v42_v33 = vld [vmem:[%s9328_s0 + $0x38] sm:$0xff]  ;;  %v6207_v34 = vld [vmem:[%s9327_s1 + $0x204] ss:$16 sps:$4 sm:$0xff]  }
  0x1d   :  { %1890 = vmatprep.subr.bf16.mxu1 %v6155_v41  ;;  %v35_v32 = vld [vmem:[%s9328_s0] sm:$0xff]  ;;  %v6210_v35 = vld [vmem:[%s9327_s1 + $0x1ec] ss:$16 sps:$4 sm:$0xff]   ;;  %v6208_v37 = vld [vmem:[%s9327_s1 + $0x1e8] ss:$16 sps:$4 sm:$0xff]  }
  0x1e   :  { %v6205_v36 = vld [vmem:[%s9327_s1 + $0x200] ss:$16 sps:$4 sm:$0xff]   ;;  %v147_v38 = vpack.c.bf16 %v42_v33, %v35_v32  ;;  %v50_v39 = vld [vmem:[%s9328_s0 + $0x78] sm:$0xff]  ;;  %v6213_v41 = vld [vmem:[%s9327_s1 + $0x224] ss:$16 sps:$4 sm:$0xff]  }
  0x1f   :  { %5316 = vmatmul.mubr.msk.bf16.gmra.mrb[12].mxu1 %vm1401_vm0, %v6973_v42  ;;  %1441 = vmatpush1.bf16.msra.mxu0 %v6156_v44  ;;  %v57_v40 = vld [vmem:[%s9328_s0 + $0xb0] sm:$0xff]  ;;  %v6222_v50 = vld [vmem:[%s9327_s1 + $0x22c] ss:$16 sps:$4 sm:$0xff]   ;;  %v6226_v61 = vld [vmem:[%s9327_s1 + $0x248] ss:$16 sps:$4 sm:$0xff]  }
  0x20   :  { %1891 = vmatpush1.bf16.msra.mxu1 %v6153_v43  ;;  %1442 = vmatprep.subr.bf16.mxu0 %v6157_v45  ;;  %v6216_v43 = vld [vmem:[%s9327_s1 + $0x20c] ss:$16 sps:$4 sm:$0xff]   ;;  %v155_v44 = vpack.c.bf16 %v57_v40, %v50_v39  ;;  %v6211_v45 = vld [vmem:[%s9327_s1 + $0x220] ss:$16 sps:$4 sm:$0xff]   ;;  %v6219_v49 = vld [vmem:[%s9327_s1 + $0x244] ss:$16 sps:$4 sm:$0xff]  }
  0x21   :  { %1892 = vmatprep.subr.bf16.mxu1 %v6161_v46  ;;  %1837 = vmatprep.mubr.bf16.mxu1 %v6791_v1  ;;  %v6214_v46 = vld [vmem:[%s9327_s1 + $0x208] ss:$16 sps:$4 sm:$0xff]   ;;  %v6237_v10 = vld [vmem:[%s9327_s1 + $0x2a4] ss:$16 sps:$4 sm:$0xff]   ;;  %v6240_v11 = vld [vmem:[%s9327_s1 + $0x28c] ss:$16 sps:$4 sm:$0xff]  }
  0x22   :  { %v6235_v12 = vld [vmem:[%s9327_s1 + $0x2a0] ss:$16 sps:$4 sm:$0xff]   ;;  %v6238_v13 = vld [vmem:[%s9327_s1 + $0x288] ss:$16 sps:$4 sm:$0xff]   ;;  %v6249_v26 = vld [vmem:[%s9327_s1 + $0x2e4] ss:$16 sps:$4 sm:$0xff]  }
  0x23   :  { %1443 = vmatpush1.bf16.msra.mxu0 %v6162_v48  ;;  %v56_v48 = vld [vmem:[%s9328_s0 + $0xa8] sm:$0xff]  ;;  %v91_v33 = vld [vmem:[%s9328_s0 + $0x1c0] sm:$0xff]  ;;  %v106_v40 = vld [vmem:[%s9328_s0 + $0x238] sm:$0xff] }
  0x24   :  { %1893 = vmatpush1.bf16.msra.mxu1 %v6159_v47  ;;  %1444 = vmatprep.subr.bf16.mxu0 %v6163_v51  ;;  %v49_v47 = vld [vmem:[%s9328_s0 + $0x70] sm:$0xff]  ;;  %v6244_v25 = vld [vmem:[%s9327_s1 + $0x2a8] ss:$16 sps:$4 sm:$0xff]  }
  0x25   :  { %1894 = vmatprep.subr.bf16.mxu1 %v6167_v52  ;;  %v6217_v51 = vld [vmem:[%s9327_s1 + $0x240] ss:$16 sps:$4 sm:$0xff]   ;;  %v6220_v52 = vld [vmem:[%s9327_s1 + $0x228] ss:$16 sps:$4 sm:$0xff]  }
  0x26   :  { %v6256_v39 = vld [vmem:[%s9327_s1 + $0x2e8] ss:$16 sps:$4 sm:$0xff]  }
  0x27   :  { %5317 = vmatmul.mubr.msk.bf16.gmra.mrb[16].mxu1 %vm1401_vm0, %v7008_v53  ;;  %1445 = vmatpush1.bf16.msra.mxu0 %v6168_v55  ;;  %v64_v55 = vld [vmem:[%s9328_s0 + $0xe8] sm:$0xff] }
  0x28   :  { %1895 = vmatpush1.bf16.msra.mxu1 %v6165_v54  ;;  %1446 = vmatprep.subr.bf16.mxu0 %v6169_v56  ;;  %v154_v54 = vpack.c.bf16 %v56_v48, %v49_v47  ;;  %v71_v56 = vld [vmem:[%s9328_s0 + $0x120] sm:$0xff]  ;;  %v6262_v47 = vld [vmem:[%s9327_s1 + $0x308] ss:$16 sps:$4 sm:$0xff]   ;;  %v105_v48 = vld [vmem:[%s9328_s0 + $0x230] sm:$0xff] }
  0x29   :  { %1896 = vmatprep.subr.bf16.mxu1 %v6173_v57  ;;  %1847 = vmatprep.mubr.bf16.mxu1 %v6791_v1  ;;  %v6225_v57 = vld [vmem:[%s9327_s1 + $0x264] ss:$16 sps:$4 sm:$0xff]   ;;  %v162_v60 = vpack.c.bf16 %v71_v56, %v64_v55  ;;  %v120_v56 = vld [vmem:[%s9328_s0 + $0x2a8] sm:$0xff] }
  0x2b   :  { %1447 = vmatpush1.bf16.msra.mxu0 %v6174_v59  ;;  %v6223_v59 = vld [vmem:[%s9327_s1 + $0x260] ss:$16 sps:$4 sm:$0xff]  }
  0x2c   :  { %1897 = vmatpush1.bf16.msra.mxu1 %v6171_v58  ;;  %1448 = vmatprep.subr.bf16.mxu0 %v6175_v62  ;;  %v6228_v58 = vld [vmem:[%s9327_s1 + $0x24c] ss:$16 sps:$4 sm:$0xff]   ;;  %v63_v62 = vld [vmem:[%s9328_s0 + $0xe0] sm:$0xff] }
  0x2d   :  { %1898 = vmatprep.subr.bf16.mxu1 %v6179_v63  ;;  %v70_v63 = vld [vmem:[%s9328_s0 + $0x118] sm:$0xff] }
  0x2f   :  { %5318 = vmatmul.mubr.msk.bf16.gmra.mrb[20].mxu1 %vm1401_vm0, %v7043_v0  ;;  %1449 = vmatpush1.bf16.msra.mxu0 %v6180_v3  ;;  %v6234_v3 = vld [vmem:[%s9327_s1 + $0x26c] ss:$16 sps:$4 sm:$0xff]  }
  0x30   :  { %1899 = vmatpush1.bf16.msra.mxu1 %v6177_v2  ;;  %1450 = vmatprep.subr.bf16.mxu0 %v6181_v4  ;;  %v6231_v2 = vld [vmem:[%s9327_s1 + $0x284] ss:$16 sps:$4 sm:$0xff]   ;;  %v6229_v4 = vld [vmem:[%s9327_s1 + $0x280] ss:$16 sps:$4 sm:$0xff]  }
  0x31   :  { %1900 = vmatprep.subr.bf16.mxu1 %v6185_v5  ;;  %1857 = vmatprep.mubr.bf16.mxu1 %v6791_v1  ;;  %v161_v5 = vpack.c.bf16 %v70_v63, %v63_v62  ;;  %v6274_v62 = vld [vmem:[%s9327_s1 + $0x348] ss:$16 sps:$4 sm:$0xff]   ;;  %v119_v63 = vld [vmem:[%s9328_s0 + $0x2a0] sm:$0xff] }
  0x33   :  { %1451 = vmatpush1.bf16.msra.mxu0 %v6186_v7  ;;  %v85_v7 = vld [vmem:[%s9328_s0 + $0x190] sm:$0xff] }
  0x34   :  { %1901 = vmatpush1.bf16.msra.mxu1 %v6183_v6  ;;  %1452 = vmatprep.subr.bf16.mxu0 %v6187_v9  ;;  %v78_v6 = vld [vmem:[%s9328_s0 + $0x158] sm:$0xff] }
  0x35   :  { %1902 = vmatprep.subr.bf16.mxu1 %v6191_v14  ;;  %v6232_v9 = vld [vmem:[%s9327_s1 + $0x268] ss:$16 sps:$4 sm:$0xff]   ;;  %v169_v14 = vpack.c.bf16 %v85_v7, %v78_v6 }
  0x36   :  { %v6280_v6 = vld [vmem:[%s9327_s1 + $0x368] ss:$16 sps:$4 sm:$0xff]  }
  0x37   :  { %5319 = vmatmul.mubr.msk.bf16.gmra.mrb[24].mxu1 %vm1401_vm0, %v7084_v16  ;;  %1453 = vmatpush1.bf16.msra.mxu0 %v6192_v18  ;;  %v6243_v18 = vld [vmem:[%s9327_s1 + $0x2c4] ss:$16 sps:$4 sm:$0xff]  }
  0x38   :  { %1903 = vmatpush1.bf16.msra.mxu1 %v6189_v17  ;;  %1454 = vmatprep.subr.bf16.mxu0 %v6193_v20  ;;  %v84_v17 = vld [vmem:[%s9328_s0 + $0x188] sm:$0xff] }
  0x39   :  { %1904 = vmatprep.subr.bf16.mxu1 %v6197_v21  ;;  %1867 = vmatprep.mubr.bf16.mxu1 %v6791_v1  ;;  %v6246_v20 = vld [vmem:[%s9327_s1 + $0x2ac] ss:$16 sps:$4 sm:$0xff]  }
  0x3b   :  { %1455 = vmatpush1.bf16.msra.mxu0 %v6198_v23  ;;  %v99_v23 = vld [vmem:[%s9328_s0 + $0x200] sm:$0xff] }
  0x3c   :  { %1905 = vmatpush1.bf16.msra.mxu1 %v6195_v22  ;;  %1456 = vmatprep.subr.bf16.mxu0 %v6199_v24  ;;  %v92_v22 = vld [vmem:[%s9328_s0 + $0x1c8] sm:$0xff]  ;;  %v6241_v24 = vld [vmem:[%s9327_s1 + $0x2c0] ss:$16 sps:$4 sm:$0xff]  }
  0x3d   :  { %1906 = vmatprep.subr.bf16.mxu1 %v6203_v27  ;;  %v6252_v27 = vld [vmem:[%s9327_s1 + $0x2cc] ss:$16 sps:$4 sm:$0xff]   ;;  %v176_v32 = vpack.c.bf16 %v99_v23, %v92_v22  ;;  %v6289_v22 = vld [vmem:[%s9327_s1 + $0x3c0] ss:$16 sps:$4 sm:$0xff]  }
  0x3f   :  { %5320 = vmatmul.mubr.msk.bf16.gmra.mrb[28].mxu1 %vm1401_vm0, %v7122_v29  ;;  %1457 = vmatpush1.bf16.msra.mxu0 %v6204_v30  ;;  %v6250_v30 = vld [vmem:[%s9327_s1 + $0x2c8] ss:$16 sps:$4 sm:$0xff]  }
  0x40   :  { %1907 = vmatpush1.bf16.msra.mxu1 %v6201_v28  ;;  %1539 = vmatprep.subr.bf16.mxu0 %v6207_v34  ;;  %v6247_v28 = vld [vmem:[%s9327_s1 + $0x2e0] ss:$16 sps:$4 sm:$0xff]   ;;  %v98_v34 = vld [vmem:[%s9328_s0 + $0x1f8] sm:$0xff] }
  0x41   :  { %1908 = vmatprep.subr.bf16.mxu1 %v6210_v35  ;;  %1910 = vmatprep.mubr.bf16.mxu1 %v148_v15  ;;  %v77_v15 = vld [vmem:[%s9328_s0 + $0x150] sm:$0xff] }
  0x42   :  { %1459 = vmatmul.mubr.bf16.vlgmr.msra.gmra.mrb[0].mxu0 %v147_v38  ;;  %v168_v21 = vpack.c.bf16 %v84_v17, %v77_v15  ;;  %v6255_v35 = vld [vmem:[%s9327_s1 + $0x304] ss:$16 sps:$4 sm:$0xff]   ;;  %v6286_v15 = vld [vmem:[%s9327_s1 + $0x388] ss:$16 sps:$4 sm:$0xff]  }
  0x43   :  { %1540 = vmatpush1.bf16.msra.mxu0 %v6205_v36  ;;  %1468 = vmatprep.mubr.bf16.mxu0 %v155_v44  ;;  %v6258_v36 = vld [vmem:[%s9327_s1 + $0x2ec] ss:$16 sps:$4 sm:$0xff]   ;;  %v133_v17 = vld [vmem:[%s9328_s0 + $0x310] sm:$0xff] }
  0x44   :  { %1909 = vmatpush1.bf16.msra.mxu1 %v6208_v37  ;;  %1541 = vmatprep.subr.bf16.mxu0 %v6213_v41  ;;  %v6253_v37 = vld [vmem:[%s9327_s1 + $0x300] ss:$16 sps:$4 sm:$0xff]  }
  0x45   :  { %1991 = vmatprep.subr.bf16.mxu1 %v6216_v43  ;;  %v113_v41 = vld [vmem:[%s9328_s0 + $0x270] sm:$0xff] }
  0x46   :  { %v6261_v43 = vld [vmem:[%s9327_s1 + $0x324] ss:$16 sps:$4 sm:$0xff]  }
  0x47   :  { %1911 = vmatmul.mubr.bf16.vlgmr.msra.gmra.mrb[32].mxu1 %v147_v38  ;;  %1542 = vmatpush1.bf16.msra.mxu0 %v6211_v45  ;;  %v175_v38 = vpack.c.bf16 %v98_v34, %v91_v33  ;;  %v6259_v45 = vld [vmem:[%s9327_s1 + $0x320] ss:$16 sps:$4 sm:$0xff]  }
  0x48   :  { %1992 = vmatpush1.bf16.msra.mxu1 %v6214_v46  ;;  %1543 = vmatprep.subr.bf16.mxu0 %v6219_v49  ;;  %v183_v46 = vpack.c.bf16 %v113_v41, %v106_v40  ;;  %v112_v49 = vld [vmem:[%s9328_s0 + $0x268] sm:$0xff]  ;;  %v37_v34 = vld [vmem:[%s9328_s0 + $0x10] sm:$0xff]  ;;  %v59_v40 = vld [vmem:[%s9328_s0 + $0xc0] sm:$0xff] }
  0x49   :  { %1993 = vmatprep.subr.bf16.mxu1 %v6222_v50  ;;  %1920 = vmatprep.mubr.bf16.mxu1 %v155_v44  ;;  %v6264_v44 = vld [vmem:[%s9327_s1 + $0x30c] ss:$16 sps:$4 sm:$0xff]   ;;  %v6267_v50 = vld [vmem:[%s9327_s1 + $0x344] ss:$16 sps:$4 sm:$0xff]   ;;  %v182_v55 = vpack.c.bf16 %v112_v49, %v105_v48  ;;  %v6301_v41 = vld [vmem:[%s9327_s1 + $0x400] ss:$16 sps:$4 sm:$0xff]  }
  0x4a   :  { %1469 = vmatmul.mubr.bf16.gmra.mrb[4].mxu0 %v154_v54  ;;  %v51_v49 = vld [vmem:[%s9328_s0 + $0x80] sm:$0xff] }
  0x4b   :  { %1544 = vmatpush1.bf16.msra.mxu0 %v6217_v51  ;;  %1478 = vmatprep.mubr.bf16.mxu0 %v162_v60  ;;  %v6270_v51 = vld [vmem:[%s9327_s1 + $0x32c] ss:$16 sps:$4 sm:$0xff]  }
  0x4c   :  { %1994 = vmatpush1.bf16.msra.mxu1 %v6220_v52  ;;  %1545 = vmatprep.subr.bf16.mxu0 %v6225_v57  ;;  %v6265_v52 = vld [vmem:[%s9327_s1 + $0x340] ss:$16 sps:$4 sm:$0xff]  }
  0x4d   :  { %1995 = vmatprep.subr.bf16.mxu1 %v6228_v58  ;;  %v127_v57 = vld [vmem:[%s9328_s0 + $0x2e0] sm:$0xff] }
  0x4e   :  { %v6273_v58 = vld [vmem:[%s9327_s1 + $0x364] ss:$16 sps:$4 sm:$0xff]  }
  0x4f   :  { %1921 = vmatmul.mubr.bf16.gmra.mrb[36].mxu1 %v154_v54  ;;  %1546 = vmatpush1.bf16.msra.mxu0 %v6223_v59  ;;  %v6268_v54 = vld [vmem:[%s9327_s1 + $0x328] ss:$16 sps:$4 sm:$0xff]   ;;  %v6276_v59 = vld [vmem:[%s9327_s1 + $0x34c] ss:$16 sps:$4 sm:$0xff]  }
  0x50   :  { %1996 = vmatpush1.bf16.msra.mxu1 %v6226_v61  ;;  %1547 = vmatprep.subr.bf16.mxu0 %v6231_v2  ;;  %v6271_v61 = vld [vmem:[%s9327_s1 + $0x360] ss:$16 sps:$4 sm:$0xff]   ;;  %v126_v2 = vld [vmem:[%s9328_s0 + $0x2d8] sm:$0xff] }
  0x51   :  { %1997 = vmatprep.subr.bf16.mxu1 %v6234_v3  ;;  %1930 = vmatprep.mubr.bf16.mxu1 %v162_v60  ;;  %v190_v60 = vpack.c.bf16 %v127_v57, %v120_v56  ;;  %v6279_v3 = vld [vmem:[%s9327_s1 + $0x384] ss:$16 sps:$4 sm:$0xff]   ;;  %v189_v7 = vpack.c.bf16 %v126_v2, %v119_v63  ;;  %v6316_v56 = vld [vmem:[%s9327_s1 + $0x428] ss:$16 sps:$4 sm:$0xff]  }
  0x52   :  { %1479 = vmatmul.mubr.bf16.gmra.mrb[8].mxu0 %v161_v5  ;;  %v66_v57 = vld [vmem:[%s9328_s0 + $0xf8] sm:$0xff]  ;;  %v65_v2 = vld [vmem:[%s9328_s0 + $0xf0] sm:$0xff] }
  0x53   :  { %1548 = vmatpush1.bf16.msra.mxu0 %v6229_v4  ;;  %1488 = vmatprep.mubr.bf16.mxu0 %v169_v14  ;;  %v6282_v4 = vld [vmem:[%s9327_s1 + $0x36c] ss:$16 sps:$4 sm:$0xff]   ;;  %v6322_v63 = vld [vmem:[%s9327_s1 + $0x448] ss:$16 sps:$4 sm:$0xff]  }
  0x54   :  { %1998 = vmatpush1.bf16.msra.mxu1 %v6232_v9  ;;  %1549 = vmatprep.subr.bf16.mxu0 %v6237_v10  ;;  %v134_v9 = vld [vmem:[%s9328_s0 + $0x318] sm:$0xff]  ;;  %v141_v10 = vld [vmem:[%s9328_s0 + $0x350] sm:$0xff] }
  0x55   :  { %1999 = vmatprep.subr.bf16.mxu1 %v6240_v11  ;;  %v6285_v11 = vld [vmem:[%s9327_s1 + $0x3a4] ss:$16 sps:$4 sm:$0xff]  }
  0x57   :  { %1931 = vmatmul.mubr.bf16.gmra.mrb[40].mxu1 %v161_v5  ;;  %1550 = vmatpush1.bf16.msra.mxu0 %v6235_v12  ;;  %v6277_v5 = vld [vmem:[%s9327_s1 + $0x380] ss:$16 sps:$4 sm:$0xff]   ;;  %v6288_v12 = vld [vmem:[%s9327_s1 + $0x38c] ss:$16 sps:$4 sm:$0xff]  }
  0x58   :  { %2000 = vmatpush1.bf16.msra.mxu1 %v6238_v13  ;;  %1551 = vmatprep.subr.bf16.mxu0 %v6243_v18  ;;  %v6283_v13 = vld [vmem:[%s9327_s1 + $0x3a0] ss:$16 sps:$4 sm:$0xff]   ;;  %v140_v18 = vld [vmem:[%s9328_s0 + $0x348] sm:$0xff] }
  0x59   :  { %2001 = vmatprep.subr.bf16.mxu1 %v6246_v20  ;;  %1940 = vmatprep.mubr.bf16.mxu1 %v169_v14  ;;  %v197_v14 = vpack.c.bf16 %v141_v10, %v134_v9  ;;  %v6291_v20 = vld [vmem:[%s9327_s1 + $0x3c4] ss:$16 sps:$4 sm:$0xff]   ;;  %v196_v23 = vpack.c.bf16 %v140_v18, %v133_v17  ;;  %v80_v10 = vld [vmem:[%s9328_s0 + $0x168] sm:$0xff] }
  0x5a   :  { %1489 = vmatmul.mubr.bf16.gmra.mrb[12].mxu0 %v168_v21  ;;  %v6334_v17 = vld [vmem:[%s9327_s1 + $0x488] ss:$16 sps:$4 sm:$0xff]   ;;  %v79_v18 = vld [vmem:[%s9328_s0 + $0x160] sm:$0xff] }
  0x5b   :  { %1552 = vmatpush1.bf16.msra.mxu0 %v6241_v24  ;;  %1498 = vmatprep.mubr.bf16.mxu0 %v176_v32  ;;  %v38_v24 = vld [vmem:[%s9328_s0 + $0x18] sm:$0xff] }
  0x5c   :  { %2002 = vmatpush1.bf16.msra.mxu1 %v6244_v25  ;;  %1553 = vmatprep.subr.bf16.mxu0 %v6249_v26  ;;  %v45_v25 = vld [vmem:[%s9328_s0 + $0x50] sm:$0xff]  ;;  %v6292_v26 = vld [vmem:[%s9327_s1 + $0x3a8] ss:$16 sps:$4 sm:$0xff]  }
  0x5d   :  { %2003 = vmatprep.subr.bf16.mxu1 %v6252_v27  ;;  %v6297_v27 = vld [vmem:[%s9327_s1 + $0x3e4] ss:$16 sps:$4 sm:$0xff]   ;;  %v150_v33 = vpack.c.bf16 %v45_v25, %v38_v24  ;;  %v6340_v24 = vld [vmem:[%s9327_s1 + $0x4a8] ss:$16 sps:$4 sm:$0xff]  }
  0x5f   :  { %1941 = vmatmul.mubr.bf16.gmra.mrb[44].mxu1 %v168_v21  ;;  %1554 = vmatpush1.bf16.msra.mxu0 %v6247_v28  ;;  %v6294_v21 = vld [vmem:[%s9327_s1 + $0x3ac] ss:$16 sps:$4 sm:$0xff]  }
  0x60   :  { %2004 = vmatpush1.bf16.msra.mxu1 %v6250_v30  ;;  %1555 = vmatprep.subr.bf16.mxu0 %v6255_v35  ;;  %v6300_v28 = vld [vmem:[%s9327_s1 + $0x3cc] ss:$16 sps:$4 sm:$0xff]   ;;  %v6295_v30 = vld [vmem:[%s9327_s1 + $0x3e0] ss:$16 sps:$4 sm:$0xff]  }
  0x61   :  { %2005 = vmatprep.subr.bf16.mxu1 %v6258_v36  ;;  %1950 = vmatprep.mubr.bf16.mxu1 %v176_v32  ;;  %v6298_v32 = vld [vmem:[%s9327_s1 + $0x3c8] ss:$16 sps:$4 sm:$0xff]   ;;  %v6303_v36 = vld [vmem:[%s9327_s1 + $0x404] ss:$16 sps:$4 sm:$0xff]  }
  0x62   :  { %1499 = vmatmul.mubr.bf16.gmra.mrb[16].mxu0 %v175_v38  ;;  %v44_v35 = vld [vmem:[%s9328_s0 + $0x48] sm:$0xff] }
  0x63   :  { %1556 = vmatpush1.bf16.msra.mxu0 %v6253_v37  ;;  %1508 = vmatprep.mubr.bf16.mxu0 %v183_v46  ;;  %v6306_v37 = vld [vmem:[%s9327_s1 + $0x3ec] ss:$16 sps:$4 sm:$0xff]  }
  0x64   :  { %2006 = vmatpush1.bf16.msra.mxu1 %v6256_v39  ;;  %1557 = vmatprep.subr.bf16.mxu0 %v6261_v43  ;;  %v52_v39 = vld [vmem:[%s9328_s0 + $0x88] sm:$0xff] }
  0x65   :  { %2007 = vmatprep.subr.bf16.mxu1 %v6264_v44  ;;  %v6304_v43 = vld [vmem:[%s9327_s1 + $0x3e8] ss:$16 sps:$4 sm:$0xff]   ;;  %v6309_v44 = vld [vmem:[%s9327_s1 + $0x424] ss:$16 sps:$4 sm:$0xff]   ;;  %v157_v48 = vpack.c.bf16 %v59_v40, %v52_v39 }
  0x66   :  { %v108_v40 = vld [vmem:[%s9328_s0 + $0x248] sm:$0xff] }
  0x67   :  { %1951 = vmatmul.mubr.bf16.gmra.mrb[48].mxu1 %v175_v38  ;;  %1558 = vmatpush1.bf16.msra.mxu0 %v6259_v45  ;;  %v149_v38 = vpack.c.bf16 %v44_v35, %v37_v34  ;;  %v6312_v45 = vld [vmem:[%s9327_s1 + $0x40c] ss:$16 sps:$4 sm:$0xff]   ;;  %v6346_v34 = vld [vmem:[%s9327_s1 + $0x4c8] ss:$16 sps:$4 sm:$0xff]   ;;  %v93_v35 = vld [vmem:[%s9328_s0 + $0x1d0] sm:$0xff] }
  0x68   :  { %2008 = vmatpush1.bf16.msra.mxu1 %v6262_v47  ;;  %1559 = vmatprep.subr.bf16.mxu0 %v6267_v50  ;;  %v6310_v47 = vld [vmem:[%s9327_s1 + $0x408] ss:$16 sps:$4 sm:$0xff]  }
  0x69   :  { %2009 = vmatprep.subr.bf16.mxu1 %v6270_v51  ;;  %1960 = vmatprep.mubr.bf16.mxu1 %v183_v46  ;;  %v6307_v46 = vld [vmem:[%s9327_s1 + $0x420] ss:$16 sps:$4 sm:$0xff]   ;;  %v58_v50 = vld [vmem:[%s9328_s0 + $0xb8] sm:$0xff]  ;;  %v6315_v51 = vld [vmem:[%s9327_s1 + $0x444] ss:$16 sps:$4 sm:$0xff]  }
  0x6a   :  { %1509 = vmatmul.mubr.bf16.gmra.mrb[20].mxu0 %v182_v55 }
  0x6b   :  { %1560 = vmatpush1.bf16.msra.mxu0 %v6265_v52  ;;  %1518 = vmatprep.mubr.bf16.mxu0 %v190_v60  ;;  %v6318_v52 = vld [vmem:[%s9327_s1 + $0x42c] ss:$16 sps:$4 sm:$0xff]  }
  0x6c   :  { %2010 = vmatpush1.bf16.msra.mxu1 %v6268_v54  ;;  %1561 = vmatprep.subr.bf16.mxu0 %v6273_v58  ;;  %v6313_v54 = vld [vmem:[%s9327_s1 + $0x440] ss:$16 sps:$4 sm:$0xff]  }
  0x6d   :  { %2011 = vmatprep.subr.bf16.mxu1 %v6276_v59  ;;  %v73_v58 = vld [vmem:[%s9328_s0 + $0x130] sm:$0xff] }
  0x6e   :  { %v6321_v59 = vld [vmem:[%s9327_s1 + $0x464] ss:$16 sps:$4 sm:$0xff]  }
  0x6f   :  { %1961 = vmatmul.mubr.bf16.gmra.mrb[52].mxu1 %v182_v55  ;;  %1562 = vmatpush1.bf16.msra.mxu0 %v6271_v61  ;;  %v156_v55 = vpack.c.bf16 %v58_v50, %v51_v49  ;;  %v6319_v61 = vld [vmem:[%s9327_s1 + $0x460] ss:$16 sps:$4 sm:$0xff]   ;;  %v6358_v49 = vld [vmem:[%s9327_s1 + $0x508] ss:$16 sps:$4 sm:$0xff]  }
  0x70   :  { %2012 = vmatpush1.bf16.msra.mxu1 %v6274_v62  ;;  %1563 = vmatprep.subr.bf16.mxu0 %v6279_v3  ;;  %v164_v62 = vpack.c.bf16 %v73_v58, %v66_v57  ;;  %v72_v3 = vld [vmem:[%s9328_s0 + $0x128] sm:$0xff]  ;;  %v107_v50 = vld [vmem:[%s9328_s0 + $0x240] sm:$0xff]  ;;  %v129_v57 = vld [vmem:[%s9328_s0 + $0x2f0] sm:$0xff] }
  0x71   :  { %2013 = vmatprep.subr.bf16.mxu1 %v6282_v4  ;;  %1970 = vmatprep.mubr.bf16.mxu1 %v190_v60  ;;  %v6324_v60 = vld [vmem:[%s9327_s1 + $0x44c] ss:$16 sps:$4 sm:$0xff]   ;;  %v6327_v4 = vld [vmem:[%s9327_s1 + $0x484] ss:$16 sps:$4 sm:$0xff]   ;;  %v163_v9 = vpack.c.bf16 %v72_v3, %v65_v2  ;;  %v6361_v58 = vld [vmem:[%s9327_s1 + $0x540] ss:$16 sps:$4 sm:$0xff]  }
  0x72   :  { %1519 = vmatmul.mubr.bf16.gmra.mrb[24].mxu0 %v189_v7  ;;  %v6370_v2 = vld [vmem:[%s9327_s1 + $0x548] ss:$16 sps:$4 sm:$0xff]   ;;  %v121_v3 = vld [vmem:[%s9328_s0 + $0x2b0] sm:$0xff] }
  0x73   :  { %1564 = vmatpush1.bf16.msra.mxu0 %v6277_v5  ;;  %1528 = vmatprep.mubr.bf16.mxu0 %v197_v14  ;;  %v6330_v5 = vld [vmem:[%s9327_s1 + $0x46c] ss:$16 sps:$4 sm:$0xff]  }
  0x74   :  { %2014 = vmatpush1.bf16.msra.mxu1 %v6280_v6  ;;  %1565 = vmatprep.subr.bf16.mxu0 %v6285_v11  ;;  %v6325_v6 = vld [vmem:[%s9327_s1 + $0x480] ss:$16 sps:$4 sm:$0xff]  }
  0x75   :  { %2015 = vmatprep.subr.bf16.mxu1 %v6288_v12  ;;  %v87_v11 = vld [vmem:[%s9328_s0 + $0x1a0] sm:$0xff] }
  0x76   :  { %v6333_v12 = vld [vmem:[%s9327_s1 + $0x4a4] ss:$16 sps:$4 sm:$0xff]  }
  0x77   :  { %1971 = vmatmul.mubr.bf16.gmra.mrb[56].mxu1 %v189_v7  ;;  %1566 = vmatpush1.bf16.msra.mxu0 %v6283_v13  ;;  %v6328_v7 = vld [vmem:[%s9327_s1 + $0x468] ss:$16 sps:$4 sm:$0xff]   ;;  %v6336_v13 = vld [vmem:[%s9327_s1 + $0x48c] ss:$16 sps:$4 sm:$0xff]  }
  0x78   :  { %2016 = vmatpush1.bf16.msra.mxu1 %v6286_v15  ;;  %1567 = vmatprep.subr.bf16.mxu0 %v6291_v20  ;;  %v6331_v15 = vld [vmem:[%s9327_s1 + $0x4a0] ss:$16 sps:$4 sm:$0xff]   ;;  %v86_v20 = vld [vmem:[%s9328_s0 + $0x198] sm:$0xff] }
  0x79   :  { %2017 = vmatprep.subr.bf16.mxu1 %v6294_v21  ;;  %1980 = vmatprep.mubr.bf16.mxu1 %v197_v14  ;;  %v171_v14 = vpack.c.bf16 %v87_v11, %v80_v10  ;;  %v6339_v21 = vld [vmem:[%s9327_s1 + $0x4c4] ss:$16 sps:$4 sm:$0xff]   ;;  %v170_v25 = vpack.c.bf16 %v86_v20, %v79_v18  ;;  %v6373_v11 = vld [vmem:[%s9327_s1 + $0x580] ss:$16 sps:$4 sm:$0xff]   ;;  %v6382_v18 = vld [vmem:[%s9327_s1 + $0x588] ss:$16 sps:$4 sm:$0xff]  }
  0x7a   :  { %1529 = vmatmul.mubr.bf16.gmra.mrb[28].mxu0 %v196_v23  ;;  %v143_v10 = vld [vmem:[%s9328_s0 + $0x360] sm:$0xff] }
  0x7b   :  { %1568 = vmatpush1.bf16.msra.mxu0 %v6289_v22  ;;  %1571 = vmatprep.mubr.bf16.mxu0 %v150_v33  ;;  %v6342_v22 = vld [vmem:[%s9327_s1 + $0x4ac] ss:$16 sps:$4 sm:$0xff]   ;;  %v135_v20 = vld [vmem:[%s9328_s0 + $0x320] sm:$0xff] }
  0x7c   :  { %2018 = vmatpush1.bf16.msra.mxu1 %v6292_v26  ;;  %1569 = vmatprep.subr.bf16.mxu0 %v6297_v27  ;;  %v94_v26 = vld [vmem:[%s9328_s0 + $0x1d8] sm:$0xff]  ;;  %v101_v27 = vld [vmem:[%s9328_s0 + $0x210] sm:$0xff] }
  0x7d   :  { %2019 = vmatprep.subr.bf16.mxu1 %v6300_v28  ;;  %v6345_v28 = vld [vmem:[%s9327_s1 + $0x4e4] ss:$16 sps:$4 sm:$0xff]  }
  0x7f   :  { %1981 = vmatmul.mubr.bf16.gmra.mrb[60].mxu1 %v196_v23  ;;  %1570 = vmatpush1.bf16.msra.mxu0 %v6295_v30  ;;  %v6337_v23 = vld [vmem:[%s9327_s1 + $0x4c0] ss:$16 sps:$4 sm:$0xff]   ;;  %v6348_v30 = vld [vmem:[%s9327_s1 + $0x4cc] ss:$16 sps:$4 sm:$0xff]  }
  0x80   :  { %2020 = vmatpush1.bf16.msra.mxu1 %v6298_v32  ;;  %1652 = vmatprep.subr.bf16.mxu0 %v6303_v36  ;;  %v6343_v32 = vld [vmem:[%s9327_s1 + $0x4e0] ss:$16 sps:$4 sm:$0xff]   ;;  %v100_v36 = vld [vmem:[%s9328_s0 + $0x208] sm:$0xff] }
  0x81   :  { %2021 = vmatprep.subr.bf16.mxu1 %v6306_v37  ;;  %2023 = vmatprep.mubr.bf16.mxu1 %v150_v33  ;;  %v178_v33 = vpack.c.bf16 %v101_v27, %v94_v26  ;;  %v6351_v37 = vld [vmem:[%s9327_s1 + $0x504] ss:$16 sps:$4 sm:$0xff]   ;;  %v177_v39 = vpack.c.bf16 %v100_v36, %v93_v35  ;;  %v6385_v27 = vld [vmem:[%s9327_s1 + $0x5c0] ss:$16 sps:$4 sm:$0xff]   ;;  %v6394_v35 = vld [vmem:[%s9327_s1 + $0x5c8] ss:$16 sps:$4 sm:$0xff]  }
  0x82   :  { %1572 = vmatmul.mubr.bf16.vlgmr.msra.gmra.mrb[0].mxu0 %v149_v38  ;;  %v47_v26 = vld [vmem:[%s9328_s0 + $0x60] sm:$0xff] }
  0x83   :  { %1653 = vmatpush1.bf16.msra.mxu0 %v6301_v41  ;;  %1581 = vmatprep.mubr.bf16.mxu0 %v157_v48  ;;  %v115_v41 = vld [vmem:[%s9328_s0 + $0x280] sm:$0xff] }
  0x84   :  { %2022 = vmatpush1.bf16.msra.mxu1 %v6304_v43  ;;  %1654 = vmatprep.subr.bf16.mxu0 %v6309_v44  ;;  %v6349_v43 = vld [vmem:[%s9327_s1 + $0x500] ss:$16 sps:$4 sm:$0xff]   ;;  %v6352_v44 = vld [vmem:[%s9327_s1 + $0x4e8] ss:$16 sps:$4 sm:$0xff]  }
  0x85   :  { %2104 = vmatprep.subr.bf16.mxu1 %v6312_v45  ;;  %v6357_v45 = vld [vmem:[%s9327_s1 + $0x524] ss:$16 sps:$4 sm:$0xff]  }
  0x86   :  { %v39_v36 = vld [vmem:[%s9328_s0 + $0x20] sm:$0xff] }
  0x87   :  { %2024 = vmatmul.mubr.bf16.vlgmr.msra.gmra.mrb[32].mxu1 %v149_v38  ;;  %1655 = vmatpush1.bf16.msra.mxu0 %v6307_v46  ;;  %v6354_v38 = vld [vmem:[%s9327_s1 + $0x4ec] ss:$16 sps:$4 sm:$0xff]  }
  0x88   :  { %2105 = vmatpush1.bf16.msra.mxu1 %v6310_v47  ;;  %1656 = vmatprep.subr.bf16.mxu0 %v6315_v51  ;;  %v6360_v46 = vld [vmem:[%s9327_s1 + $0x50c] ss:$16 sps:$4 sm:$0xff]   ;;  %v185_v47 = vpack.c.bf16 %v115_v41, %v108_v40  ;;  %v61_v40 = vld [vmem:[%s9328_s0 + $0xd0] sm:$0xff] }
  0x89   :  { %2106 = vmatprep.subr.bf16.mxu1 %v6318_v52  ;;  %2033 = vmatprep.mubr.bf16.mxu1 %v157_v48  ;;  %v6355_v48 = vld [vmem:[%s9327_s1 + $0x520] ss:$16 sps:$4 sm:$0xff]   ;;  %v114_v51 = vld [vmem:[%s9328_s0 + $0x278] sm:$0xff]  ;;  %v6363_v52 = vld [vmem:[%s9327_s1 + $0x544] ss:$16 sps:$4 sm:$0xff]  }
  0x8a   :  { %1582 = vmatmul.mubr.bf16.gmra.mrb[4].mxu0 %v156_v55 }
  0x8b   :  { %1657 = vmatpush1.bf16.msra.mxu0 %v6313_v54  ;;  %1591 = vmatprep.mubr.bf16.mxu0 %v164_v62  ;;  %v6366_v54 = vld [vmem:[%s9327_s1 + $0x52c] ss:$16 sps:$4 sm:$0xff]  }
  0x8c   :  { %2107 = vmatpush1.bf16.msra.mxu1 %v6316_v56  ;;  %1658 = vmatprep.subr.bf16.mxu0 %v6321_v59  ;;  %v122_v56 = vld [vmem:[%s9328_s0 + $0x2b8] sm:$0xff] }
  0x8d   :  { %2108 = vmatprep.subr.bf16.mxu1 %v6324_v60  ;;  %v6364_v59 = vld [vmem:[%s9327_s1 + $0x528] ss:$16 sps:$4 sm:$0xff]   ;;  %v6369_v60 = vld [vmem:[%s9327_s1 + $0x564] ss:$16 sps:$4 sm:$0xff]  }
  0x8f   :  { %2034 = vmatmul.mubr.bf16.gmra.mrb[36].mxu1 %v156_v55  ;;  %1659 = vmatpush1.bf16.msra.mxu0 %v6319_v61  ;;  %v184_v55 = vpack.c.bf16 %v114_v51, %v107_v50  ;;  %v6372_v61 = vld [vmem:[%s9327_s1 + $0x54c] ss:$16 sps:$4 sm:$0xff]  }
  0x90   :  { %2109 = vmatpush1.bf16.msra.mxu1 %v6322_v63  ;;  %1660 = vmatprep.subr.bf16.mxu0 %v6327_v4  ;;  %v6367_v63 = vld [vmem:[%s9327_s1 + $0x560] ss:$16 sps:$4 sm:$0xff]   ;;  %v128_v4 = vld [vmem:[%s9328_s0 + $0x2e8] sm:$0xff] }
  0x91   :  { %2110 = vmatprep.subr.bf16.mxu1 %v6330_v5  ;;  %2043 = vmatprep.mubr.bf16.mxu1 %v164_v62  ;;  %v192_v62 = vpack.c.bf16 %v129_v57, %v122_v56  ;;  %v6375_v5 = vld [vmem:[%s9327_s1 + $0x584] ss:$16 sps:$4 sm:$0xff]   ;;  %v60_v50 = vld [vmem:[%s9328_s0 + $0xc8] sm:$0xff]  ;;  %v6409_v56 = vld [vmem:[%s9329_s3 + $0x20] ss:$16 sps:$4 sm:$0xff]  }
  0x92   :  { %1592 = vmatmul.mubr.bf16.gmra.mrb[8].mxu0 %v163_v9  ;;  %v68_v51 = vld [vmem:[%s9328_s0 + $0x108] sm:$0xff]  ;;  %v6417_v57 = vld [vmem:[%s9329_s3 + $0x44] ss:$16 sps:$4 sm:$0xff]  }
  0x93   :  { %1661 = vmatpush1.bf16.msra.mxu0 %v6325_v6  ;;  %1601 = vmatprep.mubr.bf16.mxu0 %v171_v14  ;;  %v6378_v6 = vld [vmem:[%s9327_s1 + $0x56c] ss:$16 sps:$4 sm:$0xff]  }
  0x94   :  { %2111 = vmatpush1.bf16.msra.mxu1 %v6328_v7  ;;  %1662 = vmatprep.subr.bf16.mxu0 %v6333_v12  ;;  %v191_v7 = vpack.c.bf16 %v128_v4, %v121_v3  ;;  %v6376_v12 = vld [vmem:[%s9327_s1 + $0x568] ss:$16 sps:$4 sm:$0xff]   ;;  %v89_v3 = vld [vmem:[%s9328_s0 + $0x1b0] sm:$0xff] }
  0x95   :  { %2112 = vmatprep.subr.bf16.mxu1 %v6336_v13  ;;  %v6381_v13 = vld [vmem:[%s9327_s1 + $0x5a4] ss:$16 sps:$4 sm:$0xff]   ;;  %v6421_v4 = vld [vmem:[%s9329_s3 + $0x60] ss:$16 sps:$4 sm:$0xff]  }
  0x97   :  { %2044 = vmatmul.mubr.bf16.gmra.mrb[40].mxu1 %v163_v9  ;;  %1663 = vmatpush1.bf16.msra.mxu0 %v6331_v15  ;;  %v136_v9 = vld [vmem:[%s9328_s0 + $0x328] sm:$0xff] }
  0x98   :  { %2113 = vmatpush1.bf16.msra.mxu1 %v6334_v17  ;;  %1664 = vmatprep.subr.bf16.mxu0 %v6339_v21  ;;  %v199_v15 = vpack.c.bf16 %v143_v10, %v136_v9  ;;  %v6379_v17 = vld [vmem:[%s9327_s1 + $0x5a0] ss:$16 sps:$4 sm:$0xff]   ;;  %v142_v21 = vld [vmem:[%s9328_s0 + $0x358] sm:$0xff] }
  0x99   :  { %2114 = vmatprep.subr.bf16.mxu1 %v6342_v22  ;;  %2053 = vmatprep.mubr.bf16.mxu1 %v171_v14  ;;  %v6384_v14 = vld [vmem:[%s9327_s1 + $0x58c] ss:$16 sps:$4 sm:$0xff]   ;;  %v6387_v22 = vld [vmem:[%s9327_s1 + $0x5c4] ss:$16 sps:$4 sm:$0xff]   ;;  %v6427_v9 = vld [vmem:[%s9329_s3 + $0x80] ss:$16 sps:$4 sm:$0xff]  }
  0x9a   :  { %1602 = vmatmul.mubr.bf16.gmra.mrb[12].mxu0 %v170_v25  ;;  %v81_v10 = vld [vmem:[%s9328_s0 + $0x170] sm:$0xff] }
  0x9b   :  { %1665 = vmatpush1.bf16.msra.mxu0 %v6337_v23  ;;  %1611 = vmatprep.mubr.bf16.mxu0 %v178_v33  ;;  %v6390_v23 = vld [vmem:[%s9327_s1 + $0x5ac] ss:$16 sps:$4 sm:$0xff]  }
  0x9c   :  { %2115 = vmatpush1.bf16.msra.mxu1 %v6340_v24  ;;  %1666 = vmatprep.subr.bf16.mxu0 %v6345_v28  ;;  %v198_v24 = vpack.c.bf16 %v142_v21, %v135_v20  ;;  %v6388_v28 = vld [vmem:[%s9327_s1 + $0x5a8] ss:$16 sps:$4 sm:$0xff]   ;;  %v6439_v21 = vld [vmem:[%s9329_s3 + $0xc0] ss:$16 sps:$4 sm:$0xff]  }
  0x9d   :  { %2116 = vmatprep.subr.bf16.mxu1 %v6348_v30  ;;  %v6393_v30 = vld [vmem:[%s9327_s1 + $0x5e4] ss:$16 sps:$4 sm:$0xff]  }
  0x9f   :  { %2054 = vmatmul.mubr.bf16.gmra.mrb[44].mxu1 %v170_v25  ;;  %1667 = vmatpush1.bf16.msra.mxu0 %v6343_v32  ;;  %v40_v25 = vld [vmem:[%s9328_s0 + $0x28] sm:$0xff] }
  0xa0   :  { %2117 = vmatpush1.bf16.msra.mxu1 %v6346_v34  ;;  %1668 = vmatprep.subr.bf16.mxu0 %v6351_v37  ;;  %v6396_v32 = vld [vmem:[%s9327_s1 + $0x5cc] ss:$16 sps:$4 sm:$0xff]   ;;  %v6391_v34 = vld [vmem:[%s9327_s1 + $0x5e0] ss:$16 sps:$4 sm:$0xff]  }
  0xa1   :  { %2118 = vmatprep.subr.bf16.mxu1 %v6354_v38  ;;  %2063 = vmatprep.mubr.bf16.mxu1 %v178_v33  ;;  %v152_v33 = vpack.c.bf16 %v47_v26, %v40_v25  ;;  %v46_v37 = vld [vmem:[%s9328_s0 + $0x58] sm:$0xff] }
  0xa2   :  { %1612 = vmatmul.mubr.bf16.gmra.mrb[16].mxu0 %v177_v39  ;;  %v6399_v38 = vld [vmem:[%s9327_s1 + $0x5ec] ss:$16 sps:$4 sm:$0xff]   ;;  %v151_v41 = vpack.c.bf16 %v46_v37, %v39_v36  ;;  %v6451_v37 = vld [vmem:[%s9329_s3 + $0x100] ss:$16 sps:$4 sm:$0xff]  }
  0xa3   :  { %1669 = vmatpush1.bf16.msra.mxu0 %v6349_v43  ;;  %1621 = vmatprep.mubr.bf16.mxu0 %v185_v47  ;;  %v6397_v43 = vld [vmem:[%s9327_s1 + $0x5e8] ss:$16 sps:$4 sm:$0xff]  }
  0xa4   :  { %2119 = vmatpush1.bf16.msra.mxu1 %v6352_v44  ;;  %1670 = vmatprep.subr.bf16.mxu0 %v6357_v45  ;;  %v6402_v44 = vld [vmem:[%s9327_s1 + $0x60c] ss:$16 sps:$4 sm:$0xff]  }
  0xa5   :  { %2120 = vmatprep.subr.bf16.mxu1 %v6360_v46  ;;  %v6403_v46 = vld [vmem:[%s9329_s3] ss:$16 sps:$4 sm:$0xff]   ;;  %v102_v26 = vld [vmem:[%s9328_s0 + $0x218] sm:$0xff] }
  0xa7   :  { %2064 = vmatmul.mubr.bf16.gmra.mrb[48].mxu1 %v177_v39  ;;  %1671 = vmatpush1.bf16.msra.mxu0 %v6355_v48  ;;  %v54_v39 = vld [vmem:[%s9328_s0 + $0x98] sm:$0xff] }
  0xa8   :  { %2121 = vmatpush1.bf16.msra.mxu1 %v6358_v49  ;;  %1672 = vmatprep.subr.bf16.mxu0 %v6363_v52  ;;  %v159_v45 = vpack.c.bf16 %v61_v40, %v54_v39  ;;  %v6400_v48 = vld [vmem:[%s9327_s1 + $0x608] ss:$16 sps:$4 sm:$0xff]   ;;  %v53_v49 = vld [vmem:[%s9328_s0 + $0x90] sm:$0xff]  ;;  %v75_v52 = vld [vmem:[%s9328_s0 + $0x140] sm:$0xff] }
  0xa9   :  { %2122 = vmatprep.subr.bf16.mxu1 %v6366_v54  ;;  %2073 = vmatprep.mubr.bf16.mxu1 %v185_v47  ;;  %v6405_v47 = vld [vmem:[%s9329_s3 + $0x4] ss:$16 sps:$4 sm:$0xff]   ;;  %v116_v40 = vld [vmem:[%s9328_s0 + $0x288] sm:$0xff] }
  0xaa   :  { %1622 = vmatmul.mubr.bf16.gmra.mrb[20].mxu0 %v184_v55  ;;  %v6411_v54 = vld [vmem:[%s9329_s3 + $0x24] ss:$16 sps:$4 sm:$0xff]  }
  0xab   :  { %1673 = vmatpush1.bf16.msra.mxu0 %v6361_v58  ;;  %1631 = vmatprep.mubr.bf16.mxu0 %v192_v62  ;;  %v158_v58 = vpack.c.bf16 %v60_v50, %v53_v49  ;;  %v109_v39 = vld [vmem:[%s9328_s0 + $0x250] sm:$0xff] }
  0xac   :  { %2123 = vmatpush1.bf16.msra.mxu1 %v6364_v59  ;;  %1674 = vmatprep.subr.bf16.mxu0 %v6369_v60  ;;  %v166_v59 = vpack.c.bf16 %v75_v52, %v68_v51  ;;  %v6415_v60 = vld [vmem:[%s9329_s3 + $0x40] ss:$16 sps:$4 sm:$0xff]   ;;  %v186_v50 = vpack.c.bf16 %v116_v40, %v109_v39  ;;  %v6426_v39 = vld [vmem:[%s9329_s3 + $0x6c] ss:$16 sps:$4 sm:$0xff]   ;;  %v6424_v40 = vld [vmem:[%s9329_s3 + $0x68] ss:$16 sps:$4 sm:$0xff]  }
  0xad   :  { %2124 = vmatprep.subr.bf16.mxu1 %v6372_v61  ;;  %v67_v61 = vld [vmem:[%s9328_s0 + $0x100] sm:$0xff] }
  0xae   :  { %v6463_v51 = vld [vmem:[%s9329_s3 + $0x140] ss:$16 sps:$4 sm:$0xff]  }
  0xaf   :  { %2074 = vmatmul.mubr.bf16.gmra.mrb[52].mxu1 %v184_v55  ;;  %1675 = vmatpush1.bf16.msra.mxu0 %v6367_v63  ;;  %v6408_v55 = vld [vmem:[%s9329_s3 + $0xc] ss:$16 sps:$4 sm:$0xff]  }
  0xb0   :  { %2125 = vmatpush1.bf16.msra.mxu1 %v6370_v2  ;;  %1676 = vmatprep.subr.bf16.mxu0 %v6375_v5  ;;  %v74_v63 = vld [vmem:[%s9328_s0 + $0x138] sm:$0xff]  ;;  %v6429_v5 = vld [vmem:[%s9329_s3 + $0x84] ss:$16 sps:$4 sm:$0xff]  }
  0xb1   :  { %2126 = vmatprep.subr.bf16.mxu1 %v6378_v6  ;;  %2083 = vmatprep.mubr.bf16.mxu1 %v192_v62  ;;  %v6423_v62 = vld [vmem:[%s9329_s3 + $0x64] ss:$16 sps:$4 sm:$0xff]   ;;  %v82_v2 = vld [vmem:[%s9328_s0 + $0x178] sm:$0xff]  ;;  %v165_v6 = vpack.c.bf16 %v74_v63, %v67_v61  ;;  %v6469_v61 = vld [vmem:[%s9329_s3 + $0x160] ss:$16 sps:$4 sm:$0xff]  }
  0xb2   :  { %1632 = vmatmul.mubr.bf16.gmra.mrb[24].mxu0 %v191_v7  ;;  %v6477_v63 = vld [vmem:[%s9329_s3 + $0x184] ss:$16 sps:$4 sm:$0xff]  }
  0xb3   :  { %1677 = vmatpush1.bf16.msra.mxu0 %v6373_v11  ;;  %1641 = vmatprep.mubr.bf16.mxu0 %v199_v15  ;;  %v6435_v11 = vld [vmem:[%s9329_s3 + $0xa4] ss:$16 sps:$4 sm:$0xff]  }
  0xb4   :  { %2127 = vmatpush1.bf16.msra.mxu1 %v6376_v12  ;;  %1678 = vmatprep.subr.bf16.mxu0 %v6381_v13  ;;  %v88_v12 = vld [vmem:[%s9328_s0 + $0x1a8] sm:$0xff] }
  0xb5   :  { %2128 = vmatprep.subr.bf16.mxu1 %v6384_v14  ;;  %v96_v13 = vld [vmem:[%s9328_s0 + $0x1e8] sm:$0xff]  ;;  %v103_v14 = vld [vmem:[%s9328_s0 + $0x220] sm:$0xff] }
  0xb6   :  { %v180_v20 = vpack.c.bf16 %v103_v14, %v96_v13 }
  0xb7   :  { %2084 = vmatmul.mubr.bf16.gmra.mrb[56].mxu1 %v191_v7  ;;  %1679 = vmatpush1.bf16.msra.mxu0 %v6379_v17  ;;  %v173_v7 = vpack.c.bf16 %v89_v3, %v82_v2  ;;  %v6441_v17 = vld [vmem:[%s9329_s3 + $0xc4] ss:$16 sps:$4 sm:$0xff]  }
  0xb8   :  { %2129 = vmatpush1.bf16.msra.mxu1 %v6382_v18  ;;  %1680 = vmatprep.subr.bf16.mxu0 %v6387_v22  ;;  %v172_v18 = vpack.c.bf16 %v88_v12, %v81_v10 }
  0xb9   :  { %2130 = vmatprep.subr.bf16.mxu1 %v6390_v23  ;;  %2093 = vmatprep.mubr.bf16.mxu1 %v199_v15  ;;  %v6433_v15 = vld [vmem:[%s9329_s3 + $0xa0] ss:$16 sps:$4 sm:$0xff]  }
  0xba   :  { %1642 = vmatmul.mubr.bf16.gmra.mrb[28].mxu0 %v198_v24  ;;  %v95_v23 = vld [vmem:[%s9328_s0 + $0x1e0] sm:$0xff] }
  0xbb   :  { %1681 = vmatpush1.bf16.msra.mxu0 %v6385_v27  ;;  %1684 = vmatprep.mubr.bf16.mxu0 %v152_v33  ;;  %v110_v27 = vld [vmem:[%s9328_s0 + $0x258] sm:$0xff] }
  0xbc   :  { %2131 = vmatpush1.bf16.msra.mxu1 %v6388_v28  ;;  %1682 = vmatprep.subr.bf16.mxu0 %v6393_v30  ;;  %v117_v30 = vld [vmem:[%s9328_s0 + $0x290] sm:$0xff] }
  0xbd   :  { %2132 = vmatprep.subr.bf16.mxu1 %v6396_v32  ;;  %v187_v36 = vpack.c.bf16 %v117_v30, %v110_v27  ;;  %v6414_v27 = vld [vmem:[%s9329_s3 + $0x2c] ss:$16 sps:$4 sm:$0xff]   ;;  %v6412_v30 = vld [vmem:[%s9329_s3 + $0x28] ss:$16 sps:$4 sm:$0xff]  }
  0xbf   :  { %2094 = vmatmul.mubr.bf16.gmra.mrb[60].mxu1 %v198_v24  ;;  %1683 = vmatpush1.bf16.msra.mxu0 %v6391_v34  ;;  %v6447_v24 = vld [vmem:[%s9329_s3 + $0xe4] ss:$16 sps:$4 sm:$0xff]  }
  0xc0   :  { %2133 = vmatpush1.bf16.msra.mxu1 %v6394_v35  ;;  %2136 = vmatprep.mubr.bf16.mxu1 %v152_v33  ;;  %v6445_v33 = vld [vmem:[%s9329_s3 + $0xe0] ss:$16 sps:$4 sm:$0xff]   ;;  %v6453_v34 = vld [vmem:[%s9329_s3 + $0x104] ss:$16 sps:$4 sm:$0xff]   ;;  %v179_v35 = vpack.c.bf16 %v102_v26, %v95_v23 }
  0xc1   :  { %2134 = vmatprep.subr.bf16.mxu1 %v6399_v38  ;;  %3184 = vmatprep.subr.bf16.mxu0 %v6405_v47 }
  0xc2   :  { %1685 = vmatmul.mubr.bf16.vlgmr.msra.gmra.mrb[0].mxu0 %v151_v41 }
  0xc3   :  { %1694 = vmatprep.mubr.bf16.mxu0 %v159_v45  ;;  %3185 = vmatpush1.bf16.msra.mxu0 %v6403_v46  ;;  %v6457_v46 = vld [vmem:[%s9329_s3 + $0x120] ss:$16 sps:$4 sm:$0xff]  }
  0xc4   :  { %2135 = vmatpush1.bf16.msra.mxu1 %v6397_v43  ;;  %3186 = vmatprep.subr.bf16.mxu0 %v6411_v54  ;;  %v6471_v54 = vld [vmem:[%s9329_s3 + $0x164] ss:$16 sps:$4 sm:$0xff]  }
  0xc5   :  { %2217 = vmatprep.subr.bf16.mxu1 %v6402_v44  ;;  %v124_v44 = vld [vmem:[%s9328_s0 + $0x2c8] sm:$0xff] }
  0xc7   :  { %2137 = vmatmul.mubr.bf16.vlgmr.msra.gmra.mrb[32].mxu1 %v151_v41  ;;  %3187 = vmatpush1.bf16.msra.mxu0 %v6409_v56  ;;  %v6459_v41 = vld [vmem:[%s9329_s3 + $0x124] ss:$16 sps:$4 sm:$0xff]  }
  0xc8   :  { %2218 = vmatpush1.bf16.msra.mxu1 %v6400_v48  ;;  %2146 = vmatprep.mubr.bf16.mxu1 %v159_v45  ;;  %v131_v45 = vld [vmem:[%s9328_s0 + $0x300] sm:$0xff] }
  0xc9   :  { %3410 = vmatprep.subr.bf16.mxu1 %v6408_v55  ;;  %3188 = vmatprep.subr.bf16.mxu0 %v6417_v57  ;;  %v6465_v48 = vld [vmem:[%s9329_s3 + $0x144] ss:$16 sps:$4 sm:$0xff]   ;;  %v194_v52 = vpack.c.bf16 %v131_v45, %v124_v44  ;;  %v130_v57 = vld [vmem:[%s9328_s0 + $0x2f8] sm:$0xff] }
  0xca   :  { %1695 = vmatmul.mubr.bf16.gmra.mrb[4].mxu0 %v158_v58  ;;  %v123_v56 = vld [vmem:[%s9328_s0 + $0x2c0] sm:$0xff] }
  0xcb   :  { %1704 = vmatprep.mubr.bf16.mxu0 %v166_v59  ;;  %3189 = vmatpush1.bf16.msra.mxu0 %v6415_v60  ;;  %v145_v60 = vld [vmem:[%s9328_s0 + $0x370] sm:$0xff]  ;;  %v193_v3 = vpack.c.bf16 %v130_v57, %v123_v56  ;;  %v6444_v56 = vld [vmem:[%s9329_s3 + $0xcc] ss:$16 sps:$4 sm:$0xff]  }
  0xcc   :  { %3190 = vmatprep.subr.bf16.mxu0 %v6423_v62  ;;  %v6489_v57 = vld [vmem:[%s9329_s3 + $0x1c4] ss:$16 sps:$4 sm:$0xff]  }
  0xcf   :  { %2147 = vmatmul.mubr.bf16.gmra.mrb[36].mxu1 %v158_v58  ;;  %3191 = vmatpush1.bf16.msra.mxu0 %v6421_v4  ;;  %v6475_v4 = vld [vmem:[%s9329_s3 + $0x180] ss:$16 sps:$4 sm:$0xff]  }
  0xd0   :  { %2156 = vmatprep.mubr.bf16.mxu1 %v166_v59  ;;  %3192 = vmatprep.subr.bf16.mxu0 %v6429_v5  ;;  %v138_v59 = vld [vmem:[%s9328_s0 + $0x338] sm:$0xff] }
  0xd1   :  { %v201_v5 = vpack.c.bf16 %v145_v60, %v138_v59  ;;  %v6442_v59 = vld [vmem:[%s9329_s3 + $0xc8] ss:$16 sps:$4 sm:$0xff]   ;;  %v6450_v60 = vld [vmem:[%s9329_s3 + $0xec] ss:$16 sps:$4 sm:$0xff]  }
  0xd2   :  { %1705 = vmatmul.mubr.bf16.gmra.mrb[8].mxu0 %v165_v6 }
  0xd3   :  { %1714 = vmatprep.mubr.bf16.mxu0 %v173_v7  ;;  %3193 = vmatpush1.bf16.msra.mxu0 %v6427_v9  ;;  %v144_v9 = vld [vmem:[%s9328_s0 + $0x368] sm:$0xff] }
  0xd4   :  { %3194 = vmatprep.subr.bf16.mxu0 %v6435_v11 }
  0xd7   :  { %2157 = vmatmul.mubr.bf16.gmra.mrb[40].mxu1 %v165_v6  ;;  %3195 = vmatpush1.bf16.msra.mxu0 %v6433_v15 }
  0xd8   :  { %2166 = vmatprep.mubr.bf16.mxu1 %v173_v7  ;;  %3196 = vmatprep.subr.bf16.mxu0 %v6441_v17  ;;  %v137_v7 = vld [vmem:[%s9328_s0 + $0x330] sm:$0xff] }
  0xd9   :  { %v200_v13 = vpack.c.bf16 %v144_v9, %v137_v7  ;;  %v6462_v7 = vld [vmem:[%s9329_s3 + $0x12c] ss:$16 sps:$4 sm:$0xff]   ;;  %v6460_v9 = vld [vmem:[%s9329_s3 + $0x128] ss:$16 sps:$4 sm:$0xff]  }
  0xda   :  { %v7810_v22 = vpop.f32.mrb[0].mxu1  ;;  %1715 = vmatmul.mubr.bf16.gmra.mrb[12].mxu0 %v172_v18 }
  0xdb   :  { %v7818_v25 = vpop.f32.mrb[1].mxu1  ;;  %1724 = vmatprep.mubr.bf16.mxu0 %v180_v20  ;;  %3197 = vmatpush1.bf16.msra.mxu0 %v6439_v21 }
  0xdc   :  { %v7826_v28 = vpop.f32.mrb[2].mxu1  ;;  %3198 = vmatprep.subr.bf16.mxu0 %v6447_v24  ;;  %v6406_v24 = vld [vmem:[%s9329_s3 + $0x8] ss:$16 sps:$4 sm:$0xff]  }
  0xdd   :  { %v7831_v32 = vpop.f32.mrb[3].mxu1 }
  0xdf   :  { %2167 = vmatmul.mubr.bf16.gmra.mrb[44].mxu1 %v172_v18  ;;  %3199 = vmatpush1.bf16.msra.mxu0 %v6445_v33  ;;  %v6420_v33 = vld [vmem:[%s9329_s3 + $0x4c] ss:$16 sps:$4 sm:$0xff]  }
  0xe0   :  { %2176 = vmatprep.mubr.bf16.mxu1 %v180_v20  ;;  %3200 = vmatprep.subr.bf16.mxu0 %v6453_v34 }
  0xe2   :  { %v7842_v38 = vpop.f32.mrb[4].mxu1  ;;  %1725 = vmatmul.mubr.bf16.gmra.mrb[16].mxu0 %v179_v35 }
  0xe3   :  { %v7853_v43 = vpop.f32.mrb[5].mxu1  ;;  %1734 = vmatprep.mubr.bf16.mxu0 %v187_v36  ;;  %3201 = vmatpush1.bf16.msra.mxu0 %v6451_v37 }
  0xe4   :  { %v7864_v47 = vpop.f32.mrb[6].mxu1  ;;  %3202 = vmatprep.subr.bf16.mxu0 %v6459_v41  ;;  %v6432_v41 = vld [vmem:[%s9329_s3 + $0x8c] ss:$16 sps:$4 sm:$0xff]  }
  0xe5   :  { %v7869_v49 = vpop.f32.mrb[7].mxu1 }
  0xe7   :  { %2177 = vmatmul.mubr.bf16.gmra.mrb[48].mxu1 %v179_v35  ;;  %3203 = vmatpush1.bf16.msra.mxu0 %v6457_v46 }
  0xe8   :  { %2186 = vmatprep.mubr.bf16.mxu1 %v187_v36  ;;  %3204 = vmatprep.subr.bf16.mxu0 %v6465_v48 }
  0xea   :  { %v7877_v55 = vpop.f32.mrb[8].mxu1  ;;  %1735 = vmatmul.mubr.bf16.gmra.mrb[20].mxu0 %v186_v50 }
  0xeb   :  { %v7885_v58 = vpop.f32.mrb[9].mxu1  ;;  %1744 = vmatprep.mubr.bf16.mxu0 %v194_v52  ;;  %3205 = vmatpush1.bf16.msra.mxu0 %v6463_v51  ;;  %v6483_v51 = vld [vmem:[%s9329_s3 + $0x1a4] ss:$16 sps:$4 sm:$0xff]  }
  0xec   :  { %v7896_v62 = vpop.f32.mrb[10].mxu1  ;;  %3206 = vmatprep.subr.bf16.mxu0 %v6471_v54  ;;  %v6436_v54 = vld [vmem:[%s9329_s3 + $0xa8] ss:$16 sps:$4 sm:$0xff]  }
  0xed   :  { %v7901_v2 = vpop.f32.mrb[11].mxu1 }
  0xef   :  { %2187 = vmatmul.mubr.bf16.gmra.mrb[52].mxu1 %v186_v50  ;;  %3207 = vmatpush1.bf16.msra.mxu0 %v6469_v61  ;;  %v6438_v50 = vld [vmem:[%s9329_s3 + $0xac] ss:$16 sps:$4 sm:$0xff]   ;;  %v6495_v61 = vld [vmem:[%s9329_s3 + $0x1e4] ss:$16 sps:$4 sm:$0xff]  }
  0xf0   :  { %2196 = vmatprep.mubr.bf16.mxu1 %v194_v52  ;;  %3208 = vmatprep.subr.bf16.mxu0 %v6477_v63  ;;  %v6481_v52 = vld [vmem:[%s9329_s3 + $0x1a0] ss:$16 sps:$4 sm:$0xff]  }
  0xf1   :  { %v6493_v63 = vld [vmem:[%s9329_s3 + $0x1e0] ss:$16 sps:$4 sm:$0xff]  }
  0xf2   :  { %v7906_v6 = vpop.f32.mrb[12].mxu1  ;;  %1745 = vmatmul.mubr.bf16.gmra.mrb[24].mxu0 %v193_v3 }
  0xf3   :  { %v7914_v10 = vpop.f32.mrb[13].mxu1  ;;  %1754 = vmatprep.mubr.bf16.mxu0 %v201_v5  ;;  %3209 = vmatpush1.bf16.msra.mxu0 %v6475_v4  ;;  %v6456_v4 = vld [vmem:[%s9329_s3 + $0x10c] ss:$16 sps:$4 sm:$0xff]  }
  0xf4   :  { %v7916_v11 = vpop.f32.mrb[14].mxu1  ;;  %3210 = vmatprep.subr.bf16.mxu0 %v6483_v51 }
  0xf5   :  { %v7918_v12 = vpop.f32.mrb[15].mxu1 }
  0xf7   :  { %2197 = vmatmul.mubr.bf16.gmra.mrb[56].mxu1 %v193_v3  ;;  %3211 = vmatpush1.bf16.msra.mxu0 %v6481_v52  ;;  %v6448_v3 = vld [vmem:[%s9329_s3 + $0xe8] ss:$16 sps:$4 sm:$0xff]  }
  0xf8   :  { %2206 = vmatprep.mubr.bf16.mxu1 %v201_v5  ;;  %3212 = vmatprep.subr.bf16.mxu0 %v6489_v57  ;;  %v6501_v5 = vld [vmem:[%s9329_s3 + $0x204] ss:$16 sps:$4 sm:$0xff]  }
  0xfa   :  { %v7920_v14 = vpop.f32.mrb[16].mxu1  ;;  %1755 = vmatmul.mubr.bf16.gmra.mrb[28].mxu0 %v200_v13 }
  0xfb   :  { %v7922_v15 = vpop.f32.mrb[17].mxu1 }
  0xfc   :  { %v7924_v17 = vpop.f32.mrb[18].mxu1 }
  0xfd   :  { %v7926_v18 = vpop.f32.mrb[19].mxu1 }
  0xff   :  { %2207 = vmatmul.mubr.bf16.gmra.mrb[60].mxu1 %v200_v13  ;;  %v6468_v13 = vld [vmem:[%s9329_s3 + $0x14c] ss:$16 sps:$4 sm:$0xff]  }
 0x100   :  { %2249 = vmatprep.mubr.bf16.mxu1 %v6791_v1 }
 0x102   :  { %v7929_v20 = vpop.f32.mrb[20].mxu1 }
 0x103   :  { %v7931_v21 = vpop.f32.mrb[21].mxu1 }
 0x104   :  { %v7933_v23 = vpop.f32.mrb[22].mxu1 }
 0x105   :  { %v7938_v26 = vpop.f32.mrb[23].mxu1 }
 0x107   :  { %5321 = vmatmul.mubr.msk.bf16.vlgmr.msra.gmra.mrb[32].mxu1 %vm1401_vm0, %v6865_v8  ;;  %v6418_v8 = vld [vmem:[%s9329_s3 + $0x48] ss:$16 sps:$4 sm:$0xff]  }
 0x108   :  { %2259 = vmatprep.mubr.bf16.mxu1 %v6791_v1  ;;  %3411 = vmatpush1.bf16.msra.mxu1 %v6406_v24  ;;  %v6466_v24 = vld [vmem:[%s9329_s3 + $0x148] ss:$16 sps:$4 sm:$0xff]  }
 0x109   :  { %3412 = vmatprep.subr.bf16.mxu1 %v6414_v27  ;;  %v6472_v27 = vld [vmem:[%s9329_s3 + $0x168] ss:$16 sps:$4 sm:$0xff]  }
 0x10a   :  { %v7952_v34 = vpop.f32.mrb[24].mxu1 }
 0x10b   :  { %v7954_v35 = vpop.f32.mrb[25].mxu1 }
 0x10c   :  { %v7956_v36 = vpop.f32.mrb[26].mxu1  ;;  %3413 = vmatpush1.bf16.msra.mxu1 %v6412_v30  ;;  %v6480_v30 = vld [vmem:[%s9329_s3 + $0x18c] ss:$16 sps:$4 sm:$0xff]  }
 0x10d   :  { %v7961_v37 = vpop.f32.mrb[27].mxu1  ;;  %3414 = vmatprep.subr.bf16.mxu1 %v6420_v33  ;;  %v6478_v33 = vld [vmem:[%s9329_s3 + $0x188] ss:$16 sps:$4 sm:$0xff]  }
 0x10f   :  { %5322 = vmatmul.mubr.msk.bf16.gmra.mrb[36].mxu1 %vm1401_vm0, %v6900_v19  ;;  %v6430_v19 = vld [vmem:[%s9329_s3 + $0x88] ss:$16 sps:$4 sm:$0xff]  }
 0x110   :  { %2269 = vmatprep.mubr.bf16.mxu1 %v6791_v1  ;;  %3415 = vmatpush1.bf16.msra.mxu1 %v6418_v8  ;;  %v6484_v8 = vld [vmem:[%s9329_s3 + $0x1a8] ss:$16 sps:$4 sm:$0xff]  }
 0x111   :  { %3416 = vmatprep.subr.bf16.mxu1 %v6426_v39  ;;  %v6492_v39 = vld [vmem:[%s9329_s3 + $0x1cc] ss:$16 sps:$4 sm:$0xff]  }
 0x112   :  { %v7975_v44 = vpop.f32.mrb[28].mxu1 }
 0x113   :  { %v7977_v45 = vpop.f32.mrb[29].mxu1 }
 0x114   :  { %v7979_v46 = vpop.f32.mrb[30].mxu1  ;;  %3417 = vmatpush1.bf16.msra.mxu1 %v6424_v40  ;;  %v6490_v40 = vld [vmem:[%s9329_s3 + $0x1c8] ss:$16 sps:$4 sm:$0xff]  }
 0x115   :  { %v7984_v48 = vpop.f32.mrb[31].mxu1  ;;  %3418 = vmatprep.subr.bf16.mxu1 %v6432_v41  ;;  %v6496_v41 = vld [vmem:[%s9329_s3 + $0x1e8] ss:$16 sps:$4 sm:$0xff]  }
 0x117   :  { %5323 = vmatmul.mubr.msk.bf16.gmra.mrb[40].mxu1 %vm1401_vm0, %v6938_v31  ;;  %v6487_v31 = vld [vmem:[%s9329_s3 + $0x1c0] ss:$16 sps:$4 sm:$0xff]  }
 0x118   :  { %2279 = vmatprep.mubr.bf16.mxu1 %v6791_v1  ;;  %3419 = vmatpush1.bf16.msra.mxu1 %v6430_v19  ;;  %v6504_v19 = vld [vmem:[%s9329_s3 + $0x20c] ss:$16 sps:$4 sm:$0xff]  }
 0x119   :  { %3420 = vmatprep.subr.bf16.mxu1 %v6438_v50  ;;  %3213 = vmatpush1.bf16.msra.mxu0 %v6487_v31  ;;  %v401_v50 = vlaneseq }
 0x11a   :  { %3214 = vmatprep.subr.bf16.mxu0 %v6495_v61 }
 0x11b   :  { %v8093_v51 = vshrl.u32 %v401_v50, 7 }
 0x11c   :  { %3421 = vmatpush1.bf16.msra.mxu1 %v6436_v54 }
 0x11d   :  { %3422 = vmatprep.subr.bf16.mxu1 %v6444_v56  ;;  %3215 = vmatpush1.bf16.msra.mxu0 %v6493_v63  ;;  %v8096_v52 = vsub.s32 0, %v8093_v51  ;;  %v8104_v54 = vsub.s32 1, %v8093_v51 }
 0x11e   :  { %3297 = vmatprep.subr.bf16.mxu0 %v6501_v5 }
 0x11f   :  { %5324 = vmatmul.mubr.msk.bf16.gmra.mrb[44].mxu1 %vm1401_vm0, %v6973_v42  ;;  %v6454_v42 = vld [vmem:[%s9329_s3 + $0x108] ss:$16 sps:$4 sm:$0xff]  }
 0x120   :  { %2289 = vmatprep.mubr.bf16.mxu1 %v6791_v1  ;;  %3423 = vmatpush1.bf16.msra.mxu1 %v6442_v59 }
 0x121   :  { %3424 = vmatprep.subr.bf16.mxu1 %v6450_v60 }
 0x124   :  { %3425 = vmatpush1.bf16.msra.mxu1 %v6448_v3 }
 0x125   :  { %3426 = vmatprep.subr.bf16.mxu1 %v6456_v4 }
 0x127   :  { %5325 = vmatmul.mubr.msk.bf16.gmra.mrb[48].mxu1 %vm1401_vm0, %v7008_v53  ;;  %v6474_v53 = vld [vmem:[%s9329_s3 + $0x16c] ss:$16 sps:$4 sm:$0xff]  }
 0x128   :  { %2299 = vmatprep.mubr.bf16.mxu1 %v6791_v1  ;;  %3427 = vmatpush1.bf16.msra.mxu1 %v6454_v42 }
 0x129   :  { %3428 = vmatprep.subr.bf16.mxu1 %v6462_v7 }
 0x12c   :  { %3429 = vmatpush1.bf16.msra.mxu1 %v6460_v9 }
 0x12d   :  { %3430 = vmatprep.subr.bf16.mxu1 %v6468_v13 }
 0x12f   :  { %5326 = vmatmul.mubr.msk.bf16.gmra.mrb[52].mxu1 %vm1401_vm0, %v7043_v0  ;;  %v6486_v0 = vld [vmem:[%s9329_s3 + $0x1ac] ss:$16 sps:$4 sm:$0xff]  }
 0x130   :  { %2309 = vmatprep.mubr.bf16.mxu1 %v6791_v1  ;;  %3431 = vmatpush1.bf16.msra.mxu1 %v6466_v24 }
 0x131   :  { %3432 = vmatprep.subr.bf16.mxu1 %v6474_v53 }
 0x134   :  { %3433 = vmatpush1.bf16.msra.mxu1 %v6472_v27 }
 0x135   :  { %3434 = vmatprep.subr.bf16.mxu1 %v6480_v30 }
 0x137   :  { %5327 = vmatmul.mubr.msk.bf16.gmra.mrb[56].mxu1 %vm1401_vm0, %v7084_v16  ;;  %v6498_v16 = vld [vmem:[%s9329_s3 + $0x1ec] ss:$16 sps:$4 sm:$0xff]  }
 0x138   :  { %2319 = vmatprep.mubr.bf16.mxu1 %v6791_v1  ;;  %3435 = vmatpush1.bf16.msra.mxu1 %v6478_v33 }
 0x139   :  { %3436 = vmatprep.subr.bf16.mxu1 %v6486_v0 }
 0x13c   :  { %3437 = vmatpush1.bf16.msra.mxu1 %v6484_v8 }
 0x13d   :  { %3438 = vmatprep.subr.bf16.mxu1 %v6492_v39 }
 0x13f   :  { %5328 = vmatmul.mubr.msk.bf16.gmra.mrb[60].mxu1 %vm1401_vm0, %v7122_v29  ;;  %v8101_v29 = vld [vmem:[%s9330_s2] sm:$0xf] }
 0x140   :  { %3439 = vmatpush1.bf16.msra.mxu1 %v6490_v40  ;;  %v8108_v56 = vrot.slane %v8101_v29, %v8096_v52  ;;  %v8112_v57 = vrot.slane %v8101_v29, %v8104_v54 }
 0x141   :  { %3440 = vmatprep.subr.bf16.mxu1 %v6498_v16 }
 0x144   :  { %3441 = vmatpush1.bf16.msra.mxu1 %v6496_v41  ;;  %v6507_v41 = vld [vmem:[%s9329_s3 + $0x224] ss:$16 sps:$4 sm:$0xff]  }
 0x145   :  { %3523 = vmatprep.subr.bf16.mxu1 %v6504_v19  ;;  %v6510_v19 = vld [vmem:[%s9329_s3 + $0x22c] ss:$16 sps:$4 sm:$0xff]  }
 0x195   :  { %v1686_v31 = vpop.f32.mrb[0].mxu0 }
 0x196   :  { %v5590_v59 = vadd.f32 %v1686_v31, %v8108_v56  ;;  %v1688_v60 = vpop.f32.mrb[1].mxu0 }
 0x197   :  { %v5592_v61 = vadd.f32 %v1688_v60, %v8112_v57  ;;  %v1690_v63 = vpop.f32.mrb[2].mxu0  ;;  %v6505_v60 = vld [vmem:[%s9329_s3 + $0x220] ss:$16 sps:$4 sm:$0xff]  }
 0x198   :  { %v5591_v3 = vadd.f32 %v5590_v59, %v7810_v22  ;;  %v5594_v4 = vadd.f32 %v1690_v63, %v8108_v56  ;;  %v1692_v5 = vpop.f32.mrb[3].mxu0 }
 0x199   :  { %v5593_v42 = vadd.f32 %v5592_v61, %v7818_v25  ;;  %v5596_v7 = vadd.f32 %v1692_v5, %v8112_v57  ;;  %v6499_v25 = vld [vmem:[%s9329_s3 + $0x200] ss:$16 sps:$4 sm:$0xff]  }
 0x19a   :  { %v5595_v9 = vadd.f32 %v5594_v4, %v7826_v28  ;;  %v6502_v28 = vld [vmem:[%s9329_s3 + $0x208] ss:$16 sps:$4 sm:$0xff]  }
 0x19b   :  { %v5597_v13 = vadd.f32 %v5596_v7, %v7831_v32 }
 0x19c   :  { %v2330_v24 = vpack.c.bf16 %v5595_v9, %v5591_v3 }
 0x19d   :  { %v2331_v53 = vpack.c.bf16 %v5597_v13, %v5593_v42  ;;  %v1696_v27 = vpop.f32.mrb[4].mxu0  ;;  %v6511_v13 = vld [vmem:[%s9329_s3 + $0x240] ss:$16 sps:$4 sm:$0xff]  }
 0x19e   :  { %v5598_v30 = vadd.f32 %v1696_v27, %v8108_v56  ;;  %v1698_v33 = vpop.f32.mrb[5].mxu0  ;;  %v2362_v32 = vmax.bf16 %v6791_v1, %v2330_v24  ;;  %v6514_v24 = vld [vmem:[%s9329_s3 + $0x248] ss:$16 sps:$4 sm:$0xff]  }
 0x19f   :  { %v5600_v0 = vadd.f32 %v1698_v33, %v8112_v57  ;;  %v1700_v22 = vpop.f32.mrb[6].mxu0  ;;  %v2363_v8 = vmax.bf16 %v6791_v1, %v2331_v53 }
 0x1a0   :  { %v5599_v39 = vadd.f32 %v5598_v30, %v7842_v38  ;;  %v5602_v40 = vadd.f32 %v1700_v22, %v8108_v56  ;;  %v1702_v16 = vpop.f32.mrb[7].mxu0  ;;  %v6522_v22 = vld [vmem:[%s9329_s3 + $0x26c] ss:$16 sps:$4 sm:$0xff]  }
 0x1a1   :  { %v5601_v50 = vadd.f32 %v5600_v0, %v7853_v43  ;;  %v5604_v31 = vadd.f32 %v1702_v16, %v8112_v57  ;;  %3216 = vmatprep.mubr.bf16.mxu0 %v2363_v8  ;;  %3442 = vmatprep.mubr.bf16.mxu1 %v2363_v8  ;;  %v6508_v43 = vld [vmem:[%s9329_s3 + $0x228] ss:$16 sps:$4 sm:$0xff]   ;;  %v6519_v0 = vld [vmem:[%s9329_s3 + $0x264] ss:$16 sps:$4 sm:$0xff]  }
 0x1a2   :  { %v5603_v59 = vadd.f32 %v5602_v40, %v7864_v47  ;;  %3217 = vmatmul.mubr.bf16.vlgmr.msra.gmra.mrb[32].mxu0 %v2362_v32  ;;  %3443 = vmatmul.mubr.bf16.vlgmr.msra.gmra.mrb[64].mxu1 %v2362_v32  ;;  %v6513_v47 = vld [vmem:[%s9329_s3 + $0x244] ss:$16 sps:$4 sm:$0xff]   ;;  %v6517_v32 = vld [vmem:[%s9329_s3 + $0x260] ss:$16 sps:$4 sm:$0xff]  }
 0x1a3   :  { %v5605_v38 = vadd.f32 %v5604_v31, %v7869_v49  ;;  %3298 = vmatpush1.bf16.msra.mxu0 %v6499_v25  ;;  %3524 = vmatpush1.bf16.msra.mxu1 %v6502_v28  ;;  %v6516_v49 = vld [vmem:[%s9329_s3 + $0x24c] ss:$16 sps:$4 sm:$0xff]  }
 0x1a4   :  { %v2334_v61 = vpack.c.bf16 %v5603_v59, %v5599_v39  ;;  %3299 = vmatprep.subr.bf16.mxu0 %v6507_v41  ;;  %3525 = vmatprep.subr.bf16.mxu1 %v6510_v19 }
 0x1a5   :  { %v2335_v63 = vpack.c.bf16 %v5605_v38, %v5601_v50  ;;  %v1706_v3 = vpop.f32.mrb[8].mxu0  ;;  %v6523_v38 = vld [vmem:[%s9329_s3 + $0x280] ss:$16 sps:$4 sm:$0xff]  }
 0x1a6   :  { %v5606_v4 = vadd.f32 %v1706_v3, %v8108_v56  ;;  %v1708_v5 = vpop.f32.mrb[9].mxu0  ;;  %v2366_v33 = vmax.bf16 %v6791_v1, %v2334_v61  ;;  %v6534_v3 = vld [vmem:[%s9329_s3 + $0x2ac] ss:$16 sps:$4 sm:$0xff]  }
 0x1a7   :  { %v5608_v42 = vadd.f32 %v1708_v5, %v8112_v57  ;;  %v1710_v7 = vpop.f32.mrb[10].mxu0  ;;  %v2367_v9 = vmax.bf16 %v6791_v1, %v2335_v63  ;;  %3300 = vmatpush1.bf16.msra.mxu0 %v6505_v60  ;;  %3526 = vmatpush1.bf16.msra.mxu1 %v6508_v43  ;;  %v6526_v60 = vld [vmem:[%s9329_s3 + $0x288] ss:$16 sps:$4 sm:$0xff]   ;;  %v6531_v63 = vld [vmem:[%s9329_s3 + $0x2a4] ss:$16 sps:$4 sm:$0xff]  }
 0x1a8   :  { %v5607_v53 = vadd.f32 %v5606_v4, %v7877_v55  ;;  %v5610_v27 = vadd.f32 %v1710_v7, %v8108_v56  ;;  %v1712_v30 = vpop.f32.mrb[11].mxu0  ;;  %3301 = vmatprep.subr.bf16.mxu0 %v6513_v47  ;;  %3527 = vmatprep.subr.bf16.mxu1 %v6516_v49  ;;  %v6529_v7 = vld [vmem:[%s9329_s3 + $0x2a0] ss:$16 sps:$4 sm:$0xff]  }
 0x1a9   :  { %v5609_v8 = vadd.f32 %v5608_v42, %v7885_v58  ;;  %v5612_v25 = vadd.f32 %v1712_v30, %v8112_v57  ;;  %3226 = vmatprep.mubr.bf16.mxu0 %v2367_v9  ;;  %3452 = vmatprep.mubr.bf16.mxu1 %v2367_v9  ;;  %v6520_v58 = vld [vmem:[%s9329_s3 + $0x268] ss:$16 sps:$4 sm:$0xff]  }
 0x1aa   :  { %v5611_v55 = vadd.f32 %v5610_v27, %v7896_v62  ;;  %3227 = vmatmul.mubr.bf16.gmra.mrb[36].mxu0 %v2366_v33  ;;  %3453 = vmatmul.mubr.bf16.gmra.mrb[68].mxu1 %v2366_v33  ;;  %v6525_v62 = vld [vmem:[%s9329_s3 + $0x284] ss:$16 sps:$4 sm:$0xff]  }
 0x1ab   :  { %v5613_v28 = vadd.f32 %v5612_v25, %v7901_v2  ;;  %3302 = vmatpush1.bf16.msra.mxu0 %v6511_v13  ;;  %3528 = vmatpush1.bf16.msra.mxu1 %v6514_v24  ;;  %v6528_v2 = vld [vmem:[%s9329_s3 + $0x28c] ss:$16 sps:$4 sm:$0xff]  }
 0x1ac   :  { %v2338_v39 = vpack.c.bf16 %v5611_v55, %v5607_v53  ;;  %3303 = vmatprep.subr.bf16.mxu0 %v6519_v0  ;;  %3529 = vmatprep.subr.bf16.mxu1 %v6522_v22  ;;  %v6535_v22 = vld [vmem:[%s9329_s3 + $0x2c0] ss:$16 sps:$4 sm:$0xff]  }
 0x1ad   :  { %v2339_v40 = vpack.c.bf16 %v5613_v28, %v5609_v8  ;;  %v1716_v16 = vpop.f32.mrb[12].mxu0  ;;  %v6538_v8 = vld [vmem:[%s9329_s3 + $0x2c8] ss:$16 sps:$4 sm:$0xff]  }
 0x1ae   :  { %v5614_v41 = vadd.f32 %v1716_v16, %v8108_v56  ;;  %v1718_v19 = vpop.f32.mrb[13].mxu0  ;;  %v2370_v49 = vmax.bf16 %v6791_v1, %v2338_v39  ;;  %v6546_v39 = vld [vmem:[%s9329_s3 + $0x2ec] ss:$16 sps:$4 sm:$0xff]   ;;  %v6541_v16 = vld [vmem:[%s9329_s3 + $0x2e0] ss:$16 sps:$4 sm:$0xff]  }
 0x1af   :  { %v5616_v50 = vadd.f32 %v1718_v19, %v8112_v57  ;;  %v1720_v31 = vpop.f32.mrb[14].mxu0  ;;  %v2371_v59 = vmax.bf16 %v6791_v1, %v2339_v40  ;;  %3304 = vmatpush1.bf16.msra.mxu0 %v6517_v32  ;;  %3530 = vmatpush1.bf16.msra.mxu1 %v6520_v58  ;;  %v6543_v58 = vld [vmem:[%s9329_s3 + $0x2e4] ss:$16 sps:$4 sm:$0xff]  }
 0x1b0   :  { %v5615_v43 = vadd.f32 %v5614_v41, %v7906_v6  ;;  %v5618_v61 = vadd.f32 %v1720_v31, %v8108_v56  ;;  %v1722_v47 = vpop.f32.mrb[15].mxu0  ;;  %3305 = vmatprep.subr.bf16.mxu0 %v6525_v62  ;;  %3531 = vmatprep.subr.bf16.mxu1 %v6528_v2 }
 0x1b1   :  { %v5617_v4 = vadd.f32 %v5616_v50, %v7914_v10  ;;  %v5620_v5 = vadd.f32 %v1722_v47, %v8112_v57  ;;  %3236 = vmatprep.mubr.bf16.mxu0 %v2371_v59  ;;  %3462 = vmatprep.mubr.bf16.mxu1 %v2371_v59  ;;  %v6532_v10 = vld [vmem:[%s9329_s3 + $0x2a8] ss:$16 sps:$4 sm:$0xff]  }
 0x1b2   :  { %v5619_v6 = vadd.f32 %v5618_v61, %v7916_v11  ;;  %3237 = vmatmul.mubr.bf16.gmra.mrb[40].mxu0 %v2370_v49  ;;  %3463 = vmatmul.mubr.bf16.gmra.mrb[72].mxu1 %v2370_v49  ;;  %v6537_v11 = vld [vmem:[%s9329_s3 + $0x2c4] ss:$16 sps:$4 sm:$0xff]   ;;  %v6547_v61 = vld [vmem:[%s9329_s3 + $0x300] ss:$16 sps:$4 sm:$0xff]   ;;  %v6550_v47 = vld [vmem:[%s9329_s3 + $0x308] ss:$16 sps:$4 sm:$0xff]  }
 0x1b3   :  { %v5621_v42 = vadd.f32 %v5620_v5, %v7918_v12  ;;  %3306 = vmatpush1.bf16.msra.mxu0 %v6523_v38  ;;  %3532 = vmatpush1.bf16.msra.mxu1 %v6526_v60  ;;  %v6540_v12 = vld [vmem:[%s9329_s3 + $0x2cc] ss:$16 sps:$4 sm:$0xff]   ;;  %v6555_v5 = vld [vmem:[%s9329_s3 + $0x324] ss:$16 sps:$4 sm:$0xff]  }
 0x1b4   :  { %v2342_v9 = vpack.c.bf16 %v5619_v6, %v5615_v43  ;;  %3307 = vmatprep.subr.bf16.mxu0 %v6531_v63  ;;  %3533 = vmatprep.subr.bf16.mxu1 %v6534_v3  ;;  %v6558_v6 = vld [vmem:[%s9329_s3 + $0x32c] ss:$16 sps:$4 sm:$0xff]  }
 0x1b5   :  { %v2343_v13 = vpack.c.bf16 %v5621_v42, %v5617_v4  ;;  %v1726_v24 = vpop.f32.mrb[16].mxu0 }
 0x1b6   :  { %v5622_v53 = vadd.f32 %v1726_v24, %v8108_v56  ;;  %v1728_v27 = vpop.f32.mrb[17].mxu0  ;;  %v2374_v32 = vmax.bf16 %v6791_v1, %v2342_v9 }
 0x1b7   :  { %v5624_v30 = vadd.f32 %v1728_v27, %v8112_v57  ;;  %v1730_v33 = vpop.f32.mrb[18].mxu0  ;;  %v2375_v0 = vmax.bf16 %v6791_v1, %v2343_v13  ;;  %3308 = vmatpush1.bf16.msra.mxu0 %v6529_v7  ;;  %3534 = vmatpush1.bf16.msra.mxu1 %v6532_v10  ;;  %v6556_v10 = vld [vmem:[%s9329_s3 + $0x328] ss:$16 sps:$4 sm:$0xff]  }
 0x1b8   :  { %v5623_v25 = vadd.f32 %v5622_v53, %v7920_v14  ;;  %v5626_v55 = vadd.f32 %v1730_v33, %v8108_v56  ;;  %v1732_v28 = vpop.f32.mrb[19].mxu0  ;;  %3309 = vmatprep.subr.bf16.mxu0 %v6537_v11  ;;  %3535 = vmatprep.subr.bf16.mxu1 %v6540_v12  ;;  %v6564_v11 = vld [vmem:[%s9329_s3 + $0x34c] ss:$16 sps:$4 sm:$0xff]   ;;  %v6562_v27 = vld [vmem:[%s9329_s3 + $0x348] ss:$16 sps:$4 sm:$0xff]  }
 0x1b9   :  { %v5625_v62 = vadd.f32 %v5624_v30, %v7922_v15  ;;  %v5628_v2 = vadd.f32 %v1732_v28, %v8112_v57  ;;  %3246 = vmatprep.mubr.bf16.mxu0 %v2375_v0  ;;  %3472 = vmatprep.mubr.bf16.mxu1 %v2375_v0  ;;  %v6544_v15 = vld [vmem:[%s9329_s3 + $0x2e8] ss:$16 sps:$4 sm:$0xff]   ;;  %v6570_v0 = vld [vmem:[%s9329_s3 + $0x36c] ss:$16 sps:$4 sm:$0xff]  }
 0x1ba   :  { %v5627_v14 = vadd.f32 %v5626_v55, %v7924_v17  ;;  %3247 = vmatmul.mubr.bf16.gmra.mrb[44].mxu0 %v2374_v32  ;;  %3473 = vmatmul.mubr.bf16.gmra.mrb[76].mxu1 %v2374_v32  ;;  %v6549_v17 = vld [vmem:[%s9329_s3 + $0x304] ss:$16 sps:$4 sm:$0xff]  }
 0x1bb   :  { %v5629_v40 = vadd.f32 %v5628_v2, %v7926_v18  ;;  %3310 = vmatpush1.bf16.msra.mxu0 %v6535_v22  ;;  %3536 = vmatpush1.bf16.msra.mxu1 %v6538_v8  ;;  %v6552_v18 = vld [vmem:[%s9329_s3 + $0x30c] ss:$16 sps:$4 sm:$0xff]   ;;  %v6565_v2 = vld [vmem:[%s9329_s3 + $0x360] ss:$16 sps:$4 sm:$0xff]  }
 0x1bc   :  { %v2346_v41 = vpack.c.bf16 %v5627_v14, %v5623_v25  ;;  %3311 = vmatprep.subr.bf16.mxu0 %v6543_v58  ;;  %3537 = vmatprep.subr.bf16.mxu1 %v6546_v39 }
 0x1bd   :  { %v2347_v19 = vpack.c.bf16 %v5629_v40, %v5625_v62  ;;  %v1736_v50 = vpop.f32.mrb[20].mxu0  ;;  %v6576_v40 = vld [vmem:[%s9329_s3 + $0x38c] ss:$16 sps:$4 sm:$0xff]  }
 0x1be   :  { %v5630_v31 = vadd.f32 %v1736_v50, %v8108_v56  ;;  %v1738_v59 = vpop.f32.mrb[21].mxu0  ;;  %v2378_v4 = vmax.bf16 %v6791_v1, %v2346_v41 }
 0x1bf   :  { %v5632_v38 = vadd.f32 %v1738_v59, %v8112_v57  ;;  %v1740_v60 = vpop.f32.mrb[22].mxu0  ;;  %v2379_v43 = vmax.bf16 %v6791_v1, %v2347_v19  ;;  %3312 = vmatpush1.bf16.msra.mxu0 %v6541_v16  ;;  %3538 = vmatpush1.bf16.msra.mxu1 %v6544_v15 }
 0x1c0   :  { %v5631_v49 = vadd.f32 %v5630_v31, %v7929_v20  ;;  %v5634_v63 = vadd.f32 %v1740_v60, %v8108_v56  ;;  %v1742_v3 = vpop.f32.mrb[23].mxu0  ;;  %3313 = vmatprep.subr.bf16.mxu0 %v6549_v17  ;;  %3539 = vmatprep.subr.bf16.mxu1 %v6552_v18  ;;  %v6553_v20 = vld [vmem:[%s9329_s3 + $0x320] ss:$16 sps:$4 sm:$0xff]   ;;  %v6574_v18 = vld [vmem:[%s9329_s3 + $0x388] ss:$16 sps:$4 sm:$0xff]  }
 0x1c1   :  { %v5633_v42 = vadd.f32 %v5632_v38, %v7931_v21  ;;  %v5636_v7 = vadd.f32 %v1742_v3, %v8112_v57  ;;  %3256 = vmatprep.mubr.bf16.mxu0 %v2379_v43  ;;  %3482 = vmatprep.mubr.bf16.mxu1 %v2379_v43  ;;  %v6561_v21 = vld [vmem:[%s9329_s3 + $0x344] ss:$16 sps:$4 sm:$0xff]   ;;  %v6582_v31 = vld [vmem:[%s9329_s3 + $0x3ac] ss:$16 sps:$4 sm:$0xff]  }
 0x1c2   :  { %v5635_v9 = vadd.f32 %v5634_v63, %v7933_v23  ;;  %3257 = vmatmul.mubr.bf16.gmra.mrb[48].mxu0 %v2378_v4  ;;  %3483 = vmatmul.mubr.bf16.gmra.mrb[80].mxu1 %v2378_v4  ;;  %v6559_v23 = vld [vmem:[%s9329_s3 + $0x340] ss:$16 sps:$4 sm:$0xff]  }
 0x1c3   :  { %v5637_v12 = vadd.f32 %v5636_v7, %v7938_v26  ;;  %3314 = vmatpush1.bf16.msra.mxu0 %v6547_v61  ;;  %3540 = vmatpush1.bf16.msra.mxu1 %v6550_v47  ;;  %v6567_v26 = vld [vmem:[%s9329_s3 + $0x364] ss:$16 sps:$4 sm:$0xff]   ;;  %v6577_v4 = vld [vmem:[%s9329_s3 + $0x3a0] ss:$16 sps:$4 sm:$0xff]   ;;  %v8364_v7 = vsub.s32 3, %v8093_v51 }
 0x1c4   :  { %v2350_v13 = vpack.c.bf16 %v5635_v9, %v5631_v49  ;;  %3315 = vmatprep.subr.bf16.mxu0 %v6555_v5  ;;  %3541 = vmatprep.subr.bf16.mxu1 %v6558_v6  ;;  %v6594_v9 = vld [vmem:[%s9329_s3 + $0x3ec] ss:$16 sps:$4 sm:$0xff]  }
 0x1c5   :  { %v2351_v24 = vpack.c.bf16 %v5637_v12, %v5633_v42  ;;  %v1746_v53 = vpop.f32.mrb[24].mxu0  ;;  %v8361_v42 = vsub.s32 2, %v8093_v51 }
 0x1c6   :  { %v5638_v30 = vadd.f32 %v1746_v53, %v8108_v56  ;;  %v1748_v33 = vpop.f32.mrb[25].mxu0  ;;  %v2382_v58 = vmax.bf16 %v6791_v1, %v2350_v13  ;;  %v8386_v13 = vrot.slane %v8101_v29, %v8364_v7 }
 0x1c7   :  { %v5640_v22 = vadd.f32 %v1748_v33, %v8112_v57  ;;  %v1750_v8 = vpop.f32.mrb[26].mxu0  ;;  %v2383_v25 = vmax.bf16 %v6791_v1, %v2351_v24  ;;  %3316 = vmatpush1.bf16.msra.mxu0 %v6553_v20  ;;  %3542 = vmatpush1.bf16.msra.mxu1 %v6556_v10  ;;  %v6583_v20 = vld [vmem:[%s9329_s3 + $0x3c0] ss:$16 sps:$4 sm:$0xff]   ;;  %v6591_v10 = vld [vmem:[%s9329_s3 + $0x3e4] ss:$16 sps:$4 sm:$0xff]   ;;  %v8381_v51 = vrot.slane %v8101_v29, %v8361_v42 }
 0x1c8   :  { %v5639_v55 = vadd.f32 %v5638_v30, %v7952_v34  ;;  %v5642_v28 = vadd.f32 %v1750_v8, %v8108_v56  ;;  %v1752_v32 = vpop.f32.mrb[27].mxu0  ;;  %3317 = vmatprep.subr.bf16.mxu0 %v6561_v21  ;;  %3543 = vmatprep.subr.bf16.mxu1 %v6564_v11  ;;  %v6568_v34 = vld [vmem:[%s9329_s3 + $0x368] ss:$16 sps:$4 sm:$0xff]  }
 0x1c9   :  { %v5641_v39 = vadd.f32 %v5640_v22, %v7954_v35  ;;  %v5644_v62 = vadd.f32 %v1752_v32, %v8112_v57  ;;  %3266 = vmatprep.mubr.bf16.mxu0 %v2383_v25  ;;  %3492 = vmatprep.mubr.bf16.mxu1 %v2383_v25  ;;  %v6573_v35 = vld [vmem:[%s9329_s3 + $0x384] ss:$16 sps:$4 sm:$0xff]  }
 0x1ca   :  { %v5643_v14 = vadd.f32 %v5642_v28, %v7956_v36  ;;  %3267 = vmatmul.mubr.bf16.gmra.mrb[52].mxu0 %v2382_v58  ;;  %3493 = vmatmul.mubr.bf16.gmra.mrb[84].mxu1 %v2382_v58  ;;  %v6571_v36 = vld [vmem:[%s9329_s3 + $0x380] ss:$16 sps:$4 sm:$0xff]  }
 0x1cb   :  { %v5645_v16 = vadd.f32 %v5644_v62, %v7961_v37  ;;  %3318 = vmatpush1.bf16.msra.mxu0 %v6559_v23  ;;  %3544 = vmatpush1.bf16.msra.mxu1 %v6562_v27  ;;  %v6579_v37 = vld [vmem:[%s9329_s3 + $0x3a4] ss:$16 sps:$4 sm:$0xff]   ;;  %v6589_v23 = vld [vmem:[%s9329_s3 + $0x3e0] ss:$16 sps:$4 sm:$0xff]   ;;  %v6592_v27 = vld [vmem:[%s9329_s3 + $0x3e8] ss:$16 sps:$4 sm:$0xff]  }
 0x1cc   :  { %v2354_v15 = vpack.c.bf16 %v5643_v14, %v5639_v55  ;;  %3319 = vmatprep.subr.bf16.mxu0 %v6567_v26  ;;  %3545 = vmatprep.subr.bf16.mxu1 %v6570_v0  ;;  %v6597_v26 = vld [vmem:[%s9331_s5 + $0x4] ss:$16 sps:$4 sm:$0xff]   ;;  %v6600_v0 = vld [vmem:[%s9331_s5 + $0xc] ss:$16 sps:$4 sm:$0xff]   ;;  %v6595_v58 = vld [vmem:[%s9331_s5] ss:$16 sps:$4 sm:$0xff]  }
 0x1cd   :  { %v2355_v41 = vpack.c.bf16 %v5645_v16, %v5641_v39  ;;  %v1756_v17 = vpop.f32.mrb[28].mxu0  ;;  %v6598_v39 = vld [vmem:[%s9331_s5 + $0x8] ss:$16 sps:$4 sm:$0xff]   ;;  %v6606_v14 = vld [vmem:[%s9331_s5 + $0x2c] ss:$16 sps:$4 sm:$0xff]  }
 0x1ce   :  { %v5646_v19 = vadd.f32 %v1756_v17, %v8108_v56  ;;  %v1758_v50 = vpop.f32.mrb[29].mxu0  ;;  %v2386_v49 = vmax.bf16 %v6791_v1, %v2354_v15 }
 0x1cf   :  { %v5648_v59 = vadd.f32 %v1758_v50, %v8112_v57  ;;  %v1760_v38 = vpop.f32.mrb[30].mxu0  ;;  %v2387_v60 = vmax.bf16 %v6791_v1, %v2355_v41  ;;  %3320 = vmatpush1.bf16.msra.mxu0 %v6565_v2  ;;  %3546 = vmatpush1.bf16.msra.mxu1 %v6568_v34  ;;  %v6603_v34 = vld [vmem:[%s9331_s5 + $0x24] ss:$16 sps:$4 sm:$0xff]  }
 0x1d0   :  { %v5647_v43 = vadd.f32 %v5646_v19, %v7975_v44  ;;  %v5650_v61 = vadd.f32 %v1760_v38, %v8108_v56  ;;  %v1762_v47 = vpop.f32.mrb[31].mxu0  ;;  %3321 = vmatprep.subr.bf16.mxu0 %v6573_v35  ;;  %3547 = vmatprep.subr.bf16.mxu1 %v6576_v40  ;;  %v6580_v44 = vld [vmem:[%s9329_s3 + $0x3a8] ss:$16 sps:$4 sm:$0xff]   ;;  %v6609_v50 = vld [vmem:[%s9331_s5 + $0x44] ss:$16 sps:$4 sm:$0xff]  }
 0x1d1   :  { %v5649_v63 = vadd.f32 %v5648_v59, %v7977_v45  ;;  %v5652_v3 = vadd.f32 %v1762_v47, %v8112_v57  ;;  %3276 = vmatprep.mubr.bf16.mxu0 %v2387_v60  ;;  %3502 = vmatprep.mubr.bf16.mxu1 %v2387_v60  ;;  %v6585_v45 = vld [vmem:[%s9329_s3 + $0x3c4] ss:$16 sps:$4 sm:$0xff]   ;;  %v6588_v57 = vld [vmem:[%s9329_s3 + $0x3cc] ss:$16 sps:$4 sm:$0xff]   ;;  %v6607_v60 = vld [vmem:[%s9331_s5 + $0x40] ss:$16 sps:$4 sm:$0xff]  }
 0x1d2   :  { %v5651_v56 = vadd.f32 %v5650_v61, %v7979_v46  ;;  %3277 = vmatmul.mubr.bf16.gmra.mrb[56].mxu0 %v2386_v49  ;;  %3503 = vmatmul.mubr.bf16.gmra.mrb[88].mxu1 %v2386_v49  ;;  %v6615_v49 = vld [vmem:[%s9331_s5 + $0x64] ss:$16 sps:$4 sm:$0xff]  }
 0x1d3   :  { %v5653_v5 = vadd.f32 %v5652_v3, %v7984_v48  ;;  %3322 = vmatpush1.bf16.msra.mxu0 %v6571_v36  ;;  %3548 = vmatpush1.bf16.msra.mxu1 %v6574_v18  ;;  %v6586_v48 = vld [vmem:[%s9329_s3 + $0x3c8] ss:$16 sps:$4 sm:$0xff]   ;;  %v6601_v36 = vld [vmem:[%s9331_s5 + $0x20] ss:$16 sps:$4 sm:$0xff]  }
 0x1d4   :  { %v2358_v6 = vpack.c.bf16 %v5651_v56, %v5647_v43  ;;  %3323 = vmatprep.subr.bf16.mxu0 %v6579_v37  ;;  %3549 = vmatprep.subr.bf16.mxu1 %v6582_v31  ;;  %v6604_v18 = vld [vmem:[%s9331_s5 + $0x28] ss:$16 sps:$4 sm:$0xff]   ;;  %v6612_v37 = vld [vmem:[%s9331_s5 + $0x4c] ss:$16 sps:$4 sm:$0xff]  }
 0x1d5   :  { %v2359_v46 = vpack.c.bf16 %v5653_v5, %v5649_v63  ;;  %v6610_v43 = vld [vmem:[%s9331_s5 + $0x48] ss:$16 sps:$4 sm:$0xff]   ;;  %v6618_v63 = vld [vmem:[%s9331_s5 + $0x6c] ss:$16 sps:$4 sm:$0xff]   ;;  %v6613_v5 = vld [vmem:[%s9331_s5 + $0x60] ss:$16 sps:$4 sm:$0xff]  }
 0x1d6   :  { %v2390_v11 = vmax.bf16 %v6791_v1, %v2358_v6  ;;  %v6616_v6 = vld [vmem:[%s9331_s5 + $0x68] ss:$16 sps:$4 sm:$0xff]  }
 0x1d7   :  { %v2391_v21 = vmax.bf16 %v6791_v1, %v2359_v46  ;;  %3324 = vmatpush1.bf16.msra.mxu0 %v6577_v4  ;;  %3550 = vmatpush1.bf16.msra.mxu1 %v6580_v44 }
 0x1d8   :  { %3325 = vmatprep.subr.bf16.mxu0 %v6585_v45  ;;  %3551 = vmatprep.subr.bf16.mxu1 %v6588_v57 }
 0x1d9   :  { %3286 = vmatprep.mubr.bf16.mxu0 %v2391_v21  ;;  %3512 = vmatprep.mubr.bf16.mxu1 %v2391_v21 }
 0x1da   :  { %v2251_v12 = vpop.f32.mrb[32].mxu1  ;;  %3287 = vmatmul.mubr.bf16.gmra.mrb[60].mxu0 %v2390_v11  ;;  %3513 = vmatmul.mubr.bf16.gmra.mrb[92].mxu1 %v2390_v11  ;;  %v6619_v11 = vld [vmem:[%s9331_s5 + $0x80] ss:$16 sps:$4 sm:$0xff]  }
 0x1db   :  { %v2253_v24 = vpop.f32.mrb[33].mxu1  ;;  %3326 = vmatpush1.bf16.msra.mxu0 %v6583_v20  ;;  %3552 = vmatpush1.bf16.msra.mxu1 %v6586_v48  ;;  %v5654_v30 = vadd.f32 %v2251_v12, %v8381_v51  ;;  %v6621_v20 = vld [vmem:[%s9331_s5 + $0x84] ss:$16 sps:$4 sm:$0xff]   ;;  %v6624_v48 = vld [vmem:[%s9331_s5 + $0x8c] ss:$16 sps:$4 sm:$0xff]  }
 0x1dc   :  { %v2255_v53 = vpop.f32.mrb[34].mxu1  ;;  %3327 = vmatprep.subr.bf16.mxu0 %v6591_v10  ;;  %3553 = vmatprep.subr.bf16.mxu1 %v6594_v9  ;;  %v5655_v22 = vadd.f32 %v2253_v24, %v8386_v13  ;;  %v6622_v12 = vld [vmem:[%s9331_s5 + $0x88] ss:$16 sps:$4 sm:$0xff]  }
 0x1dd   :  { %v5656_v33 = vadd.f32 %v2255_v53, %v8381_v51  ;;  %v2257_v29 = vpop.f32.mrb[35].mxu1 }
 0x1de   :  { %v5657_v8 = vadd.f32 %v2257_v29, %v8386_v13 }
 0x1df   :  { %v2332_v25 = vpack.c.bf16 %v5656_v33, %v5654_v30  ;;  %3328 = vmatpush1.bf16.msra.mxu0 %v6589_v23  ;;  %3554 = vmatpush1.bf16.msra.mxu1 %v6592_v27  ;;  %v6627_v23 = vld [vmem:[%s9331_s5 + $0xa4] ss:$16 sps:$4 sm:$0xff]   ;;  %v6630_v27 = vld [vmem:[%s9331_s5 + $0xac] ss:$16 sps:$4 sm:$0xff]  }
 0x1e0   :  { %v2333_v55 = vpack.c.bf16 %v5657_v8, %v5655_v22  ;;  %4490 = vmatprep.subr.bf16.mxu0 %v6597_v26  ;;  %4716 = vmatprep.subr.bf16.mxu1 %v6600_v0  ;;  %v6625_v8 = vld [vmem:[%s9331_s5 + $0xa0] ss:$16 sps:$4 sm:$0xff]  }
 0x1e1   :  { %v2364_v62 = vmax.bf16 %v6791_v1, %v2332_v25  ;;  %v6628_v25 = vld [vmem:[%s9331_s5 + $0xa8] ss:$16 sps:$4 sm:$0xff]  }
 0x1e2   :  { %v2261_v28 = vpop.f32.mrb[36].mxu1  ;;  %v2365_v32 = vmax.bf16 %v6791_v1, %v2333_v55 }
 0x1e3   :  { %v2263_v2 = vpop.f32.mrb[37].mxu1  ;;  %v5658_v40 = vadd.f32 %v2261_v28, %v8381_v51  ;;  %v6633_v28 = vld [vmem:[%s9331_s5 + $0xc4] ss:$16 sps:$4 sm:$0xff]  }
 0x1e4   :  { %v2265_v35 = vpop.f32.mrb[38].mxu1  ;;  %3329 = vmatprep.mubr.bf16.mxu0 %v2365_v32  ;;  %3555 = vmatprep.mubr.bf16.mxu1 %v2365_v32  ;;  %v5659_v41 = vadd.f32 %v2263_v2, %v8386_v13  ;;  %v6636_v32 = vld [vmem:[%s9331_s5 + $0xcc] ss:$16 sps:$4 sm:$0xff]   ;;  %v6631_v2 = vld [vmem:[%s9331_s5 + $0xc0] ss:$16 sps:$4 sm:$0xff]  }
 0x1e5   :  { %v5660_v16 = vadd.f32 %v2265_v35, %v8381_v51  ;;  %v2267_v15 = vpop.f32.mrb[39].mxu1  ;;  %3330 = vmatmul.mubr.bf16.vlgmr.msra.gmra.mrb[32].mxu0 %v2364_v62  ;;  %3556 = vmatmul.mubr.bf16.vlgmr.msra.gmra.mrb[64].mxu1 %v2364_v62 }
 0x1e6   :  { %v5661_v17 = vadd.f32 %v2267_v15, %v8386_v13  ;;  %4491 = vmatpush1.bf16.msra.mxu0 %v6595_v58  ;;  %4717 = vmatpush1.bf16.msra.mxu1 %v6598_v39 }
 0x1e7   :  { %v2336_v19 = vpack.c.bf16 %v5660_v16, %v5658_v40  ;;  %4492 = vmatprep.subr.bf16.mxu0 %v6603_v34  ;;  %4718 = vmatprep.subr.bf16.mxu1 %v6606_v14  ;;  %v6634_v34 = vld [vmem:[%s9331_s5 + $0xc8] ss:$16 sps:$4 sm:$0xff]   ;;  %v6639_v40 = vld [vmem:[%s9331_s5 + $0xe4] ss:$16 sps:$4 sm:$0xff]   ;;  %v6642_v16 = vld [vmem:[%s9331_s5 + $0xec] ss:$16 sps:$4 sm:$0xff]  }
 0x1e8   :  { %v2337_v31 = vpack.c.bf16 %v5661_v17, %v5659_v41 }
 0x1e9   :  { %v2368_v47 = vmax.bf16 %v6791_v1, %v2336_v19 }
 0x1ea   :  { %v2271_v59 = vpop.f32.mrb[40].mxu1  ;;  %v2369_v38 = vmax.bf16 %v6791_v1, %v2337_v31  ;;  %4493 = vmatpush1.bf16.msra.mxu0 %v6601_v36  ;;  %4719 = vmatpush1.bf16.msra.mxu1 %v6604_v18 }
 0x1eb   :  { %v2273_v61 = vpop.f32.mrb[41].mxu1  ;;  %4494 = vmatprep.subr.bf16.mxu0 %v6609_v50  ;;  %4720 = vmatprep.subr.bf16.mxu1 %v6612_v37  ;;  %v5662_v4 = vadd.f32 %v2271_v59, %v8381_v51  ;;  %v6637_v50 = vld [vmem:[%s9331_s5 + $0xe0] ss:$16 sps:$4 sm:$0xff]   ;;  %v6640_v37 = vld [vmem:[%s9331_s5 + $0xe8] ss:$16 sps:$4 sm:$0xff]  }
 0x1ec   :  { %v2275_v3 = vpop.f32.mrb[42].mxu1  ;;  %3339 = vmatprep.mubr.bf16.mxu0 %v2369_v38  ;;  %3565 = vmatprep.mubr.bf16.mxu1 %v2369_v38  ;;  %v5663_v45 = vadd.f32 %v2273_v61, %v8386_v13  ;;  %v6645_v59 = vld [vmem:[%s9331_s5 + $0x104] ss:$16 sps:$4 sm:$0xff]   ;;  %v6648_v38 = vld [vmem:[%s9331_s5 + $0x10c] ss:$16 sps:$4 sm:$0xff]  }
 0x1ed   :  { %v5664_v44 = vadd.f32 %v2275_v3, %v8381_v51  ;;  %v2277_v56 = vpop.f32.mrb[43].mxu1  ;;  %3340 = vmatmul.mubr.bf16.gmra.mrb[36].mxu0 %v2368_v47  ;;  %3566 = vmatmul.mubr.bf16.gmra.mrb[68].mxu1 %v2368_v47  ;;  %v6643_v47 = vld [vmem:[%s9331_s5 + $0x100] ss:$16 sps:$4 sm:$0xff]  }
 0x1ee   :  { %v5665_v57 = vadd.f32 %v2277_v56, %v8386_v13  ;;  %4495 = vmatpush1.bf16.msra.mxu0 %v6607_v60  ;;  %4721 = vmatpush1.bf16.msra.mxu1 %v6610_v43 }
 0x1ef   :  { %v2340_v46 = vpack.c.bf16 %v5664_v44, %v5662_v4  ;;  %4496 = vmatprep.subr.bf16.mxu0 %v6615_v49  ;;  %4722 = vmatprep.subr.bf16.mxu1 %v6618_v63  ;;  %v6646_v49 = vld [vmem:[%s9331_s5 + $0x108] ss:$16 sps:$4 sm:$0xff]   ;;  %v6651_v4 = vld [vmem:[%s9331_s5 + $0x124] ss:$16 sps:$4 sm:$0xff]   ;;  %v6654_v44 = vld [vmem:[%s9331_s5 + $0x12c] ss:$16 sps:$4 sm:$0xff]  }
 0x1f0   :  { %v2341_v10 = vpack.c.bf16 %v5665_v57, %v5663_v45 }
 0x1f1   :  { %v2372_v53 = vmax.bf16 %v6791_v1, %v2340_v46 }
 0x1f2   :  { %v2281_v9 = vpop.f32.mrb[44].mxu1  ;;  %v2373_v21 = vmax.bf16 %v6791_v1, %v2341_v10  ;;  %4497 = vmatpush1.bf16.msra.mxu0 %v6613_v5  ;;  %4723 = vmatpush1.bf16.msra.mxu1 %v6616_v6 }
 0x1f3   :  { %v2283_v24 = vpop.f32.mrb[45].mxu1  ;;  %4498 = vmatprep.subr.bf16.mxu0 %v6621_v20  ;;  %4724 = vmatprep.subr.bf16.mxu1 %v6624_v48  ;;  %v5666_v33 = vadd.f32 %v2281_v9, %v8381_v51  ;;  %v6649_v20 = vld [vmem:[%s9331_s5 + $0x120] ss:$16 sps:$4 sm:$0xff]   ;;  %v6652_v48 = vld [vmem:[%s9331_s5 + $0x128] ss:$16 sps:$4 sm:$0xff]  }
 0x1f4   :  { %v2285_v30 = vpop.f32.mrb[46].mxu1  ;;  %3349 = vmatprep.mubr.bf16.mxu0 %v2373_v21  ;;  %3575 = vmatprep.mubr.bf16.mxu1 %v2373_v21  ;;  %v5667_v0 = vadd.f32 %v2283_v24, %v8386_v13  ;;  %v6657_v9 = vld [vmem:[%s9331_s5 + $0x144] ss:$16 sps:$4 sm:$0xff]   ;;  %v6660_v21 = vld [vmem:[%s9331_s5 + $0x14c] ss:$16 sps:$4 sm:$0xff]  }
 0x1f5   :  { %v5668_v29 = vadd.f32 %v2285_v30, %v8381_v51  ;;  %v2287_v26 = vpop.f32.mrb[47].mxu1  ;;  %3350 = vmatmul.mubr.bf16.gmra.mrb[40].mxu0 %v2372_v53  ;;  %3576 = vmatmul.mubr.bf16.gmra.mrb[72].mxu1 %v2372_v53  ;;  %v6655_v53 = vld [vmem:[%s9331_s5 + $0x140] ss:$16 sps:$4 sm:$0xff]  }
 0x1f6   :  { %v5669_v22 = vadd.f32 %v2287_v26, %v8386_v13  ;;  %4499 = vmatpush1.bf16.msra.mxu0 %v6619_v11  ;;  %4725 = vmatpush1.bf16.msra.mxu1 %v6622_v12 }
 0x1f7   :  { %v2344_v55 = vpack.c.bf16 %v5668_v29, %v5666_v33  ;;  %4500 = vmatprep.subr.bf16.mxu0 %v6627_v23  ;;  %4726 = vmatprep.subr.bf16.mxu1 %v6630_v27  ;;  %v6658_v23 = vld [vmem:[%s9331_s5 + $0x148] ss:$16 sps:$4 sm:$0xff]   ;;  %v6663_v33 = vld [vmem:[%s9331_s5 + $0x164] ss:$16 sps:$4 sm:$0xff]   ;;  %v6666_v29 = vld [vmem:[%s9331_s5 + $0x16c] ss:$16 sps:$4 sm:$0xff]  }
 0x1f8   :  { %v2345_v58 = vpack.c.bf16 %v5669_v22, %v5667_v0 }
 0x1f9   :  { %v2376_v35 = vmax.bf16 %v6791_v1, %v2344_v55 }
 0x1fa   :  { %v2291_v39 = vpop.f32.mrb[48].mxu1  ;;  %v2377_v62 = vmax.bf16 %v6791_v1, %v2345_v58  ;;  %4501 = vmatpush1.bf16.msra.mxu0 %v6625_v8  ;;  %4727 = vmatpush1.bf16.msra.mxu1 %v6628_v25 }
 0x1fb   :  { %v2293_v14 = vpop.f32.mrb[49].mxu1  ;;  %4502 = vmatprep.subr.bf16.mxu0 %v6633_v28  ;;  %4728 = vmatprep.subr.bf16.mxu1 %v6636_v32  ;;  %v5670_v41 = vadd.f32 %v2291_v39, %v8381_v51  ;;  %v6661_v28 = vld [vmem:[%s9331_s5 + $0x160] ss:$16 sps:$4 sm:$0xff]   ;;  %v6664_v32 = vld [vmem:[%s9331_s5 + $0x168] ss:$16 sps:$4 sm:$0xff]  }
 0x1fc   :  { %v2295_v15 = vpop.f32.mrb[50].mxu1  ;;  %3359 = vmatprep.mubr.bf16.mxu0 %v2377_v62  ;;  %3585 = vmatprep.mubr.bf16.mxu1 %v2377_v62  ;;  %v5671_v18 = vadd.f32 %v2293_v14, %v8386_v13  ;;  %v6669_v39 = vld [vmem:[%s9331_s5 + $0x184] ss:$16 sps:$4 sm:$0xff]   ;;  %v6672_v62 = vld [vmem:[%s9331_s5 + $0x18c] ss:$16 sps:$4 sm:$0xff]  }
 0x1fd   :  { %v5672_v17 = vadd.f32 %v2295_v15, %v8381_v51  ;;  %v2297_v36 = vpop.f32.mrb[51].mxu1  ;;  %3360 = vmatmul.mubr.bf16.gmra.mrb[44].mxu0 %v2376_v35  ;;  %3586 = vmatmul.mubr.bf16.gmra.mrb[76].mxu1 %v2376_v35  ;;  %v6667_v35 = vld [vmem:[%s9331_s5 + $0x180] ss:$16 sps:$4 sm:$0xff]  }
 0x1fe   :  { %v5673_v19 = vadd.f32 %v2297_v36, %v8386_v13  ;;  %4503 = vmatpush1.bf16.msra.mxu0 %v6631_v2  ;;  %4729 = vmatpush1.bf16.msra.mxu1 %v6634_v34 }
 0x1ff   :  { %v2348_v31 = vpack.c.bf16 %v5672_v17, %v5670_v41  ;;  %4504 = vmatprep.subr.bf16.mxu0 %v6639_v40  ;;  %4730 = vmatprep.subr.bf16.mxu1 %v6642_v16  ;;  %v6670_v40 = vld [vmem:[%s9331_s5 + $0x188] ss:$16 sps:$4 sm:$0xff]   ;;  %v6675_v41 = vld [vmem:[%s9331_s5 + $0x1a4] ss:$16 sps:$4 sm:$0xff]   ;;  %v6678_v17 = vld [vmem:[%s9331_s5 + $0x1ac] ss:$16 sps:$4 sm:$0xff]  }
 0x200   :  { %v2349_v60 = vpack.c.bf16 %v5673_v19, %v5671_v18 }
 0x201   :  { %v2380_v3 = vmax.bf16 %v6791_v1, %v2348_v31 }
 0x202   :  { %v2301_v43 = vpop.f32.mrb[52].mxu1  ;;  %v2381_v61 = vmax.bf16 %v6791_v1, %v2349_v60  ;;  %4505 = vmatpush1.bf16.msra.mxu0 %v6637_v50  ;;  %4731 = vmatpush1.bf16.msra.mxu1 %v6640_v37 }
 0x203   :  { %v2303_v63 = vpop.f32.mrb[53].mxu1  ;;  %4506 = vmatprep.subr.bf16.mxu0 %v6645_v59  ;;  %4732 = vmatprep.subr.bf16.mxu1 %v6648_v38  ;;  %v5674_v45 = vadd.f32 %v2301_v43, %v8381_v51  ;;  %v6673_v59 = vld [vmem:[%s9331_s5 + $0x1a0] ss:$16 sps:$4 sm:$0xff]   ;;  %v6676_v38 = vld [vmem:[%s9331_s5 + $0x1a8] ss:$16 sps:$4 sm:$0xff]  }
 0x204   :  { %v2305_v56 = vpop.f32.mrb[54].mxu1  ;;  %3369 = vmatprep.mubr.bf16.mxu0 %v2381_v61  ;;  %3595 = vmatprep.mubr.bf16.mxu1 %v2381_v61  ;;  %v5675_v6 = vadd.f32 %v2303_v63, %v8386_v13  ;;  %v6681_v61 = vld [vmem:[%s9331_s5 + $0x1c4] ss:$16 sps:$4 sm:$0xff]   ;;  %v6682_v63 = vld [vmem:[%s9331_s5 + $0x1c8] ss:$16 sps:$4 sm:$0xff]  }
 0x205   :  { %v5676_v57 = vadd.f32 %v2305_v56, %v8381_v51  ;;  %v2307_v5 = vpop.f32.mrb[55].mxu1  ;;  %3370 = vmatmul.mubr.bf16.gmra.mrb[48].mxu0 %v2380_v3  ;;  %3596 = vmatmul.mubr.bf16.gmra.mrb[80].mxu1 %v2380_v3  ;;  %v6687_v3 = vld [vmem:[%s9331_s5 + $0x1e4] ss:$16 sps:$4 sm:$0xff]   ;;  %v6688_v56 = vld [vmem:[%s9331_s5 + $0x1e8] ss:$16 sps:$4 sm:$0xff]  }
 0x206   :  { %v5677_v46 = vadd.f32 %v2307_v5, %v8386_v13  ;;  %4507 = vmatpush1.bf16.msra.mxu0 %v6643_v47  ;;  %4733 = vmatpush1.bf16.msra.mxu1 %v6646_v49  ;;  %v6684_v47 = vld [vmem:[%s9331_s5 + $0x1cc] ss:$16 sps:$4 sm:$0xff]   ;;  %v6679_v49 = vld [vmem:[%s9331_s5 + $0x1c0] ss:$16 sps:$4 sm:$0xff]  }
 0x207   :  { %v2352_v10 = vpack.c.bf16 %v5676_v57, %v5674_v45  ;;  %4508 = vmatprep.subr.bf16.mxu0 %v6651_v4  ;;  %4734 = vmatprep.subr.bf16.mxu1 %v6654_v44  ;;  %v6690_v4 = vld [vmem:[%s9331_s5 + $0x1ec] ss:$16 sps:$4 sm:$0xff]   ;;  %v6685_v44 = vld [vmem:[%s9331_s5 + $0x1e0] ss:$16 sps:$4 sm:$0xff]   ;;  %v6693_v45 = vld [vmem:[%s9331_s5 + $0x204] ss:$16 sps:$4 sm:$0xff]  }
 0x208   :  { %v2353_v11 = vpack.c.bf16 %v5677_v46, %v5675_v6  ;;  %v6696_v57 = vld [vmem:[%s9331_s5 + $0x20c] ss:$16 sps:$4 sm:$0xff]   ;;  %v2522_v5 = vld [vmem:[%s9332_s4] sm:$0xf] }
 0x209   :  { %v2384_v30 = vmax.bf16 %v6791_v1, %v2352_v10  ;;  %v8644_v6 = vrot.slane %v2522_v5, %v8096_v52  ;;  %v8647_v46 = vrot.slane %v2522_v5, %v8361_v42  ;;  %v8650_v10 = vrot.slane %v2522_v5, %v8104_v54 }
 0x20a   :  { %v2311_v12 = vpop.f32.mrb[56].mxu1  ;;  %v2385_v24 = vmax.bf16 %v6791_v1, %v2353_v11  ;;  %4509 = vmatpush1.bf16.msra.mxu0 %v6649_v20  ;;  %4735 = vmatpush1.bf16.msra.mxu1 %v6652_v48 }
 0x20b   :  { %v2313_v27 = vpop.f32.mrb[57].mxu1  ;;  %4510 = vmatprep.subr.bf16.mxu0 %v6657_v9  ;;  %4736 = vmatprep.subr.bf16.mxu1 %v6660_v21  ;;  %v5678_v0 = vadd.f32 %v2311_v12, %v8381_v51  ;;  %v8653_v9 = vrot.slane %v2522_v5, %v8364_v7  ;;  %v6706_v5 = vld [vmem:[%s9331_s5 + $0x248] ss:$16 sps:$4 sm:$0xff]  }
 0x20c   :  { %v2315_v26 = vpop.f32.mrb[58].mxu1  ;;  %3379 = vmatprep.mubr.bf16.mxu0 %v2385_v24  ;;  %3605 = vmatprep.mubr.bf16.mxu1 %v2385_v24  ;;  %v5679_v25 = vadd.f32 %v2313_v27, %v8386_v13 }
 0x20d   :  { %v5680_v22 = vadd.f32 %v2315_v26, %v8381_v51  ;;  %v2317_v8 = vpop.f32.mrb[59].mxu1  ;;  %3380 = vmatmul.mubr.bf16.gmra.mrb[52].mxu0 %v2384_v30  ;;  %3606 = vmatmul.mubr.bf16.gmra.mrb[84].mxu1 %v2384_v30 }
 0x20e   :  { %v5681_v55 = vadd.f32 %v2317_v8, %v8386_v13  ;;  %4511 = vmatpush1.bf16.msra.mxu0 %v6655_v53  ;;  %4737 = vmatpush1.bf16.msra.mxu1 %v6658_v23 }
 0x20f   :  { %v2356_v58 = vpack.c.bf16 %v5680_v22, %v5678_v0  ;;  %4512 = vmatprep.subr.bf16.mxu0 %v6663_v33  ;;  %4738 = vmatprep.subr.bf16.mxu1 %v6666_v29 }
 0x210   :  { %v2357_v2 = vpack.c.bf16 %v5681_v55, %v5679_v25 }
 0x211   :  { %v2388_v15 = vmax.bf16 %v6791_v1, %v2356_v58 }
 0x212   :  { %v2321_v34 = vpop.f32.mrb[60].mxu1  ;;  %v2389_v14 = vmax.bf16 %v6791_v1, %v2357_v2  ;;  %4513 = vmatpush1.bf16.msra.mxu0 %v6661_v28  ;;  %4739 = vmatpush1.bf16.msra.mxu1 %v6664_v32  ;;  %v6691_v2 = vld [vmem:[%s9331_s5 + $0x200] ss:$16 sps:$4 sm:$0xff]  }
 0x213   :  { %v2323_v16 = vpop.f32.mrb[61].mxu1  ;;  %4514 = vmatprep.subr.bf16.mxu0 %v6669_v39  ;;  %4740 = vmatprep.subr.bf16.mxu1 %v6672_v62  ;;  %v5682_v18 = vadd.f32 %v2321_v34, %v8381_v51  ;;  %v6694_v34 = vld [vmem:[%s9331_s5 + $0x208] ss:$16 sps:$4 sm:$0xff]  }
 0x214   :  { %v2325_v36 = vpop.f32.mrb[62].mxu1  ;;  %3389 = vmatprep.mubr.bf16.mxu0 %v2389_v14  ;;  %3615 = vmatprep.mubr.bf16.mxu1 %v2389_v14  ;;  %v5683_v37 = vadd.f32 %v2323_v16, %v8386_v13  ;;  %v6699_v16 = vld [vmem:[%s9331_s5 + $0x224] ss:$16 sps:$4 sm:$0xff]  }
 0x215   :  { %v5684_v19 = vadd.f32 %v2325_v36, %v8381_v51  ;;  %v2327_v50 = vpop.f32.mrb[63].mxu1  ;;  %3390 = vmatmul.mubr.bf16.gmra.mrb[56].mxu0 %v2388_v15  ;;  %3616 = vmatmul.mubr.bf16.gmra.mrb[88].mxu1 %v2388_v15  ;;  %v6702_v15 = vld [vmem:[%s9331_s5 + $0x22c] ss:$16 sps:$4 sm:$0xff]  }
 0x216   :  { %v5685_v31 = vadd.f32 %v2327_v50, %v8386_v13  ;;  %4515 = vmatpush1.bf16.msra.mxu0 %v6667_v35  ;;  %4741 = vmatpush1.bf16.msra.mxu1 %v6670_v40 }
 0x217   :  { %v2360_v60 = vpack.c.bf16 %v5684_v19, %v5682_v18  ;;  %4516 = vmatprep.subr.bf16.mxu0 %v6675_v41  ;;  %4742 = vmatprep.subr.bf16.mxu1 %v6678_v17 }
 0x218   :  { %v2361_v51 = vpack.c.bf16 %v5685_v31, %v5683_v37 }
 0x219   :  { %v2392_v13 = vmax.bf16 %v6791_v1, %v2360_v60 }
 0x21a   :  { %v2393_v43 = vmax.bf16 %v6791_v1, %v2361_v51  ;;  %4517 = vmatpush1.bf16.msra.mxu0 %v6673_v59  ;;  %4743 = vmatpush1.bf16.msra.mxu1 %v6676_v38 }
 0x21b   :  { %4518 = vmatprep.subr.bf16.mxu0 %v6681_v61  ;;  %4744 = vmatprep.subr.bf16.mxu1 %v6684_v47 }
 0x21c   :  { %3399 = vmatprep.mubr.bf16.mxu0 %v2393_v43  ;;  %3625 = vmatprep.mubr.bf16.mxu1 %v2393_v43  ;;  %v6697_v43 = vld [vmem:[%s9331_s5 + $0x220] ss:$16 sps:$4 sm:$0xff]  }
 0x21d   :  { %3400 = vmatmul.mubr.bf16.gmra.mrb[60].mxu0 %v2392_v13  ;;  %3626 = vmatmul.mubr.bf16.gmra.mrb[92].mxu1 %v2392_v13  ;;  %v6700_v13 = vld [vmem:[%s9331_s5 + $0x228] ss:$16 sps:$4 sm:$0xff]  }
 0x21e   :  { %4519 = vmatpush1.bf16.msra.mxu0 %v6679_v49  ;;  %4745 = vmatpush1.bf16.msra.mxu1 %v6682_v63  ;;  %v6705_v49 = vld [vmem:[%s9331_s5 + $0x244] ss:$16 sps:$4 sm:$0xff]   ;;  %v6708_v63 = vld [vmem:[%s9331_s5 + $0x24c] ss:$16 sps:$4 sm:$0xff]  }
 0x21f   :  { %4520 = vmatprep.subr.bf16.mxu0 %v6687_v3  ;;  %4746 = vmatprep.subr.bf16.mxu1 %v6690_v4 }
 0x222   :  { %4521 = vmatpush1.bf16.msra.mxu0 %v6685_v44  ;;  %4747 = vmatpush1.bf16.msra.mxu1 %v6688_v56 }
 0x223   :  { %4603 = vmatprep.subr.bf16.mxu0 %v6693_v45  ;;  %4829 = vmatprep.subr.bf16.mxu1 %v6696_v57  ;;  %v6703_v57 = vld [vmem:[%s9331_s5 + $0x240] ss:$16 sps:$4 sm:$0xff]  }
 0x2b8   :  { %v3331_v20 = vpop.f32.mrb[32].mxu0  ;;  %v3557_v48 = vpop.f32.mrb[64].mxu1 }
 0x2b9   :  { %v3333_v21 = vpop.f32.mrb[33].mxu0  ;;  %v3559_v11 = vpop.f32.mrb[65].mxu1  ;;  %v5686_v53 = vadd.f32 %v3331_v20, %v8644_v6  ;;  %v8657_v23 = vadd.f32 %v3557_v48, %v8647_v46 }
 0x2ba   :  { %v3335_v12 = vpop.f32.mrb[34].mxu0  ;;  %v3561_v24 = vpop.f32.mrb[66].mxu1  ;;  %v5687_v26 = vadd.f32 %v3333_v21, %v8650_v10  ;;  %v8665_v0 = vadd.f32 %v3559_v11, %v8653_v9  ;;  %v6711_v11 = vld [vmem:[%s9331_s5 + $0x264] ss:$16 sps:$4 sm:$0xff]  }
 0x2bb   :  { %v5688_v27 = vadd.f32 %v3335_v12, %v8644_v6  ;;  %v8661_v30 = vadd.f32 %v3561_v24, %v8647_v46  ;;  %v3337_v33 = vpop.f32.mrb[35].mxu0  ;;  %v3563_v29 = vpop.f32.mrb[67].mxu1  ;;  %v6714_v12 = vld [vmem:[%s9331_s5 + $0x26c] ss:$16 sps:$4 sm:$0xff]  }
 0x2bc   :  { %v5689_v22 = vadd.f32 %v3337_v33, %v8650_v10  ;;  %v8669_v8 = vadd.f32 %v3563_v29, %v8653_v9 }
 0x2bd   :  { %v3636_v25 = vpack.c.bf16 %v5688_v27, %v5686_v53  ;;  %v3638_v55 = vpack.c.bf16 %v8661_v30, %v8657_v23 }
 0x2be   :  { %v3637_v28 = vpack.c.bf16 %v5689_v22, %v5687_v26  ;;  %v3639_v32 = vpack.c.bf16 %v8669_v8, %v8665_v0  ;;  %v6784_v0 = vld [vmem:[%s9331_s5 + $0x3e8] ss:$16 sps:$4 sm:$0xff]  }
 0x2bf   :  { %v3668_v14 = vmax.bf16 %v6791_v1, %v3636_v25  ;;  %v3670_v8 = vmax.bf16 %v6791_v1, %v3638_v55 }
 0x2c0   :  { %v3341_v58 = vpop.f32.mrb[36].mxu0  ;;  %v3567_v39 = vpop.f32.mrb[68].mxu1  ;;  %v3669_v62 = vmax.bf16 %v6791_v1, %v3637_v28 }
 0x2c1   :  { %v3343_v35 = vpop.f32.mrb[37].mxu0  ;;  %v3569_v40 = vpop.f32.mrb[69].mxu1  ;;  %v5690_v41 = vadd.f32 %v3341_v58, %v8644_v6  ;;  %v8691_v17 = vadd.f32 %v3567_v39, %v8647_v46 }
 0x2c2   :  { %v3345_v36 = vpop.f32.mrb[38].mxu0  ;;  %v3571_v18 = vpop.f32.mrb[70].mxu1  ;;  %4522 = vmatprep.mubr.bf16.mxu0 %v3669_v62  ;;  %4748 = vmatprep.mubr.bf16.mxu1 %v3669_v62  ;;  %v5691_v19 = vadd.f32 %v3343_v35, %v8650_v10  ;;  %v8699_v38 = vadd.f32 %v3569_v40, %v8653_v9  ;;  %v6717_v40 = vld [vmem:[%s9331_s5 + $0x284] ss:$16 sps:$4 sm:$0xff]  }
 0x2c3   :  { %v5692_v50 = vadd.f32 %v3345_v36, %v8644_v6  ;;  %v8696_v37 = vadd.f32 %v3571_v18, %v8647_v46  ;;  %v3347_v31 = vpop.f32.mrb[39].mxu0  ;;  %v3573_v59 = vpop.f32.mrb[71].mxu1  ;;  %4523 = vmatmul.mubr.bf16.vlgmr.msra.gmra.mrb[64].mxu0 %v3668_v14  ;;  %4749 = vmatmul.mubr.bf16.vlgmr.msra.gmra.mrb[96].mxu1 %v3668_v14 }
 0x2c4   :  { %v5693_v60 = vadd.f32 %v3347_v31, %v8650_v10  ;;  %v8703_v51 = vadd.f32 %v3573_v59, %v8653_v9  ;;  %4604 = vmatpush1.bf16.msra.mxu0 %v6691_v2  ;;  %4830 = vmatpush1.bf16.msra.mxu1 %v6694_v34  ;;  %v6709_v2 = vld [vmem:[%s9331_s5 + $0x260] ss:$16 sps:$4 sm:$0xff]   ;;  %v6712_v34 = vld [vmem:[%s9331_s5 + $0x268] ss:$16 sps:$4 sm:$0xff]  }
 0x2c5   :  { %v3640_v61 = vpack.c.bf16 %v5692_v50, %v5690_v41  ;;  %v3642_v47 = vpack.c.bf16 %v8696_v37, %v8691_v17  ;;  %4605 = vmatprep.subr.bf16.mxu0 %v6699_v16  ;;  %4831 = vmatprep.subr.bf16.mxu1 %v6702_v15  ;;  %v6720_v16 = vld [vmem:[%s9331_s5 + $0x28c] ss:$16 sps:$4 sm:$0xff]   ;;  %v6715_v50 = vld [vmem:[%s9331_s5 + $0x280] ss:$16 sps:$4 sm:$0xff]   ;;  %v6718_v31 = vld [vmem:[%s9331_s5 + $0x288] ss:$16 sps:$4 sm:$0xff]  }
 0x2c6   :  { %v3641_v3 = vpack.c.bf16 %v5693_v60, %v5691_v19  ;;  %v3643_v4 = vpack.c.bf16 %v8703_v51, %v8699_v38 }
 0x2c7   :  { %v3672_v21 = vmax.bf16 %v6791_v1, %v3640_v61  ;;  %v6726_v61 = vld [vmem:[%s9331_s5 + $0x2ac] ss:$16 sps:$4 sm:$0xff]  }
 0x2c8   :  { %v3351_v44 = vpop.f32.mrb[40].mxu0  ;;  %v3577_v56 = vpop.f32.mrb[72].mxu1  ;;  %4606 = vmatpush1.bf16.msra.mxu0 %v6697_v43  ;;  %4832 = vmatpush1.bf16.msra.mxu1 %v6700_v13  ;;  %v3673_v45 = vmax.bf16 %v6791_v1, %v3641_v3  ;;  %v6723_v13 = vld [vmem:[%s9331_s5 + $0x2a4] ss:$16 sps:$4 sm:$0xff]  }
 0x2c9   :  { %v3353_v20 = vpop.f32.mrb[41].mxu0  ;;  %v3579_v48 = vpop.f32.mrb[73].mxu1  ;;  %4607 = vmatprep.subr.bf16.mxu0 %v6705_v49  ;;  %4833 = vmatprep.subr.bf16.mxu1 %v6708_v63  ;;  %v5694_v24 = vadd.f32 %v3351_v44, %v8644_v6  ;;  %v8737_v53 = vadd.f32 %v3577_v56, %v8647_v46 }
 0x2ca   :  { %v3355_v27 = vpop.f32.mrb[42].mxu0  ;;  %v3581_v33 = vpop.f32.mrb[74].mxu1  ;;  %4532 = vmatprep.mubr.bf16.mxu0 %v3673_v45  ;;  %4758 = vmatprep.mubr.bf16.mxu1 %v3673_v45  ;;  %v5695_v29 = vadd.f32 %v3353_v20, %v8650_v10  ;;  %v8745_v58 = vadd.f32 %v3579_v48, %v8653_v9 }
 0x2cb   :  { %v5696_v26 = vadd.f32 %v3355_v27, %v8644_v6  ;;  %v8742_v22 = vadd.f32 %v3581_v33, %v8647_v46  ;;  %v3357_v25 = vpop.f32.mrb[43].mxu0  ;;  %v3583_v28 = vpop.f32.mrb[75].mxu1  ;;  %4533 = vmatmul.mubr.bf16.gmra.mrb[68].mxu0 %v3672_v21  ;;  %4759 = vmatmul.mubr.bf16.gmra.mrb[100].mxu1 %v3672_v21 }
 0x2cc   :  { %v5697_v39 = vadd.f32 %v3357_v25, %v8650_v10  ;;  %v8749_v62 = vadd.f32 %v3583_v28, %v8653_v9  ;;  %4608 = vmatpush1.bf16.msra.mxu0 %v6703_v57  ;;  %4834 = vmatpush1.bf16.msra.mxu1 %v6706_v5 }
 0x2cd   :  { %v3644_v14 = vpack.c.bf16 %v5696_v26, %v5694_v24  ;;  %v3646_v35 = vpack.c.bf16 %v8742_v22, %v8737_v53  ;;  %4609 = vmatprep.subr.bf16.mxu0 %v6711_v11  ;;  %4835 = vmatprep.subr.bf16.mxu1 %v6714_v12  ;;  %v6721_v12 = vld [vmem:[%s9331_s5 + $0x2a0] ss:$16 sps:$4 sm:$0xff]   ;;  %v6724_v24 = vld [vmem:[%s9331_s5 + $0x2a8] ss:$16 sps:$4 sm:$0xff]   ;;  %v6732_v26 = vld [vmem:[%s9331_s5 + $0x2cc] ss:$16 sps:$4 sm:$0xff]  }
 0x2ce   :  { %v3645_v15 = vpack.c.bf16 %v5697_v39, %v5695_v29  ;;  %v3647_v41 = vpack.c.bf16 %v8749_v62, %v8745_v58  ;;  %v6729_v29 = vld [vmem:[%s9331_s5 + $0x2c4] ss:$16 sps:$4 sm:$0xff]  }
 0x2cf   :  { %v3676_v43 = vmax.bf16 %v6791_v1, %v3644_v14  ;;  %v6727_v14 = vld [vmem:[%s9331_s5 + $0x2c0] ss:$16 sps:$4 sm:$0xff]   ;;  %v3678_v30 = vmax.bf16 %v6791_v1, %v3646_v35 }
 0x2d0   :  { %v3361_v36 = vpop.f32.mrb[44].mxu0  ;;  %v3587_v18 = vpop.f32.mrb[76].mxu1  ;;  %4610 = vmatpush1.bf16.msra.mxu0 %v6709_v2  ;;  %4836 = vmatpush1.bf16.msra.mxu1 %v6712_v34  ;;  %v3677_v19 = vmax.bf16 %v6791_v1, %v3645_v15  ;;  %v3679_v23 = vmax.bf16 %v6791_v1, %v3647_v41 }
 0x2d1   :  { %v3363_v59 = vpop.f32.mrb[45].mxu0  ;;  %v3589_v60 = vpop.f32.mrb[77].mxu1  ;;  %4611 = vmatprep.subr.bf16.mxu0 %v6717_v40  ;;  %4837 = vmatprep.subr.bf16.mxu1 %v6720_v16  ;;  %v5698_v49 = vadd.f32 %v3361_v36, %v8644_v6  ;;  %v8783_v63 = vadd.f32 %v3587_v18, %v8647_v46  ;;  %v6730_v40 = vld [vmem:[%s9331_s5 + $0x2c8] ss:$16 sps:$4 sm:$0xff]   ;;  %v6735_v18 = vld [vmem:[%s9331_s5 + $0x2e4] ss:$16 sps:$4 sm:$0xff]  }
 0x2d2   :  { %v3365_v3 = vpop.f32.mrb[46].mxu0  ;;  %v3591_v44 = vpop.f32.mrb[78].mxu1  ;;  %4542 = vmatprep.mubr.bf16.mxu0 %v3677_v19  ;;  %4768 = vmatprep.mubr.bf16.mxu1 %v3677_v19  ;;  %v5699_v56 = vadd.f32 %v3363_v59, %v8650_v10  ;;  %v8791_v48 = vadd.f32 %v3589_v60, %v8653_v9  ;;  %v6738_v19 = vld [vmem:[%s9331_s5 + $0x2ec] ss:$16 sps:$4 sm:$0xff]  }
 0x2d3   :  { %v5700_v45 = vadd.f32 %v3365_v3, %v8644_v6  ;;  %v8788_v57 = vadd.f32 %v3591_v44, %v8647_v46  ;;  %v3367_v5 = vpop.f32.mrb[47].mxu0  ;;  %v3593_v20 = vpop.f32.mrb[79].mxu1  ;;  %4543 = vmatmul.mubr.bf16.gmra.mrb[72].mxu0 %v3676_v43  ;;  %4769 = vmatmul.mubr.bf16.gmra.mrb[104].mxu1 %v3676_v43 }
 0x2d4   :  { %v5701_v21 = vadd.f32 %v3367_v5, %v8650_v10  ;;  %v8795_v11 = vadd.f32 %v3593_v20, %v8653_v9  ;;  %4612 = vmatpush1.bf16.msra.mxu0 %v6715_v50  ;;  %4838 = vmatpush1.bf16.msra.mxu1 %v6718_v31  ;;  %v6733_v5 = vld [vmem:[%s9331_s5 + $0x2e0] ss:$16 sps:$4 sm:$0xff]   ;;  %v6736_v20 = vld [vmem:[%s9331_s5 + $0x2e8] ss:$16 sps:$4 sm:$0xff]  }
 0x2d5   :  { %v3648_v27 = vpack.c.bf16 %v5700_v45, %v5698_v49  ;;  %4613 = vmatprep.subr.bf16.mxu0 %v6723_v13  ;;  %4839 = vmatprep.subr.bf16.mxu1 %v6726_v61  ;;  %v9337_v17 = vpack.c.bf16 %v8788_v57, %v8783_v63 }
 0x2d6   :  { %v3649_v25 = vpack.c.bf16 %v5701_v21, %v5699_v56  ;;  %v3651_v28 = vpack.c.bf16 %v8795_v11, %v8791_v48 }
 0x2d7   :  { %v3680_v36 = vmax.bf16 %v6791_v1, %v3648_v27  ;;  %v6744_v27 = vld [vmem:[%s9331_s5 + $0x30c] ss:$16 sps:$4 sm:$0xff]   ;;  %v3682_v37 = vmax.bf16 %v6791_v1, %v9337_v17 }
 0x2d8   :  { %v3371_v39 = vpop.f32.mrb[48].mxu0  ;;  %v3597_v2 = vpop.f32.mrb[80].mxu1  ;;  %4614 = vmatpush1.bf16.msra.mxu0 %v6721_v12  ;;  %4840 = vmatpush1.bf16.msra.mxu1 %v6724_v24  ;;  %v3681_v34 = vmax.bf16 %v6791_v1, %v3649_v25  ;;  %v6741_v24 = vld [vmem:[%s9331_s5 + $0x304] ss:$16 sps:$4 sm:$0xff]   ;;  %v3683_v55 = vmax.bf16 %v6791_v1, %v3651_v28 }
 0x2d9   :  { %v3373_v16 = vpop.f32.mrb[49].mxu0  ;;  %v3599_v15 = vpop.f32.mrb[81].mxu1  ;;  %4615 = vmatprep.subr.bf16.mxu0 %v6729_v29  ;;  %4841 = vmatprep.subr.bf16.mxu1 %v6732_v26  ;;  %v5702_v50 = vadd.f32 %v3371_v39, %v8644_v6  ;;  %v8829_v31 = vadd.f32 %v3597_v2, %v8647_v46  ;;  %v9084_v28 = vld [vmem:[%s9333_s7] sm:$0xff] }
 0x2da   :  { %v3375_v59 = vpop.f32.mrb[50].mxu0  ;;  %v3601_v60 = vpop.f32.mrb[82].mxu1  ;;  %4552 = vmatprep.mubr.bf16.mxu0 %v3681_v34  ;;  %4778 = vmatprep.mubr.bf16.mxu1 %v3681_v34  ;;  %v5703_v43 = vadd.f32 %v3373_v16, %v8650_v10  ;;  %v8837_v44 = vadd.f32 %v3599_v15, %v8653_v9  ;;  %v6739_v34 = vld [vmem:[%s9331_s5 + $0x300] ss:$16 sps:$4 sm:$0xff]  }
 0x2db   :  { %v5704_v13 = vadd.f32 %v3375_v59, %v8644_v6  ;;  %v8834_v61 = vadd.f32 %v3601_v60, %v8647_v46  ;;  %v3377_v49 = vpop.f32.mrb[51].mxu0  ;;  %v3603_v3 = vpop.f32.mrb[83].mxu1  ;;  %4553 = vmatmul.mubr.bf16.gmra.mrb[76].mxu0 %v3680_v36  ;;  %4779 = vmatmul.mubr.bf16.gmra.mrb[108].mxu1 %v3680_v36  ;;  %v6747_v36 = vld [vmem:[%s9331_s5 + $0x324] ss:$16 sps:$4 sm:$0xff]  }
 0x2dc   :  { %v5705_v56 = vadd.f32 %v3377_v49, %v8650_v10  ;;  %v8841_v45 = vadd.f32 %v3603_v3, %v8653_v9  ;;  %4616 = vmatpush1.bf16.msra.mxu0 %v6727_v14  ;;  %4842 = vmatpush1.bf16.msra.mxu1 %v6730_v40  ;;  %v6742_v14 = vld [vmem:[%s9331_s5 + $0x308] ss:$16 sps:$4 sm:$0xff]  }
 0x2dd   :  { %v3652_v21 = vpack.c.bf16 %v5704_v13, %v5702_v50  ;;  %4617 = vmatprep.subr.bf16.mxu0 %v6735_v18  ;;  %4843 = vmatprep.subr.bf16.mxu1 %v6738_v19  ;;  %v6750_v18 = vld [vmem:[%s9331_s5 + $0x32c] ss:$16 sps:$4 sm:$0xff]  }
 0x2de   :  { %v3653_v29 = vpack.c.bf16 %v5705_v56, %v5703_v43  ;;  %v9338_v38 = vpack.c.bf16 %v8841_v45, %v8837_v44 }
 0x2df   :  { %v3684_v15 = vmax.bf16 %v6791_v1, %v3652_v21 }
 0x2e0   :  { %v3381_v25 = vpop.f32.mrb[52].mxu0  ;;  %v3607_v39 = vpop.f32.mrb[84].mxu1  ;;  %4618 = vmatpush1.bf16.msra.mxu0 %v6733_v5  ;;  %4844 = vmatpush1.bf16.msra.mxu1 %v6736_v20  ;;  %v3685_v2 = vmax.bf16 %v6791_v1, %v3653_v29  ;;  %v3687_v51 = vmax.bf16 %v6791_v1, %v9338_v38 }
 0x2e1   :  { %v3383_v40 = vpop.f32.mrb[53].mxu0  ;;  %v3609_v16 = vpop.f32.mrb[85].mxu1  ;;  %4619 = vmatprep.subr.bf16.mxu0 %v6741_v24  ;;  %4845 = vmatprep.subr.bf16.mxu1 %v6744_v27  ;;  %v5706_v19 = vadd.f32 %v3381_v25, %v8644_v6  ;;  %v8875_v50 = vadd.f32 %v3607_v39, %v8647_v46  ;;  %v6745_v24 = vld [vmem:[%s9331_s5 + $0x320] ss:$16 sps:$4 sm:$0xff]   ;;  %v6748_v27 = vld [vmem:[%s9331_s5 + $0x328] ss:$16 sps:$4 sm:$0xff]  }
 0x2e2   :  { %v3385_v59 = vpop.f32.mrb[54].mxu0  ;;  %v3611_v60 = vpop.f32.mrb[86].mxu1  ;;  %4562 = vmatprep.mubr.bf16.mxu0 %v3685_v2  ;;  %4788 = vmatprep.mubr.bf16.mxu1 %v3685_v2  ;;  %v5707_v43 = vadd.f32 %v3383_v40, %v8650_v10  ;;  %v8883_v5 = vadd.f32 %v3609_v16, %v8653_v9  ;;  %v6753_v39 = vld [vmem:[%s9331_s5 + $0x344] ss:$16 sps:$4 sm:$0xff]   ;;  %v6756_v2 = vld [vmem:[%s9331_s5 + $0x34c] ss:$16 sps:$4 sm:$0xff]  }
 0x2e3   :  { %v5708_v13 = vadd.f32 %v3385_v59, %v8644_v6  ;;  %v8880_v49 = vadd.f32 %v3611_v60, %v8647_v46  ;;  %v3387_v3 = vpop.f32.mrb[55].mxu0  ;;  %v3613_v56 = vpop.f32.mrb[87].mxu1  ;;  %4563 = vmatmul.mubr.bf16.gmra.mrb[80].mxu0 %v3684_v15  ;;  %4789 = vmatmul.mubr.bf16.gmra.mrb[112].mxu1 %v3684_v15 }
 0x2e4   :  { %v5709_v20 = vadd.f32 %v3387_v3, %v8650_v10  ;;  %v8887_v21 = vadd.f32 %v3613_v56, %v8653_v9  ;;  %4620 = vmatpush1.bf16.msra.mxu0 %v6739_v34  ;;  %4846 = vmatpush1.bf16.msra.mxu1 %v6742_v14 }
 0x2e5   :  { %v3656_v29 = vpack.c.bf16 %v5708_v13, %v5706_v19  ;;  %4621 = vmatprep.subr.bf16.mxu0 %v6747_v36  ;;  %4847 = vmatprep.subr.bf16.mxu1 %v6750_v18  ;;  %v6751_v36 = vld [vmem:[%s9331_s5 + $0x340] ss:$16 sps:$4 sm:$0xff]   ;;  %v6754_v18 = vld [vmem:[%s9331_s5 + $0x348] ss:$16 sps:$4 sm:$0xff]   ;;  %v6762_v13 = vld [vmem:[%s9331_s5 + $0x36c] ss:$16 sps:$4 sm:$0xff]   ;;  %v9341_v58 = vpack.c.bf16 %v8880_v49, %v8875_v50 }
 0x2e6   :  { %v3657_v34 = vpack.c.bf16 %v5709_v20, %v5707_v43  ;;  %v6759_v43 = vld [vmem:[%s9331_s5 + $0x364] ss:$16 sps:$4 sm:$0xff]   ;;  %v9340_v53 = vpack.c.bf16 %v8887_v21, %v8883_v5 }
 0x2e7   :  { %v3688_v60 = vmax.bf16 %v6791_v1, %v3656_v29  ;;  %v3690_v62 = vmax.bf16 %v6791_v1, %v9341_v58 }
 0x2e8   :  { %v3391_v40 = vpop.f32.mrb[56].mxu0  ;;  %v3617_v16 = vpop.f32.mrb[88].mxu1  ;;  %4622 = vmatpush1.bf16.msra.mxu0 %v6745_v24  ;;  %4848 = vmatpush1.bf16.msra.mxu1 %v6748_v27  ;;  %v3689_v15 = vmax.bf16 %v6791_v1, %v3657_v34  ;;  %v3691_v22 = vmax.bf16 %v6791_v1, %v9340_v53 }
 0x2e9   :  { %v3393_v19 = vpop.f32.mrb[57].mxu0  ;;  %v3619_v59 = vpop.f32.mrb[89].mxu1  ;;  %4623 = vmatprep.subr.bf16.mxu0 %v6753_v39  ;;  %4849 = vmatprep.subr.bf16.mxu1 %v6756_v2  ;;  %v5710_v3 = vadd.f32 %v3391_v40, %v8644_v6  ;;  %v8921_v56 = vadd.f32 %v3617_v16, %v8647_v46 }
 0x2ea   :  { %v3395_v20 = vpop.f32.mrb[58].mxu0  ;;  %v3621_v24 = vpop.f32.mrb[90].mxu1  ;;  %4572 = vmatprep.mubr.bf16.mxu0 %v3689_v15  ;;  %4798 = vmatprep.mubr.bf16.mxu1 %v3689_v15  ;;  %v5711_v27 = vadd.f32 %v3393_v19, %v8650_v10  ;;  %v8929_v40 = vadd.f32 %v3619_v59, %v8653_v9  ;;  %v6757_v15 = vld [vmem:[%s9331_s5 + $0x360] ss:$16 sps:$4 sm:$0xff]   ;;  %v6760_v19 = vld [vmem:[%s9331_s5 + $0x368] ss:$16 sps:$4 sm:$0xff]  }
 0x2eb   :  { %v5712_v29 = vadd.f32 %v3395_v20, %v8644_v6  ;;  %v8926_v39 = vadd.f32 %v3621_v24, %v8647_v46  ;;  %v3397_v2 = vpop.f32.mrb[59].mxu0  ;;  %v3623_v34 = vpop.f32.mrb[91].mxu1  ;;  %4573 = vmatmul.mubr.bf16.gmra.mrb[84].mxu0 %v3688_v60  ;;  %4799 = vmatmul.mubr.bf16.gmra.mrb[116].mxu1 %v3688_v60  ;;  %v6765_v60 = vld [vmem:[%s9331_s5 + $0x384] ss:$16 sps:$4 sm:$0xff]  }
 0x2ec   :  { %v5713_v16 = vadd.f32 %v3397_v2, %v8650_v10  ;;  %v8933_v25 = vadd.f32 %v3623_v34, %v8653_v9  ;;  %4624 = vmatpush1.bf16.msra.mxu0 %v6751_v36  ;;  %4850 = vmatpush1.bf16.msra.mxu1 %v6754_v18  ;;  %v6768_v36 = vld [vmem:[%s9331_s5 + $0x38c] ss:$16 sps:$4 sm:$0xff]  }
 0x2ed   :  { %v3660_v20 = vpack.c.bf16 %v5712_v29, %v5710_v3  ;;  %4625 = vmatprep.subr.bf16.mxu0 %v6759_v43  ;;  %4851 = vmatprep.subr.bf16.mxu1 %v6762_v13  ;;  %v6763_v43 = vld [vmem:[%s9331_s5 + $0x380] ss:$16 sps:$4 sm:$0xff]   ;;  %v6766_v13 = vld [vmem:[%s9331_s5 + $0x388] ss:$16 sps:$4 sm:$0xff]   ;;  %v9343_v63 = vpack.c.bf16 %v8926_v39, %v8921_v56 }
 0x2ee   :  { %v3661_v18 = vpack.c.bf16 %v5713_v16, %v5711_v27  ;;  %v6771_v16 = vld [vmem:[%s9331_s5 + $0x3a4] ss:$16 sps:$4 sm:$0xff]   ;;  %v9342_v35 = vpack.c.bf16 %v8933_v25, %v8929_v40 }
 0x2ef   :  { %v3692_v27 = vmax.bf16 %v6791_v1, %v3660_v20  ;;  %v3694_v57 = vmax.bf16 %v6791_v1, %v9343_v63 }
 0x2f0   :  { %v3401_v2 = vpop.f32.mrb[60].mxu0  ;;  %v3627_v34 = vpop.f32.mrb[92].mxu1  ;;  %4626 = vmatpush1.bf16.msra.mxu0 %v6757_v15  ;;  %4852 = vmatpush1.bf16.msra.mxu1 %v6760_v19  ;;  %v3693_v3 = vmax.bf16 %v6791_v1, %v3661_v18  ;;  %v6774_v15 = vld [vmem:[%s9331_s5 + $0x3ac] ss:$16 sps:$4 sm:$0xff]   ;;  %v3695_v41 = vmax.bf16 %v6791_v1, %v9342_v35 }
 0x2f1   :  { %v3403_v29 = vpop.f32.mrb[61].mxu0  ;;  %v3629_v59 = vpop.f32.mrb[93].mxu1  ;;  %4627 = vmatprep.subr.bf16.mxu0 %v6765_v60  ;;  %4853 = vmatprep.subr.bf16.mxu1 %v6768_v36  ;;  %v5714_v19 = vadd.f32 %v3401_v2, %v8644_v6  ;;  %v8967_v18 = vadd.f32 %v3627_v34, %v8647_v46 }
 0x2f2   :  { %v3405_v24 = vpop.f32.mrb[62].mxu0  ;;  %v3631_v14 = vpop.f32.mrb[94].mxu1  ;;  %4582 = vmatprep.mubr.bf16.mxu0 %v3693_v3  ;;  %4808 = vmatprep.mubr.bf16.mxu1 %v3693_v3  ;;  %v5715_v20 = vadd.f32 %v3403_v29, %v8650_v10  ;;  %v8975_v2 = vadd.f32 %v3629_v59, %v8653_v9  ;;  %v6775_v3 = vld [vmem:[%s9331_s5 + $0x3c0] ss:$16 sps:$4 sm:$0xff]   ;;  %v3671_v29 = vmax.bf16 %v6791_v1, %v3639_v32 }
 0x2f3   :  { %v5716_v60 = vadd.f32 %v3405_v24, %v8644_v6  ;;  %v8972_v36 = vadd.f32 %v3631_v14, %v8647_v46  ;;  %v3407_v12 = vpop.f32.mrb[63].mxu0  ;;  %v3633_v26 = vpop.f32.mrb[95].mxu1  ;;  %4583 = vmatmul.mubr.bf16.gmra.mrb[88].mxu0 %v3692_v27  ;;  %4809 = vmatmul.mubr.bf16.gmra.mrb[120].mxu1 %v3692_v27  ;;  %v6769_v6 = vld [vmem:[%s9331_s5 + $0x3a0] ss:$16 sps:$4 sm:$0xff]   ;;  %v6772_v46 = vld [vmem:[%s9331_s5 + $0x3a8] ss:$16 sps:$4 sm:$0xff]   ;;  %v3675_v32 = vmax.bf16 %v6791_v1, %v3643_v4 }
 0x2f4   :  { %v5717_v34 = vadd.f32 %v3407_v12, %v8650_v10  ;;  %v8979_v33 = vadd.f32 %v3633_v26, %v8653_v9  ;;  %4628 = vmatpush1.bf16.msra.mxu0 %v6763_v43  ;;  %4854 = vmatpush1.bf16.msra.mxu1 %v6766_v13  ;;  %v6777_v10 = vld [vmem:[%s9331_s5 + $0x3c4] ss:$16 sps:$4 sm:$0xff]   ;;  %v6780_v9 = vld [vmem:[%s9331_s5 + $0x3cc] ss:$16 sps:$4 sm:$0xff]   ;;  %v6778_v13 = vld [vmem:[%s9331_s5 + $0x3c8] ss:$16 sps:$4 sm:$0xff]  }
 0x2f5   :  { %v3664_v14 = vpack.c.bf16 %v5716_v60, %v5714_v19  ;;  %v3666_v59 = vpack.c.bf16 %v8972_v36, %v8967_v18  ;;  %4629 = vmatprep.subr.bf16.mxu0 %v6771_v16  ;;  %4855 = vmatprep.subr.bf16.mxu1 %v6774_v15  ;;  %v6783_v27 = vld [vmem:[%s9331_s5 + $0x3e4] ss:$16 sps:$4 sm:$0xff]   ;;  %v6786_v16 = vld [vmem:[%s9331_s5 + $0x3ec] ss:$16 sps:$4 sm:$0xff]   ;;  %v6781_v15 = vld [vmem:[%s9331_s5 + $0x3e0] ss:$16 sps:$4 sm:$0xff]   ;;  %v3674_v19 = vmax.bf16 %v6791_v1, %v3642_v47 }
 0x2f6   :  { %v3665_v12 = vpack.c.bf16 %v5717_v34, %v5715_v20  ;;  %v3667_v26 = vpack.c.bf16 %v8979_v33, %v8975_v2  ;;  %v9339_v47 = vpack.c.bf16 %v8834_v61, %v8829_v31  ;;  %v5587_v33 = vcombine.high %v9084_v28, %v9084_v28  ;;  %v3828_v31 = vld [vmem:[%s9334_s6] sm:$0xf] }
 0x2f7   :  { %v3696_v43 = vmax.bf16 %v6791_v1, %v3664_v14  ;;  %v3698_v11 = vmax.bf16 %v6791_v1, %v3666_v59  ;;  %v9092_v61 = vrot.slane %v3828_v31, %v8096_v52  ;;  %v9095_v45 = vrot.slane %v3828_v31, %v8361_v42 }
 0x2f8   :  { %4630 = vmatpush1.bf16.msra.mxu0 %v6769_v6  ;;  %4856 = vmatpush1.bf16.msra.mxu1 %v6772_v46  ;;  %v3697_v24 = vmax.bf16 %v6791_v1, %v3665_v12  ;;  %v3686_v4 = vmax.bf16 %v6791_v1, %v9339_v47  ;;  %v3699_v48 = vmax.bf16 %v6791_v1, %v3667_v26 }
 0x2f9   :  { %4631 = vmatprep.subr.bf16.mxu0 %v6777_v10  ;;  %4857 = vmatprep.subr.bf16.mxu1 %v6780_v9  ;;  %v9098_v50 = vrot.slane %v3828_v31, %v8104_v54  ;;  %v9101_v21 = vrot.slane %v3828_v31, %v8364_v7 }
 0x2fa   :  { %4592 = vmatprep.mubr.bf16.mxu0 %v3697_v24  ;;  %4818 = vmatprep.mubr.bf16.mxu1 %v3697_v24 }
 0x2fb   :  { %4593 = vmatmul.mubr.bf16.gmra.mrb[92].mxu0 %v3696_v43  ;;  %4819 = vmatmul.mubr.bf16.gmra.mrb[124].mxu1 %v3696_v43 }
 0x2fc   :  { %4632 = vmatpush1.bf16.msra.mxu0 %v6775_v3  ;;  %4635 = vmatprep.mubr.bf16.mxu0 %v3671_v29 }
 0x2fd   :  { %4858 = vmatpush1.bf16.msra.mxu1 %v6778_v13  ;;  %4861 = vmatprep.mubr.bf16.mxu1 %v3671_v29 }
 0x2fe   :  { %4633 = vmatprep.subr.bf16.mxu0 %v6783_v27  ;;  %4859 = vmatprep.subr.bf16.mxu1 %v6786_v16  ;;  %v14_v16 = vstv %s9335_s8 }
 0x2ff   :  { %15 = vst [vmem:[#allocation2] sm:$0x1] %v14_v16 }
 0x300   :  { %4634 = vmatpush1.bf16.msra.mxu0 %v6781_v15 }
 0x301   :  { %4860 = vmatpush1.bf16.msra.mxu1 %v6784_v0 }
 0x303   :  { %4636 = vmatmul.mubr.bf16.vlgmr.msra.gmra.mrb[64].mxu0 %v3670_v8 }
 0x304   :  { %4862 = vmatmul.mubr.bf16.vlgmr.msra.gmra.mrb[96].mxu1 %v3670_v8  ;;  %4645 = vmatprep.mubr.bf16.mxu0 %v3675_v32 }
 0x305   :  { %4871 = vmatprep.mubr.bf16.mxu1 %v3675_v32 }
 0x30b   :  { %4646 = vmatmul.mubr.bf16.gmra.mrb[68].mxu0 %v3674_v19 }
 0x30c   :  { %4872 = vmatmul.mubr.bf16.gmra.mrb[100].mxu1 %v3674_v19  ;;  %4655 = vmatprep.mubr.bf16.mxu0 %v3679_v23 }
 0x30d   :  { %4881 = vmatprep.mubr.bf16.mxu1 %v3679_v23 }
 0x313   :  { %4656 = vmatmul.mubr.bf16.gmra.mrb[72].mxu0 %v3678_v30 }
 0x314   :  { %4882 = vmatmul.mubr.bf16.gmra.mrb[104].mxu1 %v3678_v30  ;;  %4665 = vmatprep.mubr.bf16.mxu0 %v3683_v55 }
 0x315   :  { %4891 = vmatprep.mubr.bf16.mxu1 %v3683_v55 }
 0x31b   :  { %4666 = vmatmul.mubr.bf16.gmra.mrb[76].mxu0 %v3682_v37 }
 0x31c   :  { %4892 = vmatmul.mubr.bf16.gmra.mrb[108].mxu1 %v3682_v37  ;;  %4675 = vmatprep.mubr.bf16.mxu0 %v3687_v51 }
 0x31d   :  { %4901 = vmatprep.mubr.bf16.mxu1 %v3687_v51 }
 0x323   :  { %4676 = vmatmul.mubr.bf16.gmra.mrb[80].mxu0 %v3686_v4 }
 0x324   :  { %4902 = vmatmul.mubr.bf16.gmra.mrb[112].mxu1 %v3686_v4  ;;  %4685 = vmatprep.mubr.bf16.mxu0 %v3691_v22 }
 0x325   :  { %4911 = vmatprep.mubr.bf16.mxu1 %v3691_v22 }
 0x32b   :  { %4686 = vmatmul.mubr.bf16.gmra.mrb[84].mxu0 %v3690_v62 }
 0x32c   :  { %4912 = vmatmul.mubr.bf16.gmra.mrb[116].mxu1 %v3690_v62  ;;  %4695 = vmatprep.mubr.bf16.mxu0 %v3695_v41 }
 0x32d   :  { %4921 = vmatprep.mubr.bf16.mxu1 %v3695_v41 }
 0x333   :  { %4696 = vmatmul.mubr.bf16.gmra.mrb[88].mxu0 %v3694_v57 }
 0x334   :  { %4922 = vmatmul.mubr.bf16.gmra.mrb[120].mxu1 %v3694_v57  ;;  %4705 = vmatprep.mubr.bf16.mxu0 %v3699_v48 }
 0x335   :  { %4931 = vmatprep.mubr.bf16.mxu1 %v3699_v48  ;;  %v5585_v48 = vld [vmem:[#allocation2] ss:$0 sm:$0xff] }
 0x336   :  { %5015 = vperm.xlu0 %6108, %v5585_v48  }
 0x33b   :  { %4706 = vmatmul.mubr.bf16.gmra.mrb[92].mxu0 %v3698_v11 }
 0x33c   :  { %4932 = vmatmul.mubr.bf16.gmra.mrb[124].mxu1 %v3698_v11  ;;  %5064 = vmatprep.mubr.bf16.mxu0 %v5587_v33 }
 0x3d6   :  { %v4637_v44 = vpop.f32.mrb[64].mxu0 }
 0x3d7   :  { %v4863_v49 = vpop.f32.mrb[96].mxu1  ;;  %v4639_v5 = vpop.f32.mrb[65].mxu0  ;;  %v5750_v39 = vadd.f32 %v4637_v44, %v9092_v61 }
 0x3d8   :  { %v4865_v25 = vpop.f32.mrb[97].mxu1  ;;  %v4641_v56 = vpop.f32.mrb[66].mxu0  ;;  %v9106_v20 = vadd.f32 %v4863_v49, %v9095_v45  ;;  %v5751_v42 = vadd.f32 %v4639_v5, %v9098_v50 }
 0x3d9   :  { %v5752_v40 = vadd.f32 %v4641_v56, %v9092_v61  ;;  %v4867_v52 = vpop.f32.mrb[98].mxu1  ;;  %v4643_v18 = vpop.f32.mrb[67].mxu0  ;;  %v9114_v36 = vadd.f32 %v4865_v25, %v9101_v21 }
 0x3da   :  { %v9110_v54 = vadd.f32 %v4867_v52, %v9095_v45  ;;  %v5753_v60 = vadd.f32 %v4643_v18, %v9098_v50  ;;  %v4869_v7 = vpop.f32.mrb[99].mxu1 }
 0x3db   :  { %v4942_v2 = vpack.c.bf16 %v5752_v40, %v5750_v39  ;;  %v9117_v34 = vadd.f32 %v4869_v7, %v9101_v21 }
 0x3dc   :  { %v4944_v6 = vpack.c.bf16 %v9110_v54, %v9106_v20  ;;  %v4943_v46 = vpack.c.bf16 %v5753_v60, %v5751_v42 }
 0x3dd   :  { %v4945_v14 = vpack.c.bf16 %v9117_v34, %v9114_v36  ;;  %v4974_v9 = vmax.bf16 %v6791_v1, %v4942_v2 }
 0x3de   :  { %v4647_v59 = vpop.f32.mrb[68].mxu0  ;;  %v4975_v10 = vmax.bf16 %v6791_v1, %v4943_v46 }
 0x3df   :  { %v4873_v12 = vpop.f32.mrb[100].mxu1  ;;  %v4649_v26 = vpop.f32.mrb[69].mxu0  ;;  %v5754_v43 = vadd.f32 %v4647_v59, %v9092_v61 }
 0x3e0   :  { %v4875_v24 = vpop.f32.mrb[101].mxu1  ;;  %v4651_v3 = vpop.f32.mrb[70].mxu0  ;;  %5032 = vmatprep.subr.bf16.mxu0 %v4975_v10  ;;  %v9131_v15 = vadd.f32 %v4873_v12, %v9095_v45  ;;  %v5755_v0 = vadd.f32 %v4649_v26, %v9098_v50 }
 0x3e1   :  { %v5756_v13 = vadd.f32 %v4651_v3, %v9092_v61  ;;  %v4877_v29 = vpop.f32.mrb[102].mxu1  ;;  %v4653_v27 = vpop.f32.mrb[71].mxu0  ;;  %5033 = vmatpush1.bf16.xpose.msra.mxu0 %v4974_v9  ;;  %v9139_v23 = vadd.f32 %v4875_v24, %v9101_v21 }
 0x3e2   :  { %v9135_v8 = vadd.f32 %v4877_v29, %v9095_v45  ;;  %v5757_v32 = vadd.f32 %v4653_v27, %v9098_v50  ;;  %v4879_v19 = vpop.f32.mrb[103].mxu1 }
 0x3e3   :  { %v4946_v30 = vpack.c.bf16 %v5756_v13, %v5754_v43  ;;  %v9142_v55 = vadd.f32 %v4879_v19, %v9101_v21 }
 0x3e4   :  { %v4948_v17 = vpack.c.bf16 %v9135_v8, %v9131_v15  ;;  %v4947_v37 = vpack.c.bf16 %v5757_v32, %v5755_v0 }
 0x3e5   :  { %v4949_v38 = vpack.c.bf16 %v9142_v55, %v9139_v23  ;;  %v4978_v4 = vmax.bf16 %v6791_v1, %v4946_v30 }
 0x3e6   :  { %v4657_v51 = vpop.f32.mrb[72].mxu0  ;;  %v4979_v47 = vmax.bf16 %v6791_v1, %v4947_v37 }
 0x3e7   :  { %v4883_v53 = vpop.f32.mrb[104].mxu1  ;;  %v4659_v22 = vpop.f32.mrb[73].mxu0  ;;  %v5758_v35 = vadd.f32 %v4657_v51, %v9092_v61  ;;  %v4981_v36 = vmax.bf16 %v6791_v1, %v4949_v38 }
 0x3e8   :  { %v4885_v58 = vpop.f32.mrb[105].mxu1  ;;  %v4661_v62 = vpop.f32.mrb[74].mxu0  ;;  %5034 = vmatprep.subr.bf16.mxu0 %v4979_v47  ;;  %v9153_v11 = vadd.f32 %v4883_v53, %v9095_v45  ;;  %v5759_v33 = vadd.f32 %v4659_v22, %v9098_v50 }
 0x3e9   :  { %v5760_v41 = vadd.f32 %v4661_v62, %v9092_v61  ;;  %v4887_v63 = vpop.f32.mrb[106].mxu1  ;;  %v4663_v57 = vpop.f32.mrb[75].mxu0  ;;  %5035 = vmatpush1.bf16.xpose.msra.mxu0 %v4978_v4  ;;  %v9161_v5 = vadd.f32 %v4885_v58, %v9101_v21 }
 0x3ea   :  { %v9157_v31 = vadd.f32 %v4887_v63, %v9095_v45  ;;  %v5761_v44 = vadd.f32 %v4663_v57, %v9098_v50  ;;  %v4889_v49 = vpop.f32.mrb[107].mxu1 }
 0x3eb   :  { %v4950_v25 = vpack.c.bf16 %v5760_v41, %v5758_v35  ;;  %v9164_v56 = vadd.f32 %v4889_v49, %v9101_v21 }
 0x3ec   :  { %v4952_v39 = vpack.c.bf16 %v9157_v31, %v9153_v11  ;;  %v4951_v40 = vpack.c.bf16 %v5761_v44, %v5759_v33 }
 0x3ed   :  { %v4953_v52 = vpack.c.bf16 %v9164_v56, %v9161_v5  ;;  %v4982_v60 = vmax.bf16 %v6791_v1, %v4950_v25  ;;  %v5016_v5 = vpop.permute.xlu0 %5015 }
 0x3ee   :  { %v4667_v18 = vpop.f32.mrb[76].mxu0  ;;  %v4983_v42 = vmax.bf16 %v6791_v1, %v4951_v40  ;;  %v4984_v54 = vmax.bf16 %v6791_v1, %v4952_v39 }
 0x3ef   :  { %v4893_v7 = vpop.f32.mrb[108].mxu1  ;;  %v4669_v2 = vpop.f32.mrb[77].mxu0  ;;  %v5762_v10 = vadd.f32 %v4667_v18, %v9092_v61  ;;  %v4985_v20 = vmax.bf16 %v6791_v1, %v4953_v52 }
 0x3f0   :  { %v4895_v46 = vpop.f32.mrb[109].mxu1  ;;  %v4671_v59 = vpop.f32.mrb[78].mxu0  ;;  %5036 = vmatprep.subr.bf16.mxu0 %v4983_v42  ;;  %v9175_v24 = vadd.f32 %v4893_v7, %v9095_v45  ;;  %v5763_v3 = vadd.f32 %v4669_v2, %v9098_v50 }
 0x3f1   :  { %v5764_v9 = vadd.f32 %v4671_v59, %v9092_v61  ;;  %v4897_v12 = vpop.f32.mrb[110].mxu1  ;;  %v4673_v26 = vpop.f32.mrb[79].mxu0  ;;  %5037 = vmatpush1.bf16.xpose.msra.mxu0 %v4982_v60  ;;  %v9183_v27 = vadd.f32 %v4895_v46, %v9101_v21 }
 0x3f2   :  { %v9179_v43 = vadd.f32 %v4897_v12, %v9095_v45  ;;  %v5765_v13 = vadd.f32 %v4673_v26, %v9098_v50  ;;  %v4899_v29 = vpop.f32.mrb[111].mxu1 }
 0x3f3   :  { %v4954_v16 = vpack.c.bf16 %v5764_v9, %v5762_v10  ;;  %v9186_v0 = vadd.f32 %v4899_v29, %v9101_v21 }
 0x3f4   :  { %v4956_v32 = vpack.c.bf16 %v9179_v43, %v9175_v24  ;;  %v4955_v19 = vpack.c.bf16 %v5765_v13, %v5763_v3 }
 0x3f5   :  { %v4957_v30 = vpack.c.bf16 %v9186_v0, %v9183_v27  ;;  %v4986_v47 = vmax.bf16 %v6791_v1, %v4954_v16 }
 0x3f6   :  { %v4677_v37 = vpop.f32.mrb[80].mxu0  ;;  %v4987_v51 = vmax.bf16 %v6791_v1, %v4955_v19 }
 0x3f7   :  { %v4903_v4 = vpop.f32.mrb[112].mxu1  ;;  %v4679_v53 = vpop.f32.mrb[81].mxu0  ;;  %v5766_v62 = vadd.f32 %v4677_v37, %v9092_v61  ;;  %v4989_v34 = vmax.bf16 %v6791_v1, %v4957_v30 }
 0x3f8   :  { %v4905_v22 = vpop.f32.mrb[113].mxu1  ;;  %v4681_v58 = vpop.f32.mrb[82].mxu0  ;;  %5038 = vmatprep.subr.bf16.mxu0 %v4987_v51  ;;  %v9197_v57 = vadd.f32 %v4903_v4, %v9095_v45  ;;  %v5767_v48 = vadd.f32 %v4679_v53, %v9098_v50 }
 0x3f9   :  { %v5768_v35 = vadd.f32 %v4681_v58, %v9092_v61  ;;  %v4907_v41 = vpop.f32.mrb[114].mxu1  ;;  %v4683_v63 = vpop.f32.mrb[83].mxu0  ;;  %5039 = vmatpush1.bf16.xpose.msra.mxu0 %v4986_v47  ;;  %v9205_v25 = vadd.f32 %v4905_v22, %v9101_v21 }
 0x3fa   :  { %v9201_v33 = vadd.f32 %v4907_v41, %v9095_v45  ;;  %v5769_v44 = vadd.f32 %v4683_v63, %v9098_v50  ;;  %v4909_v49 = vpop.f32.mrb[115].mxu1 }
 0x3fb   :  { %v4958_v40 = vpack.c.bf16 %v5768_v35, %v5766_v62  ;;  %v9208_v18 = vadd.f32 %v4909_v49, %v9101_v21 }
 0x3fc   :  { %v4960_v42 = vpack.c.bf16 %v9201_v33, %v9197_v57  ;;  %v4959_v60 = vpack.c.bf16 %v5769_v44, %v5767_v48 }
 0x3fd   :  { %v4961_v7 = vpack.c.bf16 %v9208_v18, %v9205_v25  ;;  %v4990_v59 = vmax.bf16 %v6791_v1, %v4958_v40 }
 0x3fe   :  { %v4687_v2 = vpop.f32.mrb[84].mxu0  ;;  %v4991_v46 = vmax.bf16 %v6791_v1, %v4959_v60  ;;  %v4992_v15 = vmax.bf16 %v6791_v1, %v4960_v42 }
 0x3ff   :  { %v4913_v10 = vpop.f32.mrb[116].mxu1  ;;  %v4689_v9 = vpop.f32.mrb[85].mxu0  ;;  %v5770_v3 = vadd.f32 %v4687_v2, %v9092_v61 }
 0x400   :  { %v4915_v12 = vpop.f32.mrb[117].mxu1  ;;  %v4691_v26 = vpop.f32.mrb[86].mxu0  ;;  %5040 = vmatprep.subr.bf16.mxu0 %v4991_v46  ;;  %v9219_v19 = vadd.f32 %v4913_v10, %v9095_v45  ;;  %v5771_v37 = vadd.f32 %v4689_v9, %v9098_v50 }
 0x401   :  { %v5772_v13 = vadd.f32 %v4691_v26, %v9092_v61  ;;  %v4917_v29 = vpop.f32.mrb[118].mxu1  ;;  %v4693_v16 = vpop.f32.mrb[87].mxu0  ;;  %5041 = vmatpush1.bf16.xpose.msra.mxu0 %v4990_v59  ;;  %v9227_v53 = vadd.f32 %v4915_v12, %v9101_v21 }
 0x402   :  { %v9223_v51 = vadd.f32 %v4917_v29, %v9095_v45  ;;  %v5773_v47 = vadd.f32 %v4693_v16, %v9098_v50  ;;  %v4919_v4 = vpop.f32.mrb[119].mxu1 }
 0x403   :  { %v4962_v22 = vpack.c.bf16 %v5772_v13, %v5770_v3  ;;  %v9230_v58 = vadd.f32 %v4919_v4, %v9101_v21 }
 0x404   :  { %v4964_v62 = vpack.c.bf16 %v9223_v51, %v9219_v19  ;;  %v4963_v35 = vpack.c.bf16 %v5773_v47, %v5771_v37 }
 0x405   :  { %v4965_v41 = vpack.c.bf16 %v9230_v58, %v9227_v53  ;;  %v4994_v44 = vmax.bf16 %v6791_v1, %v4962_v22 }
 0x406   :  { %v4697_v63 = vpop.f32.mrb[88].mxu0  ;;  %v4995_v48 = vmax.bf16 %v6791_v1, %v4963_v35  ;;  %v4996_v23 = vmax.bf16 %v6791_v1, %v4964_v62 }
 0x407   :  { %v4923_v49 = vpop.f32.mrb[120].mxu1  ;;  %v4699_v40 = vpop.f32.mrb[89].mxu0  ;;  %v5774_v46 = vadd.f32 %v4697_v63, %v9092_v61  ;;  %v4997_v8 = vmax.bf16 %v6791_v1, %v4965_v41 }
 0x408   :  { %v4925_v60 = vpop.f32.mrb[121].mxu1  ;;  %v4701_v2 = vpop.f32.mrb[90].mxu0  ;;  %5042 = vmatprep.subr.bf16.mxu0 %v4995_v48  ;;  %v9241_v12 = vadd.f32 %v4923_v49, %v9095_v45  ;;  %v5775_v26 = vadd.f32 %v4699_v40, %v9098_v50 }
 0x409   :  { %v5776_v59 = vadd.f32 %v4701_v2, %v9092_v61  ;;  %v4927_v10 = vpop.f32.mrb[122].mxu1  ;;  %v4703_v9 = vpop.f32.mrb[91].mxu0  ;;  %5043 = vmatpush1.bf16.xpose.msra.mxu0 %v4994_v44  ;;  %v9249_v16 = vadd.f32 %v4925_v60, %v9101_v21 }
 0x40a   :  { %v9245_v3 = vadd.f32 %v4927_v10, %v9095_v45  ;;  %v5777_v13 = vadd.f32 %v4703_v9, %v9098_v50  ;;  %v4929_v29 = vpop.f32.mrb[123].mxu1 }
 0x40b   :  { %v4966_v37 = vpack.c.bf16 %v5776_v59, %v5774_v46  ;;  %v5809_v47 = vadd.f32 %v4929_v29, %v9101_v21 }
 0x40c   :  { %v4968_v4 = vpack.c.bf16 %v9245_v3, %v9241_v12  ;;  %v4967_v22 = vpack.c.bf16 %v5777_v13, %v5775_v26 }
 0x40d   :  { %v4969_v35 = vpack.c.bf16 %v5809_v47, %v9249_v16  ;;  %v4998_v44 = vmax.bf16 %v6791_v1, %v4966_v37 }
 0x40e   :  { %v4707_v63 = vpop.f32.mrb[92].mxu0  ;;  %v4999_v48 = vmax.bf16 %v6791_v1, %v4967_v22 }
 0x40f   :  { %v4933_v49 = vpop.f32.mrb[124].mxu1  ;;  %v4709_v40 = vpop.f32.mrb[93].mxu0  ;;  %v5778_v60 = vadd.f32 %v4707_v63, %v9092_v61  ;;  %v5001_v55 = vmax.bf16 %v6791_v1, %v4969_v35 }
 0x410   :  { %v4935_v2 = vpop.f32.mrb[125].mxu1  ;;  %v4711_v10 = vpop.f32.mrb[94].mxu0  ;;  %5044 = vmatprep.subr.bf16.mxu0 %v4999_v48  ;;  %v5810_v12 = vadd.f32 %v4933_v49, %v9095_v45  ;;  %v5779_v26 = vadd.f32 %v4709_v40, %v9098_v50  ;;  %v4976_v40 = vmax.bf16 %v6791_v1, %v4944_v6  ;;  %v4988_v6 = vmax.bf16 %v6791_v1, %v4956_v32 }
 0x411   :  { %v5780_v46 = vadd.f32 %v4711_v10, %v9092_v61  ;;  %v4937_v59 = vpop.f32.mrb[126].mxu1  ;;  %v4713_v9 = vpop.f32.mrb[95].mxu0  ;;  %5045 = vmatpush1.bf16.xpose.msra.mxu0 %v4998_v44  ;;  %v5811_v16 = vadd.f32 %v4935_v2, %v9101_v21 }
 0x412   :  { %v5812_v3 = vadd.f32 %v4937_v59, %v9095_v45  ;;  %v5781_v13 = vadd.f32 %v4713_v9, %v9098_v50  ;;  %v4939_v29 = vpop.f32.mrb[127].mxu1  ;;  %v4977_v45 = vmax.bf16 %v6791_v1, %v4945_v14  ;;  %v5007_v50 = vld [vmem:[%s9333_s7 + $0x8] sm:$0xff]  ;;  %v4993_v14 = vmax.bf16 %v6791_v1, %v4961_v7 }
 0x413   :  { %v4970_v37 = vpack.c.bf16 %v5780_v46, %v5778_v60  ;;  %v5813_v47 = vadd.f32 %v4939_v29, %v9101_v21  ;;  %v5586_v21 = vcombine.low %v9084_v28, %v9084_v28  ;;  %v5589_v49 = vcombine.high %v5007_v50, %v5007_v50 }
 0x414   :  { %v4972_v22 = vpack.c.bf16 %v5812_v3, %v5810_v12  ;;  %v4971_v63 = vpack.c.bf16 %v5781_v13, %v5779_v26  ;;  %v4980_v28 = vmax.bf16 %v6791_v1, %v4948_v17  ;;  %v5000_v17 = vmax.bf16 %v6791_v1, %v4968_v4 }
 0x415   :  { %v4973_v61 = vpack.c.bf16 %v5813_v47, %v5811_v16  ;;  %v5002_v44 = vmax.bf16 %v6791_v1, %v4970_v37  ;;  %v5588_v31 = vcombine.low %v5007_v50, %v5007_v50 }
 0x416   :  { %v5003_v48 = vmax.bf16 %v6791_v1, %v4971_v63  ;;  %v5004_v11 = vmax.bf16 %v6791_v1, %v4972_v22 }
 0x417   :  { %v5005_v38 = vmax.bf16 %v6791_v1, %v4973_v61 }
 0x418   :  { %5046 = vmatprep.subr.bf16.mxu0 %v5003_v48 }
 0x419   :  { %5047 = vmatpush1.bf16.xpose.msra.mxu0 %v5002_v44 }
 0x41a   :  { %5072 = vmatprep.subr.bf16.mxu0 %v4977_v45 }
 0x420   :  { %5065 = vmatmul.mubr.bf16.vlgmr.msra.gmra.mrb[96].mxu0 %v5586_v21 }
 0x421   :  { %5073 = vmatpush1.bf16.xpose.msra.mxu0 %v4976_v40  ;;  %5104 = vmatprep.mubr.bf16.mxu0 %v5589_v49 }
 0x422   :  { %5074 = vmatprep.subr.bf16.mxu0 %v4981_v36 }
 0x429   :  { %5075 = vmatpush1.bf16.xpose.msra.mxu0 %v4980_v28 }
 0x42a   :  { %5076 = vmatprep.subr.bf16.mxu0 %v4985_v20 }
 0x431   :  { %5077 = vmatpush1.bf16.xpose.msra.mxu0 %v4984_v54 }
 0x432   :  { %5078 = vmatprep.subr.bf16.mxu0 %v4989_v34 }
 0x439   :  { %5079 = vmatpush1.bf16.xpose.msra.mxu0 %v4988_v6 }
 0x43a   :  { %5080 = vmatprep.subr.bf16.mxu0 %v4993_v14 }
 0x441   :  { %5081 = vmatpush1.bf16.xpose.msra.mxu0 %v4992_v15 }
 0x442   :  { %5082 = vmatprep.subr.bf16.mxu0 %v4997_v8 }
 0x449   :  { %5083 = vmatpush1.bf16.xpose.msra.mxu0 %v4996_v23 }
 0x44a   :  { %5084 = vmatprep.subr.bf16.mxu0 %v5001_v55 }
 0x451   :  { %5085 = vmatpush1.bf16.xpose.msra.mxu0 %v5000_v17 }
 0x452   :  { %5086 = vmatprep.subr.bf16.mxu0 %v5005_v38 }
 0x459   :  { %5087 = vmatpush1.bf16.xpose.msra.mxu0 %v5004_v11 }
 0x460   :  { %5105 = vmatmul.mubr.bf16.vlgmr.msra.gmra.mrb[96].mxu0 %v5588_v31 }
 0x533   :  { %v5106_v56 = vpop.f32.mrb[96].mxu0 }
 0x534   :  { %v5814_v39 = vadd.f32 %v5106_v56, %v5016_v5  ;;  %v5108_v52 = vpop.f32.mrb[97].mxu0 }
 0x535   :  { %v5109_v24 = vpop.f32.mrb[98].mxu0 }
 0x536   :  { %5112 = vst [vmem:[%s9336_s9] sm:$0xff] %v5814_v39  ;;  %v5110_v43 = vpop.f32.mrb[99].mxu0 }

</bundles_post_ra>
